<compile_context>
chip_gen: v7x
topology: tpu7x:2x2x1
jax: 0.10.0
libtpu: 0.0.40
codegen_flags: <defaults>
</compile_context>

<pallas_src>
import jax
import jax.numpy as jnp
from jax.experimental import pallas as pl
from jax.experimental.pallas import tpu as pltpu

D_IN, D_H1, D_H2, D_OUT = 768, 1024, 512, 52
D_OUT_PAD = 128          # lane-dense padded class dim
NEG_BIG = -1e30          # bias on padded classes -> exp() == 0


def classifier_3lay_kernel(x_ref, w1_ref, b1_ref, w2_ref, b2_ref,
                           w3_ref, b3_ref, o_ref):
    # bf16 operands feed the MXU; accumulation / bias / ReLU / softmax in f32.
    x = x_ref[...].astype(jnp.bfloat16)                          # [TB, 768]

    # Layer 1: Linear(768, 1024) + Dropout(identity at inference) + ReLU
    h1 = jnp.dot(x, w1_ref[...], preferred_element_type=jnp.float32)
    h1 = jnp.maximum(h1 + b1_ref[...], 0.0).astype(jnp.bfloat16)  # [TB, 1024]

    # Layer 2: Linear(1024, 512) + ReLU
    h2 = jnp.dot(h1, w2_ref[...], preferred_element_type=jnp.float32)
    h2 = jnp.maximum(h2 + b2_ref[...], 0.0).astype(jnp.bfloat16)  # [TB, 512]

    # Layer 3: Linear(512, 52) (padded to 128 output lanes)
    logits = jnp.dot(h2, w3_ref[...], preferred_element_type=jnp.float32)
    logits = logits + b3_ref[...]                                # [TB, 128]

    # softmax over the class dim; padded columns have bias -1e30 -> exp == 0
    m = jnp.max(logits, axis=-1, keepdims=True)
    e = jnp.exp(logits - m)
    o_ref[...] = e * pl.reciprocal(jnp.sum(e, axis=-1, keepdims=True),
                                   approx=True)


def classifier_3lay_forward(pooler_output, params, *, batch_tile=256):
    """pooler_output: [B, 768] f32.  Returns softmax probabilities [B, 52]."""
    w1, b1, w2, b2, w3, b3 = params
    B = pooler_output.shape[0]
    tb = min(B, batch_tile)
    grid = (pl.cdiv(B, tb),)

    # Pad the class dim to a lane-dense 128 (weights: 0, bias: -1e30).
    w3p = jnp.pad(w3, ((0, 0), (0, D_OUT_PAD - D_OUT)))
    b3p = jnp.pad(b3, ((0, 0), (0, D_OUT_PAD - D_OUT)),
                  constant_values=NEG_BIG)

    flops = 2 * B * (D_IN * D_H1 + D_H1 * D_H2 + D_H2 * D_OUT_PAD)
    bytes_accessed = (
        (w1.size + w2.size + w3p.size) * 2          # bf16 weights
        + (b1.size + b2.size + b3p.size) * 4        # f32 biases
        + pooler_output.size * 4 + B * D_OUT_PAD * 4)

    probs_padded = pl.pallas_call(
        classifier_3lay_kernel,
        out_shape=jax.ShapeDtypeStruct((B, D_OUT_PAD), jnp.float32),
        grid=grid,
        in_specs=[
            pl.BlockSpec((tb, D_IN), lambda i: (i, 0)),        # x (per batch tile)
            pl.BlockSpec((D_IN, D_H1), lambda i: (0, 0)),      # w1 (resident)
            pl.BlockSpec((1, D_H1), lambda i: (0, 0)),         # b1
            pl.BlockSpec((D_H1, D_H2), lambda i: (0, 0)),      # w2 (resident)
            pl.BlockSpec((1, D_H2), lambda i: (0, 0)),         # b2
            pl.BlockSpec((D_H2, D_OUT_PAD), lambda i: (0, 0)),  # w3 (resident)
            pl.BlockSpec((1, D_OUT_PAD), lambda i: (0, 0)),    # b3
        ],
        out_specs=pl.BlockSpec((tb, D_OUT_PAD), lambda i: (i, 0)),
        compiler_params=pltpu.CompilerParams(
            dimension_semantics=("parallel",),
            vmem_limit_bytes=24 << 20),
        cost_estimate=pl.CostEstimate(
            flops=flops,
            transcendentals=B * D_OUT_PAD,
            bytes_accessed=bytes_accessed),
    )(pooler_output, w1, b1, w2, b2, w3p, b3p)

    return probs_padded[:, :D_OUT]


def init_params(key):
    """Deterministic init matching nn.Linear's U(-1/sqrt(fan_in), +1/sqrt(fan_in)).

    Weights are stored [in, out] (so the kernel computes x @ W == x @ W_torch.T)
    and cast to bf16 for storage/DMA; biases stay f32.
    """
    ks = jax.random.split(key, 6)

    def linear(kw, kb, fan_in, fan_out):
        bound = 1.0 / jnp.sqrt(float(fan_in))
        w = jax.random.uniform(kw, (fan_in, fan_out), jnp.float32, -bound, bound)
        b = jax.random.uniform(kb, (1, fan_out), jnp.float32, -bound, bound)
        return w.astype(jnp.bfloat16), b

    w1, b1 = linear(ks[0], ks[1], D_IN, D_H1)
    w2, b2 = linear(ks[2], ks[3], D_H1, D_H2)
    w3, b3 = linear(ks[4], ks[5], D_H2, D_OUT)
    return (w1, b1, w2, b2, w3, b3)


def reference_forward(x, params):
    """Pure-JAX f32 reference using the same bf16-valued weights/activations."""
    w1, b1, w2, b2, w3, b3 = params
    xb = x.astype(jnp.bfloat16).astype(jnp.float32)
    h1 = jnp.maximum(xb @ w1.astype(jnp.float32) + b1, 0.0)
    h1 = h1.astype(jnp.bfloat16).astype(jnp.float32)
    h2 = jnp.maximum(h1 @ w2.astype(jnp.float32) + b2, 0.0)
    h2 = h2.astype(jnp.bfloat16).astype(jnp.float32)
    logits = h2 @ w3.astype(jnp.float32) + b3
    return jax.nn.softmax(logits, axis=-1)


if __name__ == "__main__":
    key = jax.random.PRNGKey(0)
    k_x, k_p = jax.random.split(key)

    B = 8
    # Simulated BERT pooler_output (tanh-pooled CLS embedding), shape [B, 768].
    pooler_output = jnp.tanh(
        jax.random.normal(k_x, (B, D_IN), dtype=jnp.float32))

    params = init_params(k_p)

    probs = classifier_3lay_forward(pooler_output, params)
    probs = jax.block_until_ready(probs)

    # sanity: shape, softmax rows sum to ~1 (approx reciprocal => ~1e-3 slack)
    assert probs.shape == (B, D_OUT)
    row_sums = jnp.sum(probs, axis=-1)
    assert bool(jnp.all(jnp.abs(row_sums - 1.0) < 3e-3)), row_sums

    # reference check against a pure-JAX forward with the same bf16 weights
    ref = reference_forward(pooler_output, params)
    assert bool(jnp.all(jnp.abs(probs - ref) < 5e-3))

    print("KERNEL_OK")
</pallas_src>

<mosaic_0001>
module attributes {stable_mosaic.version = 11 : i64} {
  func.func @classifier_3lay_kernel(%arg0: i32, %arg1: memref<8x768xf32, #tpu.memory_space<vmem>>, %arg2: memref<768x1024xbf16, #tpu.memory_space<vmem>>, %arg3: memref<1x1024xf32, #tpu.memory_space<vmem>>, %arg4: memref<1024x512xbf16, #tpu.memory_space<vmem>>, %arg5: memref<1x512xf32, #tpu.memory_space<vmem>>, %arg6: memref<512x128xbf16, #tpu.memory_space<vmem>>, %arg7: memref<1x128xf32, #tpu.memory_space<vmem>>, %arg8: memref<8x128xf32, #tpu.memory_space<vmem>>) attributes {dimension_semantics = [#tpu.dimension_semantics<parallel>], iteration_bounds = array<i64: 1>, scalar_prefetch = 0 : i64, scratch_operands = 0 : i64, tpu.core_type = #tpu.core_type<tc>, window_params = [{transform_indices = @transform_0, window_bounds = array<i64: 8, 768>}, {pipeline_mode = #tpu.pipeline_mode<synchronous>, transform_indices = @transform_1, window_bounds = array<i64: 768, 1024>}, {pipeline_mode = #tpu.pipeline_mode<synchronous>, transform_indices = @transform_2, window_bounds = array<i64: 1, 1024>}, {pipeline_mode = #tpu.pipeline_mode<synchronous>, transform_indices = @transform_3, window_bounds = array<i64: 1024, 512>}, {pipeline_mode = #tpu.pipeline_mode<synchronous>, transform_indices = @transform_4, window_bounds = array<i64: 1, 512>}, {pipeline_mode = #tpu.pipeline_mode<synchronous>, transform_indices = @transform_5, window_bounds = array<i64: 512, 128>}, {pipeline_mode = #tpu.pipeline_mode<synchronous>, transform_indices = @transform_6, window_bounds = array<i64: 1, 128>}, {transform_indices = @transform_7, window_bounds = array<i64: 8, 128>}]} {
    %c0 = arith.constant 0 : index
    %c0_0 = arith.constant 0 : index
    %0 = vector.load %arg1[%c0, %c0_0] : memref<8x768xf32, #tpu.memory_space<vmem>>, vector<8x768xf32>
    %1 = arith.truncf %0 : vector<8x768xf32> to vector<8x768xbf16>
    %c0_1 = arith.constant 0 : index
    %c0_2 = arith.constant 0 : index
    %2 = vector.load %arg2[%c0_1, %c0_2] : memref<768x1024xbf16, #tpu.memory_space<vmem>>, vector<768x1024xbf16>
    %cst = arith.constant dense<0.000000e+00> : vector<8x1024xf32>
    %3 = tpu.matmul %1, %2, %cst {dimension_numbers = #tpu.dot_dimension_numbers<[1], [0], [0], [1], [0, 0, 1, 1], [], []>} : vector<8x768xbf16>, vector<768x1024xbf16>, vector<8x1024xf32> -> vector<8x1024xf32>
    %c0_3 = arith.constant 0 : index
    %c0_4 = arith.constant 0 : index
    %4 = vector.load %arg3[%c0_3, %c0_4] : memref<1x1024xf32, #tpu.memory_space<vmem>>, vector<1x1024xf32>
    %5 = vector.broadcast %4 : vector<1x1024xf32> to vector<8x1024xf32>
    %6 = arith.addf %3, %5 : vector<8x1024xf32>
    %cst_5 = arith.constant 0.000000e+00 : f32
    %7 = vector.broadcast %cst_5 : f32 to vector<8x1024xf32>
    %8 = arith.maximumf %6, %7 : vector<8x1024xf32>
    %9 = arith.truncf %8 : vector<8x1024xf32> to vector<8x1024xbf16>
    %c0_6 = arith.constant 0 : index
    %c0_7 = arith.constant 0 : index
    %10 = vector.load %arg4[%c0_6, %c0_7] : memref<1024x512xbf16, #tpu.memory_space<vmem>>, vector<1024x512xbf16>
    %cst_8 = arith.constant dense<0.000000e+00> : vector<8x512xf32>
    %11 = tpu.matmul %9, %10, %cst_8 {dimension_numbers = #tpu.dot_dimension_numbers<[1], [0], [0], [1], [0, 0, 1, 1], [], []>} : vector<8x1024xbf16>, vector<1024x512xbf16>, vector<8x512xf32> -> vector<8x512xf32>
    %c0_9 = arith.constant 0 : index
    %c0_10 = arith.constant 0 : index
    %12 = vector.load %arg5[%c0_9, %c0_10] : memref<1x512xf32, #tpu.memory_space<vmem>>, vector<1x512xf32>
    %13 = vector.broadcast %12 : vector<1x512xf32> to vector<8x512xf32>
    %14 = arith.addf %11, %13 : vector<8x512xf32>
    %cst_11 = arith.constant 0.000000e+00 : f32
    %15 = vector.broadcast %cst_11 : f32 to vector<8x512xf32>
    %16 = arith.maximumf %14, %15 : vector<8x512xf32>
    %17 = arith.truncf %16 : vector<8x512xf32> to vector<8x512xbf16>
    %c0_12 = arith.constant 0 : index
    %c0_13 = arith.constant 0 : index
    %18 = vector.load %arg6[%c0_12, %c0_13] : memref<512x128xbf16, #tpu.memory_space<vmem>>, vector<512x128xbf16>
    %cst_14 = arith.constant dense<0.000000e+00> : vector<8x128xf32>
    %19 = tpu.matmul %17, %18, %cst_14 {dimension_numbers = #tpu.dot_dimension_numbers<[1], [0], [0], [1], [0, 0, 1, 1], [], []>} : vector<8x512xbf16>, vector<512x128xbf16>, vector<8x128xf32> -> vector<8x128xf32>
    %c0_15 = arith.constant 0 : index
    %c0_16 = arith.constant 0 : index
    %20 = vector.load %arg7[%c0_15, %c0_16] : memref<1x128xf32, #tpu.memory_space<vmem>>, vector<1x128xf32>
    %21 = vector.broadcast %20 : vector<1x128xf32> to vector<8x128xf32>
    %22 = arith.addf %19, %21 : vector<8x128xf32>
    %cst_17 = arith.constant dense<0xFF800000> : vector<8xf32>
    %23 = vector.multi_reduction <maximumf>, %22, %cst_17 [1] : vector<8x128xf32> to vector<8xf32>
    %24 = vector.shape_cast %23 : vector<8xf32> to vector<8x1xf32>
    %25 = vector.broadcast %24 : vector<8x1xf32> to vector<8x128xf32>
    %26 = arith.subf %22, %25 : vector<8x128xf32>
    %27 = math.exp %26 : vector<8x128xf32>
    %cst_18 = arith.constant dense<0.000000e+00> : vector<8xf32>
    %28 = vector.multi_reduction <add>, %27, %cst_18 [1] : vector<8x128xf32> to vector<8xf32>
    %29 = vector.shape_cast %28 : vector<8xf32> to vector<8x1xf32>
    %30 = tpu.reciprocal %29 {approx = true} : vector<8x1xf32> -> vector<8x1xf32>
    %31 = vector.broadcast %30 : vector<8x1xf32> to vector<8x128xf32>
    %32 = arith.mulf %27, %31 : vector<8x128xf32>
    %c0_19 = arith.constant 0 : index
    %c0_20 = arith.constant 0 : index
    %33 = vector.load %arg8[%c0_19, %c0_20] : memref<8x128xf32, #tpu.memory_space<vmem>>, vector<8x128xf32>
    tpu.vector_store %arg8[%c0_19, %c0_20], %32 {strides = array<i32>} : memref<8x128xf32, #tpu.memory_space<vmem>>, vector<8x128xf32>,
    return
  }
  func.func @transform_0(%arg0: i32) -> (i32, i32) {
    %c0_i32 = arith.constant 0 : i32
    %c0_i32_0 = arith.constant 0 : i32
    return %arg0, %c0_i32 : i32, i32
  }
  func.func @transform_1(%arg0: i32) -> (i32, i32) {
    %c0_i32 = arith.constant 0 : i32
    %c0_i32_0 = arith.constant 0 : i32
    %c0_i32_1 = arith.constant 0 : i32
    return %c0_i32, %c0_i32_0 : i32, i32
  }
  func.func @transform_2(%arg0: i32) -> (i32, i32) {
    %c0_i32 = arith.constant 0 : i32
    %c0_i32_0 = arith.constant 0 : i32
    %c0_i32_1 = arith.constant 0 : i32
    return %c0_i32, %c0_i32_0 : i32, i32
  }
  func.func @transform_3(%arg0: i32) -> (i32, i32) {
    %c0_i32 = arith.constant 0 : i32
    %c0_i32_0 = arith.constant 0 : i32
    %c0_i32_1 = arith.constant 0 : i32
    return %c0_i32, %c0_i32_0 : i32, i32
  }
  func.func @transform_4(%arg0: i32) -> (i32, i32) {
    %c0_i32 = arith.constant 0 : i32
    %c0_i32_0 = arith.constant 0 : i32
    %c0_i32_1 = arith.constant 0 : i32
    return %c0_i32, %c0_i32_0 : i32, i32
  }
  func.func @transform_5(%arg0: i32) -> (i32, i32) {
    %c0_i32 = arith.constant 0 : i32
    %c0_i32_0 = arith.constant 0 : i32
    %c0_i32_1 = arith.constant 0 : i32
    return %c0_i32, %c0_i32_0 : i32, i32
  }
  func.func @transform_6(%arg0: i32) -> (i32, i32) {
    %c0_i32 = arith.constant 0 : i32
    %c0_i32_0 = arith.constant 0 : i32
    %c0_i32_1 = arith.constant 0 : i32
    return %c0_i32, %c0_i32_0 : i32, i32
  }
  func.func @transform_7(%arg0: i32) -> (i32, i32) {
    %c0_i32 = arith.constant 0 : i32
    %c0_i32_0 = arith.constant 0 : i32
    return %arg0, %c0_i32 : i32, i32
  }
}

</mosaic_0001>

<bundles_post_ra>
// kernel: tpu_custom_call.1
= control target key start
LH: loop header
LB: loop body
LE: loop exit
PB: predicated region body
PF: predicated region fallthrough
CT: control target
= control target key end

     0   :  { %12 = vsyncpa [#allocation3], 0  ;;  %s6885_s0 = inlined_call_operand.hbm [shape: f32[8,768], index: 0, kind: input, shape index: {}]   ;;  %s6886_s1 = inlined_call_operand.hbm [shape: bf16[768,1024], index: 1, kind: input, shape index: {}]   ;;  %s6887_s2 = inlined_call_operand.hbm [shape: f32[1,1024], index: 2, kind: input, shape index: {}]   ;;  %s6888_s3 = inlined_call_operand.hbm [shape: bf16[1024,512], index: 3, kind: input, shape index: {}]   ;;  %s6889_s4 = inlined_call_operand.hbm [shape: f32[1,512], index: 4, kind: input, shape index: {}]   ;;  %s6890_s5 = inlined_call_operand.hbm [shape: bf16[512,128], index: 5, kind: input, shape index: {}]   ;;  %s6891_s6 = inlined_call_operand.hbm [shape: f32[1,128], index: 6, kind: input, shape index: {}]   ;;  %s6892_s7 = inlined_call_operand.hbm [shape: f32[8,128], index: 7, kind: output, shape index: {}]  }
   0x1   :  { %13 = vsyncpa [#allocation6], 0 }
   0x2   :  { %14 = vsyncpa [#allocation9], 0 }
   0x3   :  { %15 = vsyncpa [#allocation12], 0 }
   0x4   :  { %16 = vsyncpa [#allocation4], 0  ;;  %s6652_s24 = smov [#allocation5]   ;;  %s6466_s28 = scalar_lea.hbm %s6886_s1, 49152 }
   0x5   :  { %s32_s25 = sshll.u32 %s6652_s24, 4  ;;  %p6467_p0 = scmp.ne.s32.totalorder %s6886_s1, %s6466_s28  ;;  %s33_s25 = int_to_ptr.vmem [resolvable:$true] %s32_s25 }
   0x6   :  { %p6470_p1 = scmp.lt.u32.totalorder %s6466_s28, %s6886_s1 }
   0x8   :  { %p6472_p2 = pnand %p6470_p1, %p6467_p0 }
   0xa   :  { %6475 = shalt.err (!%p6472_p2)
}
   0xb   :  { %s6476_s10 = scalar_lea.vmem %s33_s25, 49152  ;;  %p6481_p4 = scmp.lt.s32.totalorder %s33_s25, %s33_s25 }
   0xc   :  { %p6477_p3 = scmp.ne.s32.totalorder %s33_s25, %s6476_s10  ;;  %p6482_p5 = scmp.lt.s32.totalorder %s6476_s10, %s6476_s10 }
   0xe   :  { %p6483_p6 = por %p6482_p5, %p6481_p4 }
  0x10   :  { %p6484_p7 = pnand %p6483_p6, %p6477_p3 }
  0x12   :  { %6487 = shalt.err (!%p6484_p7)
}
  0x13   :  { %s6653_s11 = smov 512   ;;  %s6654_s12 = smov 32  }
  0x14   :  { %38 = dma.hbm_to_vmem [thread:$0]  %s6886_s1, 49152, %s33_s25, [#allocation6], %s6653_s11, %s6653_s11, %s6654_s12  }
  0x15   :  { %s6655_s15 = smov [#allocation8]   ;;  %s6488_s19 = scalar_lea.hbm %s6888_s3, 32768 }
  0x16   :  { %s54_s16 = sshll.u32 %s6655_s15, 4  ;;  %p6489_p8 = scmp.ne.s32.totalorder %s6888_s3, %s6488_s19  ;;  %s55_s16 = int_to_ptr.vmem [resolvable:$true] %s54_s16 }
  0x17   :  { %p6492_p9 = scmp.lt.u32.totalorder %s6488_s19, %s6888_s3 }
  0x19   :  { %p6494_p10 = pnand %p6492_p9, %p6489_p8 }
  0x1b   :  { %6497 = shalt.err (!%p6494_p10)
}
  0x1c   :  { %s6498_s24 = scalar_lea.vmem %s55_s16, 32768  ;;  %p6503_p12 = scmp.lt.s32.totalorder %s55_s16, %s55_s16 }
  0x1d   :  { %p6499_p11 = scmp.ne.s32.totalorder %s55_s16, %s6498_s24  ;;  %p6504_p13 = scmp.lt.s32.totalorder %s6498_s24, %s6498_s24 }
  0x1f   :  { %p6505_p0 = por %p6504_p13, %p6503_p12 }
  0x21   :  { %p6506_p1 = pnand %p6505_p0, %p6499_p11 }
  0x23   :  { %6509 = shalt.err (!%p6506_p1)
}
  0x24   :  { %s6656_s1 = smov 256   ;;  %s6657_s25 = smov 16  }
  0x25   :  { %60 = dma.hbm_to_vmem [thread:$0]  %s6888_s3, 32768, %s55_s16, [#allocation9], %s6656_s1, %s6656_s1, %s6657_s25  }
  0x26   :  { %s6658_s28 = smov [#allocation11]   ;;  %s6510_s9 = scalar_lea.hbm %s6890_s5, 4096 }
  0x27   :  { %s76_s29 = sshll.u32 %s6658_s28, 4  ;;  %p6511_p2 = scmp.ne.s32.totalorder %s6890_s5, %s6510_s9  ;;  %s77_s29 = int_to_ptr.vmem [resolvable:$true] %s76_s29 }
  0x28   :  { %p6514_p3 = scmp.lt.u32.totalorder %s6510_s9, %s6890_s5 }
  0x2a   :  { %p6516_p4 = pnand %p6514_p3, %p6511_p2 }
  0x2c   :  { %6519 = shalt.err (!%p6516_p4)
}
  0x2d   :  { %s6520_s14 = scalar_lea.vmem %s77_s29, 4096  ;;  %p6525_p6 = scmp.lt.s32.totalorder %s77_s29, %s77_s29 }
  0x2e   :  { %p6521_p5 = scmp.ne.s32.totalorder %s77_s29, %s6520_s14  ;;  %p6526_p7 = scmp.lt.s32.totalorder %s6520_s14, %s6520_s14 }
  0x30   :  { %p6527_p8 = por %p6526_p7, %p6525_p6 }
  0x32   :  { %p6528_p9 = pnand %p6527_p8, %p6521_p5 }
  0x34   :  { %6531 = shalt.err (!%p6528_p9)
}
  0x35   :  { %s6659_s3 = smov 64   ;;  %s6660_s15 = smov 4  }
  0x36   :  { %82 = dma.hbm_to_vmem [thread:$0]  %s6890_s5, 4096, %s77_s29, [#allocation12], %s6659_s3, %s6659_s3, %s6660_s15  }
  0x37   :  { %s6661_s18 = smov [#allocation2]   ;;  %s6662_s20 = smov [#allocation7]  }
  0x38   :  { %s23_s19 = sshll.u32 %s6661_s18, 4  ;;  %s45_s21 = sshll.u32 %s6662_s20, 4  ;;  %s24_s19 = int_to_ptr.vmem [resolvable:$true] %s23_s19  ;;  %s46_s21 = int_to_ptr.vmem [resolvable:$true] %s45_s21 }
  0x39   :  { %s6532_s24 = scalar_lea.hbm %s6885_s0, 768 }
  0x3a   :  { %p6533_p10 = scmp.ne.s32.totalorder %s6885_s0, %s6532_s24  ;;  %p6536_p11 = scmp.lt.u32.totalorder %s6532_s24, %s6885_s0 }
  0x3c   :  { %p6538_p12 = pnand %p6536_p11, %p6533_p10 }
  0x3e   :  { %6541 = shalt.err (!%p6538_p12)
}
  0x3f   :  { %s6542_s5 = scalar_lea.vmem %s24_s19, 768  ;;  %p6547_p0 = scmp.lt.s32.totalorder %s24_s19, %s24_s19 }
  0x40   :  { %p6543_p13 = scmp.ne.s32.totalorder %s24_s19, %s6542_s5  ;;  %p6548_p1 = scmp.lt.s32.totalorder %s6542_s5, %s6542_s5 }
  0x42   :  { %p6549_p2 = por %p6548_p1, %p6547_p0 }
  0x44   :  { %p6550_p3 = pnand %p6549_p2, %p6543_p13 }
  0x46   :  { %6553 = shalt.err (!%p6550_p3)
}
  0x47   :  { %26 = dma.hbm_to_vmem [thread:$0]  %s6885_s0, 768, %s24_s19, [#allocation3]  }
  0x48   :  { %s6554_s9 = scalar_lea.hbm %s6887_s2, 128 }
  0x49   :  { %p6555_p4 = scmp.ne.s32.totalorder %s6887_s2, %s6554_s9  ;;  %p6558_p5 = scmp.lt.u32.totalorder %s6554_s9, %s6887_s2 }
  0x4b   :  { %p6560_p6 = pnand %p6558_p5, %p6555_p4 }
  0x4d   :  { %6563 = shalt.err (!%p6560_p6)
}
  0x4e   :  { %s6564_s14 = scalar_lea.vmem %s46_s21, 128  ;;  %p6569_p8 = scmp.lt.s32.totalorder %s46_s21, %s46_s21 }
  0x4f   :  { %p6565_p7 = scmp.ne.s32.totalorder %s46_s21, %s6564_s14  ;;  %p6570_p9 = scmp.lt.s32.totalorder %s6564_s14, %s6564_s14 }
  0x51   :  { %p6571_p10 = por %p6570_p9, %p6569_p8 }
  0x53   :  { %p6572_p11 = pnand %p6571_p10, %p6565_p7 }
  0x55   :  { %6575 = shalt.err (!%p6572_p11)
}
  0x56   :  { %48 = dma.hbm_to_vmem [thread:$0]  %s6887_s2, 128, %s46_s21, [#allocation6]  }
  0x57   :  { %s6663_s15 = smov [#allocation10]   ;;  %s6664_s17 = smov [#allocation13]  }
  0x58   :  { %s67_s16 = sshll.u32 %s6663_s15, 4  ;;  %s89_s18 = sshll.u32 %s6664_s17, 4  ;;  %s68_s16 = int_to_ptr.vmem [resolvable:$true] %s67_s16  ;;  %s90_s18 = int_to_ptr.vmem [resolvable:$true] %s89_s18 }
  0x59   :  { %s6576_s22 = scalar_lea.hbm %s6889_s4, 64 }
  0x5a   :  { %p6577_p12 = scmp.ne.s32.totalorder %s6889_s4, %s6576_s22  ;;  %p6580_p13 = scmp.lt.u32.totalorder %s6576_s22, %s6889_s4 }
  0x5c   :  { %p6582_p0 = pnand %p6580_p13, %p6577_p12 }
  0x5e   :  { %6585 = shalt.err (!%p6582_p0)
}
  0x5f   :  { %s6586_s2 = scalar_lea.vmem %s68_s16, 64  ;;  %p6591_p2 = scmp.lt.s32.totalorder %s68_s16, %s68_s16 }
  0x60   :  { %p6587_p1 = scmp.ne.s32.totalorder %s68_s16, %s6586_s2  ;;  %p6592_p3 = scmp.lt.s32.totalorder %s6586_s2, %s6586_s2 }
  0x62   :  { %p6593_p4 = por %p6592_p3, %p6591_p2 }
  0x64   :  { %p6594_p5 = pnand %p6593_p4, %p6587_p1 }
  0x66   :  { %6597 = shalt.err (!%p6594_p5)
}
  0x67   :  { %70 = dma.hbm_to_vmem [thread:$0]  %s6889_s4, 64, %s68_s16, [#allocation9]  }
  0x68   :  { %s6598_s28 = scalar_lea.hbm %s6891_s6, 16 }
  0x69   :  { %p6599_p6 = scmp.ne.s32.totalorder %s6891_s6, %s6598_s28  ;;  %p6602_p7 = scmp.lt.u32.totalorder %s6598_s28, %s6891_s6 }
  0x6b   :  { %p6604_p8 = pnand %p6602_p7, %p6599_p6 }
  0x6d   :  { %6607 = shalt.err (!%p6604_p8)
}
  0x6e   :  { %s6608_s10 = scalar_lea.vmem %s90_s18, 16  ;;  %s6612_s11 = scalar_lea.vmem %s90_s18, 32 }
  0x6f   :  { %p6609_p9 = scmp.ne.s32.totalorder %s90_s18, %s6608_s10  ;;  %p6613_p10 = scmp.lt.s32.totalorder %s90_s18, %s90_s18 }
  0x70   :  { %p6614_p11 = scmp.lt.s32.totalorder %s6612_s11, %s6608_s10 }
  0x72   :  { %p6615_p12 = por %p6614_p11, %p6613_p10 }
  0x74   :  { %p6616_p13 = pnand %p6615_p12, %p6609_p9 }
  0x76   :  { %6619 = shalt.err (!%p6616_p13)
}
  0x77   :  { %92 = dma.hbm_to_vmem [thread:$0]  %s6891_s6, 16, %s90_s18, [#allocation12]  }
  0x78   :  { %6642 = dma.done.wait [#allocation3], 768  }
  0x79   :  { %6643 = vsyncadd [#allocation3], 4294966528 }
  0x7a   :  { %6644 = dma.done.wait [#allocation6], 49280  }
  0x7b   :  { %6645 = vsyncadd [#allocation6], 4294918016 }
  0x7c   :  { %6646 = dma.done.wait [#allocation9], 32832  }
  0x7d   :  { %6647 = vsyncadd [#allocation9], 4294934464 }
  0x7e   :  { %6648 = dma.done.wait [#allocation12], 4112  }
  0x7f   :  { %6649 = vsyncadd [#allocation12], 4294963184  ;;  %v127_v0 = vld [vmem:[#allocation5] sm:$0xff]  ;;  %v128_v2 = vld [vmem:[#allocation5 + $0x8] sm:$0xff]  ;;  %s6665_s6 = smov [#allocation14]  }
  0x80   :  { %v131_v1 = vld [vmem:[#allocation5 + $0x20] sm:$0xff]  ;;  %v132_v4 = vld [vmem:[#allocation5 + $0x28] sm:$0xff]  ;;  %v116_v53 = vld [vmem:[#allocation2 + $0x8] sm:$0xff]  ;;  %s5234_s13 = sshll.u32 %s6665_s6, 4  ;;  %s5235_s13 = int_to_ptr.vmem [resolvable:$true] %s5234_s13 }
  0x81   :  { %v5247_v3 = vcombine.high %v127_v0, %v131_v1  ;;  %v5246_v5 = vcombine.low %v127_v0, %v131_v1  ;;  %v135_v6 = vld [vmem:[#allocation5 + $0x40] sm:$0xff]  ;;  %v5249_v8 = vcombine.high %v128_v2, %v132_v4  ;;  %v5248_v9 = vcombine.low %v128_v2, %v132_v4  ;;  %v136_v11 = vld [vmem:[#allocation5 + $0x48] sm:$0xff]  ;;  %s6620_s14 = scalar_lea.vmem %s5235_s13, 128  ;;  %p6625_p1 = scmp.lt.s32.totalorder %s5235_s13, %s5235_s13 }
  0x82   :  { %v139_v7 = vld [vmem:[#allocation5 + $0x60] sm:$0xff]  ;;  %v140_v12 = vld [vmem:[#allocation5 + $0x68] sm:$0xff]  ;;  %v6790_v57 = vpack.c.bf16 %v116_v53, %v116_v53  ;;  %p6621_p0 = scmp.ne.s32.totalorder %s5235_s13, %s6620_s14  ;;  %p6626_p2 = scmp.lt.s32.totalorder %s6620_s14, %s6620_s14 }
  0x83   :  { %v5255_v10 = vcombine.high %v135_v6, %v139_v7  ;;  %v143_v13 = vld [vmem:[#allocation5 + $0x80] sm:$0xff]  ;;  %2473 = vmatprep.subr.bf16.mxu0 %v5247_v3  ;;  %v5257_v14 = vcombine.high %v136_v11, %v140_v12  ;;  %v144_v16 = vld [vmem:[#allocation5 + $0x88] sm:$0xff]  ;;  %2596 = vmatprep.subr.bf16.mxu1 %v5249_v8  ;;  %v5254_v18 = vcombine.low %v135_v6, %v139_v7 }
  0x84   :  { %v147_v15 = vld [vmem:[#allocation5 + $0xa0] sm:$0xff]  ;;  %v148_v17 = vld [vmem:[#allocation5 + $0xa8] sm:$0xff]  ;;  %2474 = vmatpush1.bf16.msra.mxu0 %v5246_v5  ;;  %2597 = vmatpush1.bf16.msra.mxu1 %v5248_v9  ;;  %v5256_v19 = vcombine.low %v136_v11, %v140_v12  ;;  %p6627_p3 = por %p6626_p2, %p6625_p1 }
  0x85   :  { %2475 = vmatprep.subr.bf16.mxu0 %v5255_v10  ;;  %v5263_v20 = vcombine.high %v143_v13, %v147_v15  ;;  %2598 = vmatprep.subr.bf16.mxu1 %v5257_v14  ;;  %v5265_v21 = vcombine.high %v144_v16, %v148_v17  ;;  %v151_v22 = vld [vmem:[#allocation5 + $0xc0] sm:$0xff]  ;;  %v152_v24 = vld [vmem:[#allocation5 + $0xc8] sm:$0xff]  ;;  %v5262_v26 = vcombine.low %v143_v13, %v147_v15 }
  0x86   :  { %v155_v23 = vld [vmem:[#allocation5 + $0xe0] sm:$0xff]  ;;  %v156_v25 = vld [vmem:[#allocation5 + $0xe8] sm:$0xff]  ;;  %v5264_v27 = vcombine.low %v144_v16, %v148_v17  ;;  %2505 = vmatprep.mubr.bf16.mxu0 %v6790_v57  ;;  %2628 = vmatprep.mubr.bf16.mxu1 %v6790_v57  ;;  %p6628_p4 = pnand %p6627_p3, %p6621_p0 }
  0x87   :  { %v5271_v28 = vcombine.high %v151_v22, %v155_v23  ;;  %v5273_v29 = vcombine.high %v152_v24, %v156_v25  ;;  %v159_v30 = vld [vmem:[#allocation5 + $0x100] sm:$0xff]  ;;  %v160_v32 = vld [vmem:[#allocation5 + $0x108] sm:$0xff]  ;;  %v5270_v34 = vcombine.low %v151_v22, %v155_v23  ;;  %v5272_v35 = vcombine.low %v152_v24, %v156_v25 }
  0x88   :  { %2476 = vmatpush1.bf16.msra.mxu0 %v5254_v18  ;;  %2599 = vmatpush1.bf16.msra.mxu1 %v5256_v19  ;;  %v163_v31 = vld [vmem:[#allocation5 + $0x120] sm:$0xff]  ;;  %v164_v33 = vld [vmem:[#allocation5 + $0x128] sm:$0xff] }
  0x89   :  { %2477 = vmatprep.subr.bf16.mxu0 %v5263_v20  ;;  %2600 = vmatprep.subr.bf16.mxu1 %v5265_v21  ;;  %v5279_v36 = vcombine.high %v159_v30, %v163_v31  ;;  %v5281_v37 = vcombine.high %v160_v32, %v164_v33  ;;  %v167_v38 = vld [vmem:[#allocation5 + $0x140] sm:$0xff]  ;;  %v168_v40 = vld [vmem:[#allocation5 + $0x148] sm:$0xff]  ;;  %v5278_v42 = vcombine.low %v159_v30, %v163_v31 }
  0x8a   :  { %v171_v39 = vld [vmem:[#allocation5 + $0x160] sm:$0xff]  ;;  %v172_v41 = vld [vmem:[#allocation5 + $0x168] sm:$0xff]  ;;  %v5280_v43 = vcombine.low %v160_v32, %v164_v33 }
  0x8b   :  { %v5287_v44 = vcombine.high %v167_v38, %v171_v39  ;;  %v5289_v45 = vcombine.high %v168_v40, %v172_v41  ;;  %v175_v46 = vld [vmem:[#allocation5 + $0x180] sm:$0xff]  ;;  %v176_v48 = vld [vmem:[#allocation5 + $0x188] sm:$0xff]  ;;  %v5286_v50 = vcombine.low %v167_v38, %v171_v39  ;;  %v5288_v51 = vcombine.low %v168_v40, %v172_v41 }
  0x8c   :  { %2478 = vmatpush1.bf16.msra.mxu0 %v5262_v26  ;;  %2601 = vmatpush1.bf16.msra.mxu1 %v5264_v27  ;;  %v179_v47 = vld [vmem:[#allocation5 + $0x1a0] sm:$0xff]  ;;  %v180_v49 = vld [vmem:[#allocation5 + $0x1a8] sm:$0xff] }
  0x8d   :  { %2479 = vmatprep.subr.bf16.mxu0 %v5271_v28  ;;  %2602 = vmatprep.subr.bf16.mxu1 %v5273_v29  ;;  %v5295_v52 = vcombine.high %v175_v46, %v179_v47  ;;  %v5297_v54 = vcombine.high %v176_v48, %v180_v49  ;;  %v183_v55 = vld [vmem:[#allocation5 + $0x1c0] sm:$0xff]  ;;  %v184_v58 = vld [vmem:[#allocation5 + $0x1c8] sm:$0xff]  ;;  %v5294_v60 = vcombine.low %v175_v46, %v179_v47 }
  0x8e   :  { %v187_v56 = vld [vmem:[#allocation5 + $0x1e0] sm:$0xff]  ;;  %v188_v59 = vld [vmem:[#allocation5 + $0x1e8] sm:$0xff]  ;;  %v5296_v61 = vcombine.low %v176_v48, %v180_v49 }
  0x8f   :  { %v5303_v62 = vcombine.high %v183_v55, %v187_v56  ;;  %v5305_v63 = vcombine.high %v184_v58, %v188_v59  ;;  %v191_v0 = vld [vmem:[#allocation5 + $0x200] sm:$0xff]  ;;  %v192_v2 = vld [vmem:[#allocation5 + $0x208] sm:$0xff]  ;;  %v5302_v4 = vcombine.low %v183_v55, %v187_v56  ;;  %v5304_v5 = vcombine.low %v184_v58, %v188_v59 }
  0x90   :  { %2480 = vmatpush1.bf16.msra.mxu0 %v5270_v34  ;;  %2603 = vmatpush1.bf16.msra.mxu1 %v5272_v35  ;;  %v195_v1 = vld [vmem:[#allocation5 + $0x220] sm:$0xff]  ;;  %v196_v3 = vld [vmem:[#allocation5 + $0x228] sm:$0xff] }
  0x91   :  { %2481 = vmatprep.subr.bf16.mxu0 %v5279_v36  ;;  %2604 = vmatprep.subr.bf16.mxu1 %v5281_v37  ;;  %v5311_v6 = vcombine.high %v191_v0, %v195_v1  ;;  %v5313_v7 = vcombine.high %v192_v2, %v196_v3  ;;  %v199_v8 = vld [vmem:[#allocation5 + $0x240] sm:$0xff]  ;;  %v200_v10 = vld [vmem:[#allocation5 + $0x248] sm:$0xff]  ;;  %v5310_v12 = vcombine.low %v191_v0, %v195_v1 }
  0x92   :  { %v203_v9 = vld [vmem:[#allocation5 + $0x260] sm:$0xff]  ;;  %v204_v11 = vld [vmem:[#allocation5 + $0x268] sm:$0xff]  ;;  %v5312_v13 = vcombine.low %v192_v2, %v196_v3 }
  0x93   :  { %v5319_v14 = vcombine.high %v199_v8, %v203_v9  ;;  %v5321_v15 = vcombine.high %v200_v10, %v204_v11  ;;  %v207_v16 = vld [vmem:[#allocation5 + $0x280] sm:$0xff]  ;;  %v208_v18 = vld [vmem:[#allocation5 + $0x288] sm:$0xff]  ;;  %v5318_v20 = vcombine.low %v199_v8, %v203_v9  ;;  %v5320_v21 = vcombine.low %v200_v10, %v204_v11 }
  0x94   :  { %2482 = vmatpush1.bf16.msra.mxu0 %v5278_v42  ;;  %2605 = vmatpush1.bf16.msra.mxu1 %v5280_v43  ;;  %v211_v17 = vld [vmem:[#allocation5 + $0x2a0] sm:$0xff]  ;;  %v212_v19 = vld [vmem:[#allocation5 + $0x2a8] sm:$0xff] }
  0x95   :  { %2483 = vmatprep.subr.bf16.mxu0 %v5287_v44  ;;  %2606 = vmatprep.subr.bf16.mxu1 %v5289_v45  ;;  %v5327_v22 = vcombine.high %v207_v16, %v211_v17  ;;  %v5329_v23 = vcombine.high %v208_v18, %v212_v19  ;;  %v215_v24 = vld [vmem:[#allocation5 + $0x2c0] sm:$0xff]  ;;  %v216_v26 = vld [vmem:[#allocation5 + $0x2c8] sm:$0xff]  ;;  %v5326_v28 = vcombine.low %v207_v16, %v211_v17 }
  0x96   :  { %v219_v25 = vld [vmem:[#allocation5 + $0x2e0] sm:$0xff]  ;;  %v220_v27 = vld [vmem:[#allocation5 + $0x2e8] sm:$0xff]  ;;  %v5328_v29 = vcombine.low %v208_v18, %v212_v19 }
  0x97   :  { %v5335_v30 = vcombine.high %v215_v24, %v219_v25  ;;  %v5337_v31 = vcombine.high %v216_v26, %v220_v27  ;;  %v223_v32 = vld [vmem:[#allocation5 + $0x300] sm:$0xff]  ;;  %v224_v34 = vld [vmem:[#allocation5 + $0x308] sm:$0xff]  ;;  %v5334_v36 = vcombine.low %v215_v24, %v219_v25  ;;  %v5336_v37 = vcombine.low %v216_v26, %v220_v27 }
  0x98   :  { %2484 = vmatpush1.bf16.msra.mxu0 %v5286_v50  ;;  %2607 = vmatpush1.bf16.msra.mxu1 %v5288_v51  ;;  %v227_v33 = vld [vmem:[#allocation5 + $0x320] sm:$0xff]  ;;  %v228_v35 = vld [vmem:[#allocation5 + $0x328] sm:$0xff] }
  0x99   :  { %2485 = vmatprep.subr.bf16.mxu0 %v5295_v52  ;;  %2608 = vmatprep.subr.bf16.mxu1 %v5297_v54  ;;  %v5343_v38 = vcombine.high %v223_v32, %v227_v33  ;;  %v5345_v39 = vcombine.high %v224_v34, %v228_v35  ;;  %v231_v40 = vld [vmem:[#allocation5 + $0x340] sm:$0xff]  ;;  %v232_v42 = vld [vmem:[#allocation5 + $0x348] sm:$0xff]  ;;  %v5342_v44 = vcombine.low %v223_v32, %v227_v33 }
  0x9a   :  { %v235_v41 = vld [vmem:[#allocation5 + $0x360] sm:$0xff]  ;;  %v236_v43 = vld [vmem:[#allocation5 + $0x368] sm:$0xff]  ;;  %v5344_v45 = vcombine.low %v224_v34, %v228_v35 }
  0x9b   :  { %v5351_v46 = vcombine.high %v231_v40, %v235_v41  ;;  %v5353_v47 = vcombine.high %v232_v42, %v236_v43  ;;  %v239_v48 = vld [vmem:[#allocation5 + $0x380] sm:$0xff]  ;;  %v240_v50 = vld [vmem:[#allocation5 + $0x388] sm:$0xff]  ;;  %v5350_v52 = vcombine.low %v231_v40, %v235_v41  ;;  %v5352_v53 = vcombine.low %v232_v42, %v236_v43 }
  0x9c   :  { %2486 = vmatpush1.bf16.msra.mxu0 %v5294_v60  ;;  %2609 = vmatpush1.bf16.msra.mxu1 %v5296_v61  ;;  %v243_v49 = vld [vmem:[#allocation5 + $0x3a0] sm:$0xff]  ;;  %v244_v51 = vld [vmem:[#allocation5 + $0x3a8] sm:$0xff] }
  0x9d   :  { %2487 = vmatprep.subr.bf16.mxu0 %v5303_v62  ;;  %2610 = vmatprep.subr.bf16.mxu1 %v5305_v63  ;;  %v5359_v54 = vcombine.high %v239_v48, %v243_v49  ;;  %v5361_v55 = vcombine.high %v240_v50, %v244_v51  ;;  %v247_v56 = vld [vmem:[#allocation5 + $0x3c0] sm:$0xff]  ;;  %v248_v59 = vld [vmem:[#allocation5 + $0x3c8] sm:$0xff]  ;;  %v5358_v61 = vcombine.low %v239_v48, %v243_v49 }
  0x9e   :  { %v251_v58 = vld [vmem:[#allocation5 + $0x3e0] sm:$0xff]  ;;  %v252_v60 = vld [vmem:[#allocation5 + $0x3e8] sm:$0xff]  ;;  %v5360_v62 = vcombine.low %v240_v50, %v244_v51 }
  0x9f   :  { %v5367_v63 = vcombine.high %v247_v56, %v251_v58  ;;  %v5369_v0 = vcombine.high %v248_v59, %v252_v60  ;;  %v255_v1 = vld [vmem:[#allocation5 + $0x400] sm:$0xff]  ;;  %v256_v3 = vld [vmem:[#allocation5 + $0x408] sm:$0xff] }
  0xa0   :  { %2488 = vmatpush1.bf16.msra.mxu0 %v5302_v4  ;;  %2611 = vmatpush1.bf16.msra.mxu1 %v5304_v5  ;;  %v259_v2 = vld [vmem:[#allocation5 + $0x420] sm:$0xff]  ;;  %v260_v4 = vld [vmem:[#allocation5 + $0x428] sm:$0xff]  ;;  %v5366_v5 = vcombine.low %v247_v56, %v251_v58 }
  0xa1   :  { %2489 = vmatprep.subr.bf16.mxu0 %v5311_v6  ;;  %2612 = vmatprep.subr.bf16.mxu1 %v5313_v7  ;;  %v115_v6 = vld [vmem:[#allocation2] sm:$0xff]  ;;  %v5368_v7 = vcombine.low %v248_v59, %v252_v60  ;;  %v5375_v8 = vcombine.high %v255_v1, %v259_v2  ;;  %v5377_v9 = vcombine.high %v256_v3, %v260_v4  ;;  %v263_v10 = vld [vmem:[#allocation5 + $0x440] sm:$0xff]  ;;  %v276_v24 = vld [vmem:[#allocation5 + $0x4a8] sm:$0xff] }
  0xa2   :  { %v267_v11 = vld [vmem:[#allocation5 + $0x460] sm:$0xff]  ;;  %v5374_v16 = vcombine.low %v255_v1, %v259_v2  ;;  %v5376_v17 = vcombine.low %v256_v3, %v260_v4  ;;  %v284_v32 = vld [vmem:[#allocation5 + $0x4e8] sm:$0xff] }
  0xa3   :  { %v5383_v18 = vcombine.high %v263_v10, %v267_v11  ;;  %v5382_v25 = vcombine.low %v263_v10, %v267_v11  ;;  %v292_v40 = vld [vmem:[#allocation5 + $0x528] sm:$0xff] }
  0xa4   :  { %2490 = vmatpush1.bf16.msra.mxu0 %v5310_v12  ;;  %2613 = vmatpush1.bf16.msra.mxu1 %v5312_v13  ;;  %v6794_v12 = vpack.c.bf16 %v115_v6, %v115_v6  ;;  %v264_v13 = vld [vmem:[#allocation5 + $0x448] sm:$0xff]  ;;  %v323_v6 = vld [vmem:[#allocation5 + $0x620] sm:$0xff] }
  0xa5   :  { %2491 = vmatprep.subr.bf16.mxu0 %v5319_v14  ;;  %2614 = vmatprep.subr.bf16.mxu1 %v5321_v15  ;;  %v268_v14 = vld [vmem:[#allocation5 + $0x468] sm:$0xff] }
  0xa6   :  { %v118_v15 = vld [vmem:[#allocation2 + $0x18] sm:$0xff]  ;;  %v5385_v19 = vcombine.high %v264_v13, %v268_v14  ;;  %v5384_v26 = vcombine.low %v264_v13, %v268_v14  ;;  %v327_v14 = vld [vmem:[#allocation5 + $0x640] sm:$0xff] }
  0xa7   :  { %v300_v48 = vld [vmem:[#allocation5 + $0x568] sm:$0xff] }
  0xa8   :  { %2492 = vmatpush1.bf16.msra.mxu0 %v5318_v20  ;;  %2615 = vmatpush1.bf16.msra.mxu1 %v5320_v21  ;;  %v271_v20 = vld [vmem:[#allocation5 + $0x480] sm:$0xff]  ;;  %v308_v56 = vld [vmem:[#allocation5 + $0x5a8] sm:$0xff] }
  0xa9   :  { %2493 = vmatprep.subr.bf16.mxu0 %v5327_v22  ;;  %2616 = vmatprep.subr.bf16.mxu1 %v5329_v23  ;;  %v275_v21 = vld [vmem:[#allocation5 + $0x4a0] sm:$0xff]  ;;  %v272_v22 = vld [vmem:[#allocation5 + $0x488] sm:$0xff]  ;;  %v6796_v23 = vpack.c.bf16 %v118_v15, %v118_v15 }
  0xaa   :  { %v5391_v27 = vcombine.high %v271_v20, %v275_v21  ;;  %v5390_v33 = vcombine.low %v271_v20, %v275_v21  ;;  %v5392_v34 = vcombine.low %v272_v22, %v276_v24  ;;  %v316_v1 = vld [vmem:[#allocation5 + $0x5e8] sm:$0xff]  ;;  %v331_v15 = vld [vmem:[#allocation5 + $0x660] sm:$0xff] }
  0xab   :  { %v5447_v21 = vcombine.high %v327_v14, %v331_v15 }
  0xac   :  { %2494 = vmatpush1.bf16.msra.mxu0 %v5326_v28  ;;  %2617 = vmatpush1.bf16.msra.mxu1 %v5328_v29  ;;  %v279_v28 = vld [vmem:[#allocation5 + $0x4c0] sm:$0xff] }
  0xad   :  { %2495 = vmatprep.subr.bf16.mxu0 %v5335_v30  ;;  %2618 = vmatprep.subr.bf16.mxu1 %v5337_v31  ;;  %v283_v29 = vld [vmem:[#allocation5 + $0x4e0] sm:$0xff]  ;;  %v280_v30 = vld [vmem:[#allocation5 + $0x4c8] sm:$0xff]  ;;  %v5393_v31 = vcombine.high %v272_v22, %v276_v24 }
  0xae   :  { %v5399_v35 = vcombine.high %v279_v28, %v283_v29  ;;  %v5398_v41 = vcombine.low %v279_v28, %v283_v29  ;;  %v5400_v42 = vcombine.low %v280_v30, %v284_v32  ;;  %v335_v22 = vld [vmem:[#allocation5 + $0x680] sm:$0xff]  ;;  %v5446_v28 = vcombine.low %v327_v14, %v331_v15 }
  0xaf   :  { %v339_v24 = vld [vmem:[#allocation5 + $0x6a0] sm:$0xff] }
  0xb0   :  { %2496 = vmatpush1.bf16.msra.mxu0 %v5334_v36  ;;  %2619 = vmatpush1.bf16.msra.mxu1 %v5336_v37  ;;  %v287_v36 = vld [vmem:[#allocation5 + $0x500] sm:$0xff] }
  0xb1   :  { %2497 = vmatprep.subr.bf16.mxu0 %v5343_v38  ;;  %2620 = vmatprep.subr.bf16.mxu1 %v5345_v39  ;;  %v291_v37 = vld [vmem:[#allocation5 + $0x520] sm:$0xff]  ;;  %v288_v38 = vld [vmem:[#allocation5 + $0x508] sm:$0xff]  ;;  %v5401_v39 = vcombine.high %v280_v30, %v284_v32  ;;  %v5455_v30 = vcombine.high %v335_v22, %v339_v24 }
  0xb2   :  { %v5407_v43 = vcombine.high %v287_v36, %v291_v37  ;;  %v5406_v49 = vcombine.low %v287_v36, %v291_v37  ;;  %v5408_v50 = vcombine.low %v288_v38, %v292_v40  ;;  %v347_v32 = vld [vmem:[#allocation5 + $0x6e0] sm:$0xff]  ;;  %v5454_v36 = vcombine.low %v335_v22, %v339_v24  ;;  %v120_v24 = vld [vmem:[#allocation2 + $0x28] sm:$0xff] }
  0xb3   :  { %v117_v14 = vld [vmem:[#allocation2 + $0x10] sm:$0xff] }
  0xb4   :  { %2498 = vmatpush1.bf16.msra.mxu0 %v5342_v44  ;;  %2621 = vmatpush1.bf16.msra.mxu1 %v5344_v45  ;;  %v295_v44 = vld [vmem:[#allocation5 + $0x540] sm:$0xff] }
  0xb5   :  { %2499 = vmatprep.subr.bf16.mxu0 %v5351_v46  ;;  %2622 = vmatprep.subr.bf16.mxu1 %v5353_v47  ;;  %v299_v45 = vld [vmem:[#allocation5 + $0x560] sm:$0xff]  ;;  %v296_v46 = vld [vmem:[#allocation5 + $0x548] sm:$0xff]  ;;  %v5409_v47 = vcombine.high %v288_v38, %v292_v40 }
  0xb6   :  { %v5415_v51 = vcombine.high %v295_v44, %v299_v45  ;;  %v5414_v58 = vcombine.low %v295_v44, %v299_v45  ;;  %v5416_v59 = vcombine.low %v296_v46, %v300_v48  ;;  %v355_v40 = vld [vmem:[#allocation5 + $0x720] sm:$0xff] }
  0xb8   :  { %2500 = vmatpush1.bf16.msra.mxu0 %v5350_v52  ;;  %2623 = vmatpush1.bf16.msra.mxu1 %v5352_v53  ;;  %v303_v52 = vld [vmem:[#allocation5 + $0x580] sm:$0xff] }
  0xb9   :  { %2501 = vmatprep.subr.bf16.mxu0 %v5359_v54  ;;  %2624 = vmatprep.subr.bf16.mxu1 %v5361_v55  ;;  %v307_v53 = vld [vmem:[#allocation5 + $0x5a0] sm:$0xff]  ;;  %v304_v54 = vld [vmem:[#allocation5 + $0x588] sm:$0xff]  ;;  %v5417_v55 = vcombine.high %v296_v46, %v300_v48 }
  0xba   :  { %v5423_v60 = vcombine.high %v303_v52, %v307_v53  ;;  %v5422_v2 = vcombine.low %v303_v52, %v307_v53  ;;  %v5424_v3 = vcombine.low %v304_v54, %v308_v56  ;;  %v363_v48 = vld [vmem:[#allocation5 + $0x760] sm:$0xff] }
  0xbc   :  { %2502 = vmatpush1.bf16.msra.mxu0 %v5358_v61  ;;  %2625 = vmatpush1.bf16.msra.mxu1 %v5360_v62  ;;  %v311_v61 = vld [vmem:[#allocation5 + $0x5c0] sm:$0xff] }
  0xbd   :  { %2503 = vmatprep.subr.bf16.mxu0 %v5367_v63  ;;  %2626 = vmatprep.subr.bf16.mxu1 %v5369_v0  ;;  %v315_v62 = vld [vmem:[#allocation5 + $0x5e0] sm:$0xff]  ;;  %v312_v63 = vld [vmem:[#allocation5 + $0x5c8] sm:$0xff]  ;;  %v5425_v0 = vcombine.high %v304_v54, %v308_v56 }
  0xbe   :  { %v5431_v4 = vcombine.high %v311_v61, %v315_v62  ;;  %v5430_v10 = vcombine.low %v311_v61, %v315_v62  ;;  %v5432_v11 = vcombine.low %v312_v63, %v316_v1  ;;  %v371_v56 = vld [vmem:[#allocation5 + $0x7a0] sm:$0xff] }
  0xc0   :  { %2504 = vmatpush1.bf16.msra.mxu0 %v5366_v5  ;;  %2627 = vmatpush1.bf16.msra.mxu1 %v5368_v7  ;;  %v319_v5 = vld [vmem:[#allocation5 + $0x600] sm:$0xff]  ;;  %v320_v7 = vld [vmem:[#allocation5 + $0x608] sm:$0xff] }
  0xc1   :  { %2514 = vmatprep.subr.bf16.mxu0 %v5375_v8  ;;  %2637 = vmatprep.subr.bf16.mxu1 %v5377_v9  ;;  %v5433_v8 = vcombine.high %v312_v63, %v316_v1  ;;  %v324_v9 = vld [vmem:[#allocation5 + $0x628] sm:$0xff]  ;;  %v5439_v13 = vcombine.high %v319_v5, %v323_v6  ;;  %v379_v1 = vld [vmem:[#allocation5 + $0x7e0] sm:$0xff] }
  0xc2   :  { %v5440_v20 = vcombine.low %v320_v7, %v324_v9 }
  0xc3   :  { %2506 = vmatmul.mubr.bf16.vlgmr.msra.gmra.mrb[0].mxu0 %v6794_v12  ;;  %2629 = vmatmul.mubr.bf16.vlgmr.msra.gmra.mrb[0].mxu1 %v6794_v12 }
  0xc4   :  { %2515 = vmatpush1.bf16.msra.mxu0 %v5374_v16  ;;  %2638 = vmatpush1.bf16.msra.mxu1 %v5376_v17  ;;  %v328_v16 = vld [vmem:[#allocation5 + $0x648] sm:$0xff]  ;;  %v5441_v17 = vcombine.high %v320_v7, %v324_v9  ;;  %v387_v9 = vld [vmem:[#allocation5 + $0x820] sm:$0xff] }
  0xc5   :  { %2516 = vmatprep.subr.bf16.mxu0 %v5383_v18  ;;  %2639 = vmatprep.subr.bf16.mxu1 %v5385_v19  ;;  %v332_v18 = vld [vmem:[#allocation5 + $0x668] sm:$0xff]  ;;  %v5438_v19 = vcombine.low %v319_v5, %v323_v6  ;;  %v383_v6 = vld [vmem:[#allocation5 + $0x800] sm:$0xff] }
  0xc6   :  { %2546 = vmatprep.mubr.bf16.mxu0 %v6796_v23  ;;  %2669 = vmatprep.mubr.bf16.mxu1 %v6796_v23  ;;  %v5448_v29 = vcombine.low %v328_v16, %v332_v18 }
  0xc8   :  { %2517 = vmatpush1.bf16.msra.mxu0 %v5382_v25  ;;  %2640 = vmatpush1.bf16.msra.mxu1 %v5384_v26  ;;  %v336_v25 = vld [vmem:[#allocation5 + $0x688] sm:$0xff]  ;;  %v5449_v26 = vcombine.high %v328_v16, %v332_v18  ;;  %v391_v16 = vld [vmem:[#allocation5 + $0x840] sm:$0xff]  ;;  %v5503_v18 = vcombine.high %v383_v6, %v387_v9 }
  0xc9   :  { %2518 = vmatprep.subr.bf16.mxu0 %v5391_v27  ;;  %2641 = vmatprep.subr.bf16.mxu1 %v5393_v31  ;;  %v340_v27 = vld [vmem:[#allocation5 + $0x6a8] sm:$0xff]  ;;  %v343_v31 = vld [vmem:[#allocation5 + $0x6c0] sm:$0xff] }
  0xca   :  { %v5456_v37 = vcombine.low %v336_v25, %v340_v27  ;;  %v5463_v38 = vcombine.high %v343_v31, %v347_v32  ;;  %v5462_v44 = vcombine.low %v343_v31, %v347_v32  ;;  %v400_v31 = vld [vmem:[#allocation5 + $0x888] sm:$0xff] }
  0xcc   :  { %2519 = vmatpush1.bf16.msra.mxu0 %v5390_v33  ;;  %2642 = vmatpush1.bf16.msra.mxu1 %v5392_v34  ;;  %v344_v33 = vld [vmem:[#allocation5 + $0x6c8] sm:$0xff]  ;;  %v5457_v34 = vcombine.high %v336_v25, %v340_v27  ;;  %v6802_v25 = vpack.c.bf16 %v117_v14, %v117_v14 }
  0xcd   :  { %2520 = vmatprep.subr.bf16.mxu0 %v5399_v35  ;;  %2643 = vmatprep.subr.bf16.mxu1 %v5401_v39  ;;  %v348_v35 = vld [vmem:[#allocation5 + $0x6e8] sm:$0xff]  ;;  %v351_v39 = vld [vmem:[#allocation5 + $0x700] sm:$0xff] }
  0xce   :  { %v5464_v45 = vcombine.low %v344_v33, %v348_v35  ;;  %v5471_v46 = vcombine.high %v351_v39, %v355_v40  ;;  %v5470_v52 = vcombine.low %v351_v39, %v355_v40  ;;  %v411_v39 = vld [vmem:[#allocation5 + $0x8e0] sm:$0xff]  ;;  %v408_v40 = vld [vmem:[#allocation5 + $0x8c8] sm:$0xff] }
  0xd0   :  { %2521 = vmatpush1.bf16.msra.mxu0 %v5398_v41  ;;  %2644 = vmatpush1.bf16.msra.mxu1 %v5400_v42  ;;  %v352_v41 = vld [vmem:[#allocation5 + $0x708] sm:$0xff]  ;;  %v5465_v42 = vcombine.high %v344_v33, %v348_v35 }
  0xd1   :  { %2522 = vmatprep.subr.bf16.mxu0 %v5407_v43  ;;  %2645 = vmatprep.subr.bf16.mxu1 %v5409_v47  ;;  %v356_v43 = vld [vmem:[#allocation5 + $0x728] sm:$0xff]  ;;  %v359_v47 = vld [vmem:[#allocation5 + $0x740] sm:$0xff] }
  0xd2   :  { %v5472_v53 = vcombine.low %v352_v41, %v356_v43  ;;  %v5479_v54 = vcombine.high %v359_v47, %v363_v48  ;;  %v5478_v61 = vcombine.low %v359_v47, %v363_v48  ;;  %v404_v33 = vld [vmem:[#allocation5 + $0x8a8] sm:$0xff]  ;;  %v419_v47 = vld [vmem:[#allocation5 + $0x920] sm:$0xff] }
  0xd3   :  { %v416_v48 = vld [vmem:[#allocation5 + $0x908] sm:$0xff] }
  0xd4   :  { %2523 = vmatpush1.bf16.msra.mxu0 %v5406_v49  ;;  %2646 = vmatpush1.bf16.msra.mxu1 %v5408_v50  ;;  %v360_v49 = vld [vmem:[#allocation5 + $0x748] sm:$0xff]  ;;  %v5473_v50 = vcombine.high %v352_v41, %v356_v43  ;;  %v5521_v41 = vcombine.high %v400_v31, %v404_v33 }
  0xd5   :  { %2524 = vmatprep.subr.bf16.mxu0 %v5415_v51  ;;  %2647 = vmatprep.subr.bf16.mxu1 %v5417_v55  ;;  %v364_v51 = vld [vmem:[#allocation5 + $0x768] sm:$0xff]  ;;  %v367_v55 = vld [vmem:[#allocation5 + $0x780] sm:$0xff] }
  0xd6   :  { %v5480_v62 = vcombine.low %v360_v49, %v364_v51  ;;  %v5487_v63 = vcombine.high %v367_v55, %v371_v56  ;;  %v5486_v5 = vcombine.low %v367_v55, %v371_v56  ;;  %v427_v55 = vld [vmem:[#allocation5 + $0x960] sm:$0xff]  ;;  %v424_v56 = vld [vmem:[#allocation5 + $0x948] sm:$0xff] }
  0xd8   :  { %2525 = vmatpush1.bf16.msra.mxu0 %v5414_v58  ;;  %2648 = vmatpush1.bf16.msra.mxu1 %v5416_v59  ;;  %v368_v58 = vld [vmem:[#allocation5 + $0x788] sm:$0xff]  ;;  %v5481_v59 = vcombine.high %v360_v49, %v364_v51 }
  0xd9   :  { %2526 = vmatprep.subr.bf16.mxu0 %v5423_v60  ;;  %2649 = vmatprep.subr.bf16.mxu1 %v5425_v0  ;;  %v372_v60 = vld [vmem:[#allocation5 + $0x7a8] sm:$0xff]  ;;  %v375_v0 = vld [vmem:[#allocation5 + $0x7c0] sm:$0xff] }
  0xda   :  { %v5488_v7 = vcombine.low %v368_v58, %v372_v60  ;;  %v5494_v15 = vcombine.low %v375_v0, %v379_v1 }
  0xdc   :  { %2527 = vmatpush1.bf16.msra.mxu0 %v5422_v2  ;;  %2650 = vmatpush1.bf16.msra.mxu1 %v5424_v3  ;;  %v376_v2 = vld [vmem:[#allocation5 + $0x7c8] sm:$0xff]  ;;  %v5489_v3 = vcombine.high %v368_v58, %v372_v60 }
  0xdd   :  { %2528 = vmatprep.subr.bf16.mxu0 %v5431_v4  ;;  %2651 = vmatprep.subr.bf16.mxu1 %v5433_v8  ;;  %v380_v4 = vld [vmem:[#allocation5 + $0x7e8] sm:$0xff]  ;;  %v5495_v8 = vcombine.high %v375_v0, %v379_v1  ;;  %v435_v0 = vld [vmem:[#allocation5 + $0x9a0] sm:$0xff] }
  0xde   :  { %v432_v1 = vld [vmem:[#allocation5 + $0x988] sm:$0xff] }
  0xe0   :  { %2529 = vmatpush1.bf16.msra.mxu0 %v5430_v10  ;;  %2652 = vmatpush1.bf16.msra.mxu1 %v5432_v11  ;;  %v384_v10 = vld [vmem:[#allocation5 + $0x808] sm:$0xff] }
  0xe1   :  { %2530 = vmatprep.subr.bf16.mxu0 %v5439_v13  ;;  %2653 = vmatprep.subr.bf16.mxu1 %v5441_v17  ;;  %v388_v11 = vld [vmem:[#allocation5 + $0x828] sm:$0xff]  ;;  %v5497_v13 = vcombine.high %v376_v2, %v380_v4  ;;  %v5496_v17 = vcombine.low %v376_v2, %v380_v4 }
  0xe2   :  { %v5505_v22 = vcombine.high %v384_v10, %v388_v11  ;;  %v5504_v27 = vcombine.low %v384_v10, %v388_v11  ;;  %v444_v11 = vld [vmem:[#allocation5 + $0x9e8] sm:$0xff] }
  0xe4   :  { %2531 = vmatpush1.bf16.msra.mxu0 %v5438_v19  ;;  %2654 = vmatpush1.bf16.msra.mxu1 %v5440_v20  ;;  %v395_v19 = vld [vmem:[#allocation5 + $0x860] sm:$0xff]  ;;  %v392_v20 = vld [vmem:[#allocation5 + $0x848] sm:$0xff] }
  0xe5   :  { %2532 = vmatprep.subr.bf16.mxu0 %v5447_v21  ;;  %2655 = vmatprep.subr.bf16.mxu1 %v5449_v26  ;;  %v396_v21 = vld [vmem:[#allocation5 + $0x868] sm:$0xff]  ;;  %v5502_v26 = vcombine.low %v383_v6, %v387_v9  ;;  %v5510_v35 = vcombine.low %v391_v16, %v395_v19 }
  0xe6   :  { %v5513_v32 = vcombine.high %v392_v20, %v396_v21  ;;  %v440_v9 = vld [vmem:[#allocation5 + $0x9c8] sm:$0xff] }
  0xe8   :  { %2533 = vmatpush1.bf16.msra.mxu0 %v5446_v28  ;;  %2656 = vmatpush1.bf16.msra.mxu1 %v5448_v29  ;;  %v5511_v28 = vcombine.high %v391_v16, %v395_v19  ;;  %v399_v29 = vld [vmem:[#allocation5 + $0x880] sm:$0xff]  ;;  %v5561_v19 = vcombine.high %v440_v9, %v444_v11 }
  0xe9   :  { %2534 = vmatprep.subr.bf16.mxu0 %v5455_v30  ;;  %2657 = vmatprep.subr.bf16.mxu1 %v5457_v34  ;;  %v403_v30 = vld [vmem:[#allocation5 + $0x8a0] sm:$0xff]  ;;  %v6804_v34 = vpack.c.bf16 %v120_v24, %v120_v24 }
  0xea   :  { %v5518_v43 = vcombine.low %v399_v29, %v403_v30  ;;  %v447_v16 = vld [vmem:[#allocation5 + $0xa00] sm:$0xff] }
  0xec   :  { %2535 = vmatpush1.bf16.msra.mxu0 %v5454_v36  ;;  %2658 = vmatpush1.bf16.msra.mxu1 %v5456_v37  ;;  %v5512_v36 = vcombine.low %v392_v20, %v396_v21  ;;  %v5519_v37 = vcombine.high %v399_v29, %v403_v30  ;;  %v452_v20 = vld [vmem:[#allocation5 + $0xa28] sm:$0xff] }
  0xed   :  { %2536 = vmatprep.subr.bf16.mxu0 %v5463_v38  ;;  %2659 = vmatprep.subr.bf16.mxu1 %v5465_v42  ;;  %v407_v38 = vld [vmem:[#allocation5 + $0x8c0] sm:$0xff]  ;;  %v412_v42 = vld [vmem:[#allocation5 + $0x8e8] sm:$0xff] }
  0xee   :  { %v5529_v49 = vcombine.high %v408_v40, %v412_v42  ;;  %v5526_v51 = vcombine.low %v407_v38, %v411_v39  ;;  %v460_v30 = vld [vmem:[#allocation5 + $0xa68] sm:$0xff] }
  0xf0   :  { %2537 = vmatpush1.bf16.msra.mxu0 %v5462_v44  ;;  %2660 = vmatpush1.bf16.msra.mxu1 %v5464_v45  ;;  %v5520_v44 = vcombine.low %v400_v31, %v404_v33  ;;  %v5527_v45 = vcombine.high %v407_v38, %v411_v39  ;;  %v468_v39 = vld [vmem:[#allocation5 + $0xaa8] sm:$0xff] }
  0xf1   :  { %2538 = vmatprep.subr.bf16.mxu0 %v5471_v46  ;;  %2661 = vmatprep.subr.bf16.mxu1 %v5473_v50  ;;  %v415_v46 = vld [vmem:[#allocation5 + $0x900] sm:$0xff]  ;;  %v420_v50 = vld [vmem:[#allocation5 + $0x928] sm:$0xff] }
  0xf2   :  { %v5537_v58 = vcombine.high %v416_v48, %v420_v50  ;;  %v5534_v60 = vcombine.low %v415_v46, %v419_v47 }
  0xf4   :  { %2539 = vmatpush1.bf16.msra.mxu0 %v5470_v52  ;;  %2662 = vmatpush1.bf16.msra.mxu1 %v5472_v53  ;;  %v5528_v52 = vcombine.low %v408_v40, %v412_v42  ;;  %v5535_v53 = vcombine.high %v415_v46, %v419_v47  ;;  %v476_v47 = vld [vmem:[#allocation5 + $0xae8] sm:$0xff] }
  0xf5   :  { %2540 = vmatprep.subr.bf16.mxu0 %v5479_v54  ;;  %2663 = vmatprep.subr.bf16.mxu1 %v5481_v59  ;;  %v423_v54 = vld [vmem:[#allocation5 + $0x940] sm:$0xff]  ;;  %v428_v59 = vld [vmem:[#allocation5 + $0x968] sm:$0xff] }
  0xf6   :  { %v5545_v2 = vcombine.high %v424_v56, %v428_v59  ;;  %v5542_v4 = vcombine.low %v423_v54, %v427_v55 }
  0xf8   :  { %2541 = vmatpush1.bf16.msra.mxu0 %v5478_v61  ;;  %2664 = vmatpush1.bf16.msra.mxu1 %v5480_v62  ;;  %v5536_v61 = vcombine.low %v416_v48, %v420_v50  ;;  %v5543_v62 = vcombine.high %v423_v54, %v427_v55  ;;  %v484_v55 = vld [vmem:[#allocation5 + $0xb28] sm:$0xff] }
  0xf9   :  { %2542 = vmatprep.subr.bf16.mxu0 %v5487_v63  ;;  %2665 = vmatprep.subr.bf16.mxu1 %v5489_v3  ;;  %v431_v63 = vld [vmem:[#allocation5 + $0x980] sm:$0xff]  ;;  %v436_v3 = vld [vmem:[#allocation5 + $0x9a8] sm:$0xff] }
  0xfa   :  { %v5551_v6 = vcombine.high %v431_v63, %v435_v0  ;;  %v5553_v10 = vcombine.high %v432_v1, %v436_v3  ;;  %v5552_v14 = vcombine.low %v432_v1, %v436_v3 }
  0xfc   :  { %2543 = vmatpush1.bf16.msra.mxu0 %v5486_v5  ;;  %2666 = vmatpush1.bf16.msra.mxu1 %v5488_v7  ;;  %v5544_v5 = vcombine.low %v424_v56, %v428_v59  ;;  %v439_v7 = vld [vmem:[#allocation5 + $0x9c0] sm:$0xff] }
  0xfd   :  { %2544 = vmatprep.subr.bf16.mxu0 %v5495_v8  ;;  %2667 = vmatprep.subr.bf16.mxu1 %v5497_v13  ;;  %v443_v8 = vld [vmem:[#allocation5 + $0x9e0] sm:$0xff]  ;;  %v5550_v13 = vcombine.low %v431_v63, %v435_v0  ;;  %v492_v0 = vld [vmem:[#allocation5 + $0xb68] sm:$0xff] }
  0xfe   :  { %v5558_v21 = vcombine.low %v439_v7, %v443_v8 }
 0x100   :  { %2545 = vmatpush1.bf16.msra.mxu0 %v5494_v15  ;;  %2668 = vmatpush1.bf16.msra.mxu1 %v5496_v17  ;;  %v5559_v15 = vcombine.high %v439_v7, %v443_v8  ;;  %v451_v17 = vld [vmem:[#allocation5 + $0xa20] sm:$0xff]  ;;  %v500_v8 = vld [vmem:[#allocation5 + $0xba8] sm:$0xff] }
 0x101   :  { %2555 = vmatprep.subr.bf16.mxu0 %v5503_v18  ;;  %2678 = vmatprep.subr.bf16.mxu1 %v5505_v22  ;;  %v448_v18 = vld [vmem:[#allocation5 + $0xa08] sm:$0xff]  ;;  %v5560_v22 = vcombine.low %v440_v9, %v444_v11  ;;  %v5567_v24 = vcombine.high %v447_v16, %v451_v17  ;;  %v5566_v31 = vcombine.low %v447_v16, %v451_v17 }
 0x102   :  { %v5569_v29 = vcombine.high %v448_v18, %v452_v20  ;;  %v508_v17 = vld [vmem:[#allocation5 + $0xbe8] sm:$0xff] }
 0x103   :  { %2547 = vmatmul.mubr.bf16.vlgmr.msra.gmra.mrb[0].mxu0 %v6802_v25  ;;  %2670 = vmatmul.mubr.bf16.vlgmr.msra.gmra.mrb[0].mxu1 %v6802_v25 }
 0x104   :  { %2556 = vmatpush1.bf16.msra.mxu0 %v5502_v26  ;;  %2679 = vmatpush1.bf16.msra.mxu1 %v5504_v27  ;;  %v455_v26 = vld [vmem:[#allocation5 + $0xa40] sm:$0xff] }
 0x105   :  { %2557 = vmatprep.subr.bf16.mxu0 %v5511_v28  ;;  %2680 = vmatprep.subr.bf16.mxu1 %v5513_v32  ;;  %v459_v27 = vld [vmem:[#allocation5 + $0xa60] sm:$0xff]  ;;  %v456_v28 = vld [vmem:[#allocation5 + $0xa48] sm:$0xff]  ;;  %v5568_v32 = vcombine.low %v448_v18, %v452_v20 }
 0x106   :  { %2587 = vmatprep.mubr.bf16.mxu0 %v6804_v34  ;;  %2710 = vmatprep.mubr.bf16.mxu1 %v6804_v34  ;;  %v5575_v33 = vcombine.high %v455_v26, %v459_v27  ;;  %v5577_v38 = vcombine.high %v456_v28, %v460_v30  ;;  %v5574_v40 = vcombine.low %v455_v26, %v459_v27  ;;  %v119_v27 = vld [vmem:[#allocation2 + $0x20] sm:$0xff] }
 0x108   :  { %2558 = vmatpush1.bf16.msra.mxu0 %v5510_v35  ;;  %2681 = vmatpush1.bf16.msra.mxu1 %v5512_v36  ;;  %v463_v35 = vld [vmem:[#allocation5 + $0xa80] sm:$0xff] }
 0x109   :  { %2559 = vmatprep.subr.bf16.mxu0 %v5519_v37  ;;  %2682 = vmatprep.subr.bf16.mxu1 %v5521_v41  ;;  %v467_v36 = vld [vmem:[#allocation5 + $0xaa0] sm:$0xff]  ;;  %v464_v37 = vld [vmem:[#allocation5 + $0xa88] sm:$0xff]  ;;  %v5576_v41 = vcombine.low %v456_v28, %v460_v30  ;;  %v134_v28 = vld [vmem:[#allocation5 + $0x38] sm:$0xff] }
 0x10a   :  { %v5583_v42 = vcombine.high %v463_v35, %v467_v36  ;;  %v5585_v46 = vcombine.high %v464_v37, %v468_v39  ;;  %v5582_v48 = vcombine.low %v463_v35, %v467_v36  ;;  %v138_v35 = vld [vmem:[#allocation5 + $0x58] sm:$0xff] }
 0x10c   :  { %2560 = vmatpush1.bf16.msra.mxu0 %v5518_v43  ;;  %2683 = vmatpush1.bf16.msra.mxu1 %v5520_v44  ;;  %v471_v43 = vld [vmem:[#allocation5 + $0xac0] sm:$0xff] }
 0x10d   :  { %2561 = vmatprep.subr.bf16.mxu0 %v5527_v45  ;;  %2684 = vmatprep.subr.bf16.mxu1 %v5529_v49  ;;  %v475_v44 = vld [vmem:[#allocation5 + $0xae0] sm:$0xff]  ;;  %v472_v45 = vld [vmem:[#allocation5 + $0xac8] sm:$0xff]  ;;  %v5584_v49 = vcombine.low %v464_v37, %v468_v39  ;;  %v142_v37 = vld [vmem:[#allocation5 + $0x78] sm:$0xff] }
 0x10e   :  { %v5591_v50 = vcombine.high %v471_v43, %v475_v44  ;;  %v5593_v54 = vcombine.high %v472_v45, %v476_v47  ;;  %v5590_v56 = vcombine.low %v471_v43, %v475_v44  ;;  %v149_v43 = vld [vmem:[#allocation5 + $0xb0] sm:$0xff]  ;;  %v146_v44 = vld [vmem:[#allocation5 + $0x98] sm:$0xff] }
 0x110   :  { %2562 = vmatpush1.bf16.msra.mxu0 %v5526_v51  ;;  %2685 = vmatpush1.bf16.msra.mxu1 %v5528_v52  ;;  %v479_v51 = vld [vmem:[#allocation5 + $0xb00] sm:$0xff] }
 0x111   :  { %2563 = vmatprep.subr.bf16.mxu0 %v5535_v53  ;;  %2686 = vmatprep.subr.bf16.mxu1 %v5537_v58  ;;  %v483_v52 = vld [vmem:[#allocation5 + $0xb20] sm:$0xff]  ;;  %v480_v53 = vld [vmem:[#allocation5 + $0xb08] sm:$0xff]  ;;  %v5592_v58 = vcombine.low %v472_v45, %v476_v47  ;;  %v5261_v45 = vcombine.high %v138_v35, %v142_v37 }
 0x112   :  { %v5599_v59 = vcombine.high %v479_v51, %v483_v52  ;;  %v5601_v63 = vcombine.high %v480_v53, %v484_v55  ;;  %v5598_v1 = vcombine.low %v479_v51, %v483_v52  ;;  %v157_v51 = vld [vmem:[#allocation5 + $0xf0] sm:$0xff]  ;;  %v154_v52 = vld [vmem:[#allocation5 + $0xd8] sm:$0xff] }
 0x114   :  { %2564 = vmatpush1.bf16.msra.mxu0 %v5534_v60  ;;  %2687 = vmatpush1.bf16.msra.mxu1 %v5536_v61  ;;  %v487_v60 = vld [vmem:[#allocation5 + $0xb40] sm:$0xff] }
 0x115   :  { %2565 = vmatprep.subr.bf16.mxu0 %v5543_v62  ;;  %2688 = vmatprep.subr.bf16.mxu1 %v5545_v2  ;;  %v491_v61 = vld [vmem:[#allocation5 + $0xb60] sm:$0xff]  ;;  %v488_v62 = vld [vmem:[#allocation5 + $0xb48] sm:$0xff]  ;;  %v5600_v2 = vcombine.low %v480_v53, %v484_v55 }
 0x116   :  { %v5607_v3 = vcombine.high %v487_v60, %v491_v61  ;;  %v5609_v7 = vcombine.high %v488_v62, %v492_v0  ;;  %v5606_v9 = vcombine.low %v487_v60, %v491_v61  ;;  %v165_v60 = vld [vmem:[#allocation5 + $0x130] sm:$0xff]  ;;  %v162_v61 = vld [vmem:[#allocation5 + $0x118] sm:$0xff] }
 0x118   :  { %2566 = vmatpush1.bf16.msra.mxu0 %v5542_v4  ;;  %2689 = vmatpush1.bf16.msra.mxu1 %v5544_v5  ;;  %v495_v4 = vld [vmem:[#allocation5 + $0xb80] sm:$0xff] }
 0x119   :  { %2567 = vmatprep.subr.bf16.mxu0 %v5551_v6  ;;  %2690 = vmatprep.subr.bf16.mxu1 %v5553_v10  ;;  %v499_v5 = vld [vmem:[#allocation5 + $0xba0] sm:$0xff]  ;;  %v496_v6 = vld [vmem:[#allocation5 + $0xb88] sm:$0xff]  ;;  %v5608_v10 = vcombine.low %v488_v62, %v492_v0 }
 0x11a   :  { %v5615_v11 = vcombine.high %v495_v4, %v499_v5  ;;  %v5617_v16 = vcombine.high %v496_v6, %v500_v8  ;;  %v5614_v18 = vcombine.low %v495_v4, %v499_v5  ;;  %v170_v4 = vld [vmem:[#allocation5 + $0x158] sm:$0xff] }
 0x11c   :  { %2568 = vmatpush1.bf16.msra.mxu0 %v5550_v13  ;;  %2691 = vmatpush1.bf16.msra.mxu1 %v5552_v14  ;;  %v503_v13 = vld [vmem:[#allocation5 + $0xbc0] sm:$0xff] }
 0x11d   :  { %2569 = vmatprep.subr.bf16.mxu0 %v5559_v15  ;;  %2692 = vmatprep.subr.bf16.mxu1 %v5561_v19  ;;  %v507_v14 = vld [vmem:[#allocation5 + $0xbe0] sm:$0xff]  ;;  %v504_v15 = vld [vmem:[#allocation5 + $0xbc8] sm:$0xff]  ;;  %v5616_v19 = vcombine.low %v496_v6, %v500_v8  ;;  %v174_v6 = vld [vmem:[#allocation5 + $0x178] sm:$0xff] }
 0x11e   :  { %v5623_v20 = vcombine.high %v503_v13, %v507_v14  ;;  %v5625_v26 = vcombine.high %v504_v15, %v508_v17  ;;  %v5624_v30 = vcombine.low %v504_v15, %v508_v17  ;;  %v182_v15 = vld [vmem:[#allocation5 + $0x1b8] sm:$0xff]  ;;  %v5292_v17 = vcombine.low %v170_v4, %v174_v6 }
 0x120   :  { %2570 = vmatpush1.bf16.msra.mxu0 %v5558_v21  ;;  %2693 = vmatpush1.bf16.msra.mxu1 %v5560_v22  ;;  %v129_v21 = vld [vmem:[#allocation5 + $0x10] sm:$0xff] }
 0x121   :  { %2571 = vmatprep.subr.bf16.mxu0 %v5567_v24  ;;  %2694 = vmatprep.subr.bf16.mxu1 %v5569_v29  ;;  %v133_v22 = vld [vmem:[#allocation5 + $0x30] sm:$0xff]  ;;  %v130_v24 = vld [vmem:[#allocation5 + $0x18] sm:$0xff]  ;;  %v5622_v29 = vcombine.low %v503_v13, %v507_v14  ;;  %v5293_v14 = vcombine.high %v170_v4, %v174_v6 }
 0x122   :  { %v5253_v36 = vcombine.high %v130_v24, %v134_v28  ;;  %v5250_v39 = vcombine.low %v129_v21, %v133_v22  ;;  %v178_v13 = vld [vmem:[#allocation5 + $0x198] sm:$0xff] }
 0x124   :  { %2572 = vmatpush1.bf16.msra.mxu0 %v5566_v31  ;;  %2695 = vmatpush1.bf16.msra.mxu1 %v5568_v32  ;;  %v5251_v31 = vcombine.high %v129_v21, %v133_v22  ;;  %v137_v32 = vld [vmem:[#allocation5 + $0x50] sm:$0xff]  ;;  %v186_v21 = vld [vmem:[#allocation5 + $0x1d8] sm:$0xff]  ;;  %v5301_v22 = vcombine.high %v178_v13, %v182_v15 }
 0x125   :  { %2573 = vmatprep.subr.bf16.mxu0 %v5575_v33  ;;  %2696 = vmatprep.subr.bf16.mxu1 %v5577_v38  ;;  %v141_v33 = vld [vmem:[#allocation5 + $0x70] sm:$0xff]  ;;  %v6810_v38 = vpack.c.bf16 %v119_v27, %v119_v27  ;;  %v5300_v27 = vcombine.low %v178_v13, %v182_v15 }
 0x126   :  { %v5258_v47 = vcombine.low %v137_v32, %v141_v33 }
 0x128   :  { %2574 = vmatpush1.bf16.msra.mxu0 %v5574_v40  ;;  %2697 = vmatpush1.bf16.msra.mxu1 %v5576_v41  ;;  %v5252_v40 = vcombine.low %v130_v24, %v134_v28  ;;  %v5259_v41 = vcombine.high %v137_v32, %v141_v33  ;;  %v190_v24 = vld [vmem:[#allocation5 + $0x1f8] sm:$0xff] }
 0x129   :  { %2575 = vmatprep.subr.bf16.mxu0 %v5583_v42  ;;  %2698 = vmatprep.subr.bf16.mxu1 %v5585_v46  ;;  %v145_v42 = vld [vmem:[#allocation5 + $0x90] sm:$0xff]  ;;  %v150_v46 = vld [vmem:[#allocation5 + $0xb8] sm:$0xff]  ;;  %v5309_v32 = vcombine.high %v186_v21, %v190_v24 }
 0x12a   :  { %v5269_v53 = vcombine.high %v146_v44, %v150_v46  ;;  %v5266_v55 = vcombine.low %v145_v42, %v149_v43  ;;  %v198_v33 = vld [vmem:[#allocation5 + $0x238] sm:$0xff] }
 0x12c   :  { %2576 = vmatpush1.bf16.msra.mxu0 %v5582_v48  ;;  %2699 = vmatpush1.bf16.msra.mxu1 %v5584_v49  ;;  %v5260_v48 = vcombine.low %v138_v35, %v142_v37  ;;  %v5267_v49 = vcombine.high %v145_v42, %v149_v43  ;;  %v206_v43 = vld [vmem:[#allocation5 + $0x278] sm:$0xff] }
 0x12d   :  { %2577 = vmatprep.subr.bf16.mxu0 %v5591_v50  ;;  %2700 = vmatprep.subr.bf16.mxu1 %v5593_v54  ;;  %v153_v50 = vld [vmem:[#allocation5 + $0xd0] sm:$0xff]  ;;  %v158_v54 = vld [vmem:[#allocation5 + $0xf8] sm:$0xff] }
 0x12e   :  { %v5277_v62 = vcombine.high %v154_v52, %v158_v54  ;;  %v5274_v0 = vcombine.low %v153_v50, %v157_v51 }
 0x130   :  { %2578 = vmatpush1.bf16.msra.mxu0 %v5590_v56  ;;  %2701 = vmatpush1.bf16.msra.mxu1 %v5592_v58  ;;  %v5268_v56 = vcombine.low %v146_v44, %v150_v46  ;;  %v5275_v58 = vcombine.high %v153_v50, %v157_v51  ;;  %v210_v50 = vld [vmem:[#allocation5 + $0x298] sm:$0xff] }
 0x131   :  { %2579 = vmatprep.subr.bf16.mxu0 %v5599_v59  ;;  %2702 = vmatprep.subr.bf16.mxu1 %v5601_v63  ;;  %v161_v59 = vld [vmem:[#allocation5 + $0x110] sm:$0xff]  ;;  %v166_v63 = vld [vmem:[#allocation5 + $0x138] sm:$0xff] }
 0x132   :  { %v5285_v5 = vcombine.high %v162_v61, %v166_v63  ;;  %v5284_v8 = vcombine.low %v162_v61, %v166_v63  ;;  %v214_v51 = vld [vmem:[#allocation5 + $0x2b8] sm:$0xff] }
 0x134   :  { %2580 = vmatpush1.bf16.msra.mxu0 %v5598_v1  ;;  %2703 = vmatpush1.bf16.msra.mxu1 %v5600_v2  ;;  %v5276_v1 = vcombine.low %v154_v52, %v158_v54  ;;  %v5283_v2 = vcombine.high %v161_v59, %v165_v60 }
 0x135   :  { %2581 = vmatprep.subr.bf16.mxu0 %v5607_v3  ;;  %2704 = vmatprep.subr.bf16.mxu1 %v5609_v7  ;;  %v169_v3 = vld [vmem:[#allocation5 + $0x150] sm:$0xff]  ;;  %v5282_v7 = vcombine.low %v161_v59, %v165_v60  ;;  %v218_v59 = vld [vmem:[#allocation5 + $0x2d8] sm:$0xff] }
 0x136   :  { %v222_v60 = vld [vmem:[#allocation5 + $0x2f8] sm:$0xff] }
 0x138   :  { %2582 = vmatpush1.bf16.msra.mxu0 %v5606_v9  ;;  %2705 = vmatpush1.bf16.msra.mxu1 %v5608_v10  ;;  %v177_v10 = vld [vmem:[#allocation5 + $0x190] sm:$0xff] }
 0x139   :  { %2583 = vmatprep.subr.bf16.mxu0 %v5615_v11  ;;  %2706 = vmatprep.subr.bf16.mxu1 %v5617_v16  ;;  %v181_v11 = vld [vmem:[#allocation5 + $0x1b0] sm:$0xff] }
 0x13c   :  { %2584 = vmatpush1.bf16.msra.mxu0 %v5614_v18  ;;  %2707 = vmatpush1.bf16.msra.mxu1 %v5616_v19  ;;  %v5299_v18 = vcombine.high %v177_v10, %v181_v11  ;;  %v185_v19 = vld [vmem:[#allocation5 + $0x1d0] sm:$0xff] }
 0x13d   :  { %2585 = vmatprep.subr.bf16.mxu0 %v5623_v20  ;;  %2708 = vmatprep.subr.bf16.mxu1 %v5625_v26  ;;  %v189_v20 = vld [vmem:[#allocation5 + $0x1f0] sm:$0xff]  ;;  %v5298_v26 = vcombine.low %v177_v10, %v181_v11  ;;  %v234_v10 = vld [vmem:[#allocation5 + $0x358] sm:$0xff] }
 0x13e   :  { %v5307_v28 = vcombine.high %v185_v19, %v189_v20  ;;  %v5306_v35 = vcombine.low %v185_v19, %v189_v20  ;;  %v238_v11 = vld [vmem:[#allocation5 + $0x378] sm:$0xff] }
 0x13f   :  { %v242_v19 = vld [vmem:[#allocation5 + $0x398] sm:$0xff] }
 0x140   :  { %2586 = vmatpush1.bf16.msra.mxu0 %v5622_v29  ;;  %2709 = vmatpush1.bf16.msra.mxu1 %v5624_v30  ;;  %v193_v29 = vld [vmem:[#allocation5 + $0x210] sm:$0xff]  ;;  %v246_v20 = vld [vmem:[#allocation5 + $0x3b8] sm:$0xff] }
 0x141   :  { %2719 = vmatprep.subr.bf16.mxu0 %v5251_v31  ;;  %2842 = vmatprep.subr.bf16.mxu1 %v5253_v36  ;;  %v197_v30 = vld [vmem:[#allocation5 + $0x230] sm:$0xff]  ;;  %v194_v31 = vld [vmem:[#allocation5 + $0x218] sm:$0xff]  ;;  %v5308_v36 = vcombine.low %v186_v21, %v190_v24 }
 0x142   :  { %v5315_v37 = vcombine.high %v193_v29, %v197_v30  ;;  %v5317_v42 = vcombine.high %v194_v31, %v198_v33  ;;  %v5314_v44 = vcombine.low %v193_v29, %v197_v30  ;;  %v250_v29 = vld [vmem:[#allocation5 + $0x3d8] sm:$0xff] }
 0x143   :  { %2588 = vmatmul.mubr.bf16.vlgmr.msra.gmra.mrb[0].mxu0 %v6810_v38  ;;  %2711 = vmatmul.mubr.bf16.vlgmr.msra.gmra.mrb[0].mxu1 %v6810_v38  ;;  %v254_v30 = vld [vmem:[#allocation5 + $0x3f8] sm:$0xff] }
 0x144   :  { %2720 = vmatpush1.bf16.msra.mxu0 %v5250_v39  ;;  %2843 = vmatpush1.bf16.msra.mxu1 %v5252_v40  ;;  %v201_v39 = vld [vmem:[#allocation5 + $0x250] sm:$0xff] }
 0x145   :  { %2721 = vmatprep.subr.bf16.mxu0 %v5259_v41  ;;  %2844 = vmatprep.subr.bf16.mxu1 %v5261_v45  ;;  %v205_v40 = vld [vmem:[#allocation5 + $0x270] sm:$0xff]  ;;  %v202_v41 = vld [vmem:[#allocation5 + $0x258] sm:$0xff]  ;;  %v5316_v45 = vcombine.low %v194_v31, %v198_v33 }
 0x146   :  { %2751 = vmatprep.mubr.bf16.mxu0 %v6790_v57  ;;  %2874 = vmatprep.mubr.bf16.mxu1 %v6790_v57  ;;  %v173_v57 = vld [vmem:[#allocation5 + $0x170] sm:$0xff]  ;;  %v5323_v46 = vcombine.high %v201_v39, %v205_v40  ;;  %v5322_v52 = vcombine.low %v201_v39, %v205_v40  ;;  %v258_v39 = vld [vmem:[#allocation5 + $0x418] sm:$0xff] }
 0x147   :  { %v5291_v9 = vcombine.high %v169_v3, %v173_v57  ;;  %v5290_v16 = vcombine.low %v169_v3, %v173_v57  ;;  %v226_v3 = vld [vmem:[#allocation5 + $0x318] sm:$0xff] }
 0x148   :  { %2722 = vmatpush1.bf16.msra.mxu0 %v5258_v47  ;;  %2845 = vmatpush1.bf16.msra.mxu1 %v5260_v48  ;;  %v209_v47 = vld [vmem:[#allocation5 + $0x290] sm:$0xff]  ;;  %v5325_v48 = vcombine.high %v202_v41, %v206_v43  ;;  %v230_v57 = vld [vmem:[#allocation5 + $0x338] sm:$0xff] }
 0x149   :  { %2723 = vmatprep.subr.bf16.mxu0 %v5267_v49  ;;  %2846 = vmatprep.subr.bf16.mxu1 %v5269_v53  ;;  %v213_v49 = vld [vmem:[#allocation5 + $0x2b0] sm:$0xff]  ;;  %v5324_v53 = vcombine.low %v202_v41, %v206_v43  ;;  %v262_v40 = vld [vmem:[#allocation5 + $0x438] sm:$0xff] }
 0x14a   :  { %v5331_v54 = vcombine.high %v209_v47, %v213_v49  ;;  %v5330_v61 = vcombine.low %v209_v47, %v213_v49  ;;  %v266_v47 = vld [vmem:[#allocation5 + $0x458] sm:$0xff] }
 0x14c   :  { %2724 = vmatpush1.bf16.msra.mxu0 %v5266_v55  ;;  %2847 = vmatpush1.bf16.msra.mxu1 %v5268_v56  ;;  %v5333_v55 = vcombine.high %v210_v50, %v214_v51  ;;  %v217_v56 = vld [vmem:[#allocation5 + $0x2d0] sm:$0xff] }
 0x14d   :  { %2725 = vmatprep.subr.bf16.mxu0 %v5275_v58  ;;  %2848 = vmatprep.subr.bf16.mxu1 %v5277_v62  ;;  %v221_v58 = vld [vmem:[#allocation5 + $0x2f0] sm:$0xff]  ;;  %v5332_v62 = vcombine.low %v210_v50, %v214_v51  ;;  %v5380_v50 = vcombine.low %v258_v39, %v262_v40 }
 0x14e   :  { %v5339_v63 = vcombine.high %v217_v56, %v221_v58  ;;  %v5338_v4 = vcombine.low %v217_v56, %v221_v58  ;;  %v278_v56 = vld [vmem:[#allocation5 + $0x4b8] sm:$0xff] }
 0x150   :  { %2726 = vmatpush1.bf16.msra.mxu0 %v5274_v0  ;;  %2849 = vmatpush1.bf16.msra.mxu1 %v5276_v1  ;;  %v5341_v0 = vcombine.high %v218_v59, %v222_v60  ;;  %v225_v1 = vld [vmem:[#allocation5 + $0x310] sm:$0xff] }
 0x151   :  { %2727 = vmatprep.subr.bf16.mxu0 %v5283_v2  ;;  %2850 = vmatprep.subr.bf16.mxu1 %v5285_v5  ;;  %v229_v2 = vld [vmem:[#allocation5 + $0x330] sm:$0xff]  ;;  %v5340_v5 = vcombine.low %v218_v59, %v222_v60 }
 0x152   :  { %v5347_v6 = vcombine.high %v225_v1, %v229_v2  ;;  %v5346_v13 = vcombine.low %v225_v1, %v229_v2  ;;  %v286_v1 = vld [vmem:[#allocation5 + $0x4f8] sm:$0xff] }
 0x154   :  { %2728 = vmatpush1.bf16.msra.mxu0 %v5282_v7  ;;  %2851 = vmatpush1.bf16.msra.mxu1 %v5284_v8  ;;  %v5349_v7 = vcombine.high %v226_v3, %v230_v57  ;;  %v233_v8 = vld [vmem:[#allocation5 + $0x350] sm:$0xff] }
 0x155   :  { %2729 = vmatprep.subr.bf16.mxu0 %v5291_v9  ;;  %2852 = vmatprep.subr.bf16.mxu1 %v5293_v14  ;;  %v237_v9 = vld [vmem:[#allocation5 + $0x370] sm:$0xff]  ;;  %v5348_v14 = vcombine.low %v226_v3, %v230_v57 }
 0x156   :  { %v5355_v15 = vcombine.high %v233_v8, %v237_v9  ;;  %v5354_v21 = vcombine.low %v233_v8, %v237_v9 }
 0x158   :  { %2730 = vmatpush1.bf16.msra.mxu0 %v5290_v16  ;;  %2853 = vmatpush1.bf16.msra.mxu1 %v5292_v17  ;;  %v5357_v16 = vcombine.high %v234_v10, %v238_v11  ;;  %v241_v17 = vld [vmem:[#allocation5 + $0x390] sm:$0xff] }
 0x159   :  { %2731 = vmatprep.subr.bf16.mxu0 %v5299_v18  ;;  %2854 = vmatprep.subr.bf16.mxu1 %v5301_v22  ;;  %v245_v18 = vld [vmem:[#allocation5 + $0x3b0] sm:$0xff]  ;;  %v5356_v22 = vcombine.low %v234_v10, %v238_v11 }
 0x15a   :  { %v5363_v24 = vcombine.high %v241_v17, %v245_v18  ;;  %v5362_v31 = vcombine.low %v241_v17, %v245_v18  ;;  %v297_v11 = vld [vmem:[#allocation5 + $0x550] sm:$0xff] }
 0x15c   :  { %2732 = vmatpush1.bf16.msra.mxu0 %v5298_v26  ;;  %2855 = vmatpush1.bf16.msra.mxu1 %v5300_v27  ;;  %v5365_v26 = vcombine.high %v242_v19, %v246_v20  ;;  %v249_v27 = vld [vmem:[#allocation5 + $0x3d0] sm:$0xff] }
 0x15d   :  { %2733 = vmatprep.subr.bf16.mxu0 %v5307_v28  ;;  %2856 = vmatprep.subr.bf16.mxu1 %v5309_v32  ;;  %v253_v28 = vld [vmem:[#allocation5 + $0x3f0] sm:$0xff]  ;;  %v5364_v32 = vcombine.low %v242_v19, %v246_v20 }
 0x15e   :  { %v5371_v33 = vcombine.high %v249_v27, %v253_v28  ;;  %v5370_v41 = vcombine.low %v249_v27, %v253_v28  ;;  %v305_v20 = vld [vmem:[#allocation5 + $0x590] sm:$0xff] }
 0x160   :  { %2734 = vmatpush1.bf16.msra.mxu0 %v5306_v35  ;;  %2857 = vmatpush1.bf16.msra.mxu1 %v5308_v36  ;;  %v5373_v35 = vcombine.high %v250_v29, %v254_v30  ;;  %v257_v36 = vld [vmem:[#allocation5 + $0x410] sm:$0xff] }
 0x161   :  { %2735 = vmatprep.subr.bf16.mxu0 %v5315_v37  ;;  %2858 = vmatprep.subr.bf16.mxu1 %v5317_v42  ;;  %v261_v37 = vld [vmem:[#allocation5 + $0x430] sm:$0xff]  ;;  %v5372_v42 = vcombine.low %v250_v29, %v254_v30 }
 0x162   :  { %v5379_v43 = vcombine.high %v257_v36, %v261_v37  ;;  %v5378_v49 = vcombine.low %v257_v36, %v261_v37  ;;  %v313_v30 = vld [vmem:[#allocation5 + $0x5d0] sm:$0xff] }
 0x164   :  { %2736 = vmatpush1.bf16.msra.mxu0 %v5314_v44  ;;  %2859 = vmatpush1.bf16.msra.mxu1 %v5316_v45  ;;  %v5381_v44 = vcombine.high %v258_v39, %v262_v40  ;;  %v265_v45 = vld [vmem:[#allocation5 + $0x450] sm:$0xff] }
 0x165   :  { %2737 = vmatprep.subr.bf16.mxu0 %v5323_v46  ;;  %2860 = vmatprep.subr.bf16.mxu1 %v5325_v48  ;;  %v269_v46 = vld [vmem:[#allocation5 + $0x470] sm:$0xff]  ;;  %v270_v48 = vld [vmem:[#allocation5 + $0x478] sm:$0xff] }
 0x166   :  { %v5387_v51 = vcombine.high %v265_v45, %v269_v46  ;;  %v5386_v58 = vcombine.low %v265_v45, %v269_v46  ;;  %v5388_v59 = vcombine.low %v266_v47, %v270_v48  ;;  %v321_v40 = vld [vmem:[#allocation5 + $0x610] sm:$0xff] }
 0x168   :  { %2738 = vmatpush1.bf16.msra.mxu0 %v5322_v52  ;;  %2861 = vmatpush1.bf16.msra.mxu1 %v5324_v53  ;;  %v5389_v52 = vcombine.high %v266_v47, %v270_v48  ;;  %v273_v53 = vld [vmem:[#allocation5 + $0x490] sm:$0xff] }
 0x169   :  { %2739 = vmatprep.subr.bf16.mxu0 %v5331_v54  ;;  %2862 = vmatprep.subr.bf16.mxu1 %v5333_v55  ;;  %v277_v54 = vld [vmem:[#allocation5 + $0x4b0] sm:$0xff]  ;;  %v274_v55 = vld [vmem:[#allocation5 + $0x498] sm:$0xff] }
 0x16a   :  { %v5395_v60 = vcombine.high %v273_v53, %v277_v54  ;;  %v5394_v2 = vcombine.low %v273_v53, %v277_v54  ;;  %v329_v48 = vld [vmem:[#allocation5 + $0x650] sm:$0xff] }
 0x16c   :  { %2740 = vmatpush1.bf16.msra.mxu0 %v5330_v61  ;;  %2863 = vmatpush1.bf16.msra.mxu1 %v5332_v62  ;;  %v5397_v61 = vcombine.high %v274_v55, %v278_v56  ;;  %v281_v62 = vld [vmem:[#allocation5 + $0x4d0] sm:$0xff] }
 0x16d   :  { %2741 = vmatprep.subr.bf16.mxu0 %v5339_v63  ;;  %2864 = vmatprep.subr.bf16.mxu1 %v5341_v0  ;;  %v285_v63 = vld [vmem:[#allocation5 + $0x4f0] sm:$0xff]  ;;  %v282_v0 = vld [vmem:[#allocation5 + $0x4d8] sm:$0xff] }
 0x16e   :  { %v5403_v3 = vcombine.high %v281_v62, %v285_v63  ;;  %v5405_v57 = vcombine.high %v282_v0, %v286_v1  ;;  %v5402_v8 = vcombine.low %v281_v62, %v285_v63  ;;  %v5404_v9 = vcombine.low %v282_v0, %v286_v1  ;;  %v345_v1 = vld [vmem:[#allocation5 + $0x6d0] sm:$0xff] }
 0x170   :  { %2742 = vmatpush1.bf16.msra.mxu0 %v5338_v4  ;;  %2865 = vmatpush1.bf16.msra.mxu1 %v5340_v5  ;;  %v289_v4 = vld [vmem:[#allocation5 + $0x510] sm:$0xff] }
 0x171   :  { %2743 = vmatprep.subr.bf16.mxu0 %v5347_v6  ;;  %2866 = vmatprep.subr.bf16.mxu1 %v5349_v7  ;;  %v293_v5 = vld [vmem:[#allocation5 + $0x530] sm:$0xff]  ;;  %v290_v6 = vld [vmem:[#allocation5 + $0x518] sm:$0xff] }
 0x172   :  { %v294_v7 = vld [vmem:[#allocation5 + $0x538] sm:$0xff]  ;;  %v5411_v10 = vcombine.high %v289_v4, %v293_v5 }
 0x173   :  { %v5412_v17 = vcombine.low %v290_v6, %v294_v7 }
 0x174   :  { %2744 = vmatpush1.bf16.msra.mxu0 %v5346_v13  ;;  %2867 = vmatpush1.bf16.msra.mxu1 %v5348_v14  ;;  %v301_v13 = vld [vmem:[#allocation5 + $0x570] sm:$0xff]  ;;  %v298_v14 = vld [vmem:[#allocation5 + $0x558] sm:$0xff] }
 0x175   :  { %2745 = vmatprep.subr.bf16.mxu0 %v5355_v15  ;;  %2868 = vmatprep.subr.bf16.mxu1 %v5357_v16  ;;  %v302_v15 = vld [vmem:[#allocation5 + $0x578] sm:$0xff]  ;;  %v5410_v16 = vcombine.low %v289_v4, %v293_v5  ;;  %v5419_v18 = vcombine.high %v297_v11, %v301_v13 }
 0x176   :  { %v5421_v19 = vcombine.high %v298_v14, %v302_v15  ;;  %v5420_v27 = vcombine.low %v298_v14, %v302_v15  ;;  %v361_v15 = vld [vmem:[#allocation5 + $0x750] sm:$0xff] }
 0x178   :  { %2746 = vmatpush1.bf16.msra.mxu0 %v5354_v21  ;;  %2869 = vmatpush1.bf16.msra.mxu1 %v5356_v22  ;;  %v309_v21 = vld [vmem:[#allocation5 + $0x5b0] sm:$0xff]  ;;  %v306_v22 = vld [vmem:[#allocation5 + $0x598] sm:$0xff] }
 0x179   :  { %2747 = vmatprep.subr.bf16.mxu0 %v5363_v24  ;;  %2870 = vmatprep.subr.bf16.mxu1 %v5365_v26  ;;  %v310_v24 = vld [vmem:[#allocation5 + $0x5b8] sm:$0xff]  ;;  %v5418_v26 = vcombine.low %v297_v11, %v301_v13  ;;  %v5427_v28 = vcombine.high %v305_v20, %v309_v21 }
 0x17a   :  { %v5429_v29 = vcombine.high %v306_v22, %v310_v24  ;;  %v5428_v36 = vcombine.low %v306_v22, %v310_v24  ;;  %v369_v24 = vld [vmem:[#allocation5 + $0x790] sm:$0xff] }
 0x17c   :  { %2748 = vmatpush1.bf16.msra.mxu0 %v5362_v31  ;;  %2871 = vmatpush1.bf16.msra.mxu1 %v5364_v32  ;;  %v317_v31 = vld [vmem:[#allocation5 + $0x5f0] sm:$0xff]  ;;  %v314_v32 = vld [vmem:[#allocation5 + $0x5d8] sm:$0xff] }
 0x17d   :  { %2749 = vmatprep.subr.bf16.mxu0 %v5371_v33  ;;  %2872 = vmatprep.subr.bf16.mxu1 %v5373_v35  ;;  %v318_v33 = vld [vmem:[#allocation5 + $0x5f8] sm:$0xff]  ;;  %v5426_v35 = vcombine.low %v305_v20, %v309_v21  ;;  %v5435_v37 = vcombine.high %v313_v30, %v317_v31 }
 0x17e   :  { %v5437_v39 = vcombine.high %v314_v32, %v318_v33  ;;  %v5436_v45 = vcombine.low %v314_v32, %v318_v33  ;;  %v377_v33 = vld [vmem:[#allocation5 + $0x7d0] sm:$0xff] }
 0x180   :  { %2750 = vmatpush1.bf16.msra.mxu0 %v5370_v41  ;;  %2873 = vmatpush1.bf16.msra.mxu1 %v5372_v42  ;;  %v325_v41 = vld [vmem:[#allocation5 + $0x630] sm:$0xff]  ;;  %v322_v42 = vld [vmem:[#allocation5 + $0x618] sm:$0xff] }
 0x181   :  { %2760 = vmatprep.subr.bf16.mxu0 %v5379_v43  ;;  %2883 = vmatprep.subr.bf16.mxu1 %v5381_v44  ;;  %v326_v43 = vld [vmem:[#allocation5 + $0x638] sm:$0xff]  ;;  %v5434_v44 = vcombine.low %v313_v30, %v317_v31  ;;  %v5443_v46 = vcombine.high %v321_v40, %v325_v41 }
 0x182   :  { %v5445_v47 = vcombine.high %v322_v42, %v326_v43  ;;  %v5444_v53 = vcombine.low %v322_v42, %v326_v43  ;;  %v385_v43 = vld [vmem:[#allocation5 + $0x810] sm:$0xff] }
 0x183   :  { %2752 = vmatmul.mubr.bf16.vlgmr.msra.gmra.mrb[4].mxu0 %v6794_v12  ;;  %2875 = vmatmul.mubr.bf16.vlgmr.msra.gmra.mrb[4].mxu1 %v6794_v12  ;;  %v5396_v12 = vcombine.low %v274_v55, %v278_v56  ;;  %v337_v56 = vld [vmem:[#allocation5 + $0x690] sm:$0xff] }
 0x184   :  { %2761 = vmatpush1.bf16.msra.mxu0 %v5378_v49  ;;  %2884 = vmatpush1.bf16.msra.mxu1 %v5380_v50  ;;  %v333_v49 = vld [vmem:[#allocation5 + $0x670] sm:$0xff]  ;;  %v330_v50 = vld [vmem:[#allocation5 + $0x658] sm:$0xff] }
 0x185   :  { %2762 = vmatprep.subr.bf16.mxu0 %v5387_v51  ;;  %2885 = vmatprep.subr.bf16.mxu1 %v5389_v52  ;;  %v334_v51 = vld [vmem:[#allocation5 + $0x678] sm:$0xff]  ;;  %v5442_v52 = vcombine.low %v321_v40, %v325_v41  ;;  %v5451_v54 = vcombine.high %v329_v48, %v333_v49 }
 0x186   :  { %2792 = vmatprep.mubr.bf16.mxu0 %v6796_v23  ;;  %2915 = vmatprep.mubr.bf16.mxu1 %v6796_v23  ;;  %v5413_v23 = vcombine.high %v290_v6, %v294_v7  ;;  %v5453_v55 = vcombine.high %v330_v50, %v334_v51  ;;  %v5452_v62 = vcombine.low %v330_v50, %v334_v51  ;;  %v353_v7 = vld [vmem:[#allocation5 + $0x710] sm:$0xff] }
 0x187   :  { %v393_v51 = vld [vmem:[#allocation5 + $0x850] sm:$0xff] }
 0x188   :  { %2763 = vmatpush1.bf16.msra.mxu0 %v5386_v58  ;;  %2886 = vmatpush1.bf16.msra.mxu1 %v5388_v59  ;;  %v341_v58 = vld [vmem:[#allocation5 + $0x6b0] sm:$0xff]  ;;  %v338_v59 = vld [vmem:[#allocation5 + $0x698] sm:$0xff] }
 0x189   :  { %2764 = vmatprep.subr.bf16.mxu0 %v5395_v60  ;;  %2887 = vmatprep.subr.bf16.mxu1 %v5397_v61  ;;  %v342_v60 = vld [vmem:[#allocation5 + $0x6b8] sm:$0xff]  ;;  %v5450_v61 = vcombine.low %v329_v48, %v333_v49  ;;  %v5459_v63 = vcombine.high %v337_v56, %v341_v58 }
 0x18a   :  { %v5461_v0 = vcombine.high %v338_v59, %v342_v60  ;;  %v5460_v4 = vcombine.low %v338_v59, %v342_v60  ;;  %v401_v60 = vld [vmem:[#allocation5 + $0x890] sm:$0xff] }
 0x18c   :  { %2765 = vmatpush1.bf16.msra.mxu0 %v5394_v2  ;;  %2888 = vmatpush1.bf16.msra.mxu1 %v5396_v12  ;;  %v349_v2 = vld [vmem:[#allocation5 + $0x6f0] sm:$0xff]  ;;  %v346_v12 = vld [vmem:[#allocation5 + $0x6d8] sm:$0xff] }
 0x18d   :  { %2766 = vmatprep.subr.bf16.mxu0 %v5403_v3  ;;  %2889 = vmatprep.subr.bf16.mxu1 %v5405_v57  ;;  %v350_v3 = vld [vmem:[#allocation5 + $0x6f8] sm:$0xff]  ;;  %v5458_v57 = vcombine.low %v337_v56, %v341_v58  ;;  %v5467_v5 = vcombine.high %v345_v1, %v349_v2 }
 0x18e   :  { %v5469_v6 = vcombine.high %v346_v12, %v350_v3  ;;  %v5468_v11 = vcombine.low %v346_v12, %v350_v3  ;;  %v409_v3 = vld [vmem:[#allocation5 + $0x8d0] sm:$0xff] }
 0x190   :  { %2767 = vmatpush1.bf16.msra.mxu0 %v5402_v8  ;;  %2890 = vmatpush1.bf16.msra.mxu1 %v5404_v9  ;;  %v357_v8 = vld [vmem:[#allocation5 + $0x730] sm:$0xff]  ;;  %v354_v9 = vld [vmem:[#allocation5 + $0x718] sm:$0xff] }
 0x191   :  { %2768 = vmatprep.subr.bf16.mxu0 %v5411_v10  ;;  %2891 = vmatprep.subr.bf16.mxu1 %v5413_v23  ;;  %v358_v10 = vld [vmem:[#allocation5 + $0x738] sm:$0xff]  ;;  %v5466_v23 = vcombine.low %v345_v1, %v349_v2  ;;  %v5475_v13 = vcombine.high %v353_v7, %v357_v8 }
 0x192   :  { %v5477_v14 = vcombine.high %v354_v9, %v358_v10  ;;  %v5476_v20 = vcombine.low %v354_v9, %v358_v10  ;;  %v417_v9 = vld [vmem:[#allocation5 + $0x910] sm:$0xff] }
 0x193   :  { %v421_v10 = vld [vmem:[#allocation5 + $0x930] sm:$0xff] }
 0x194   :  { %2769 = vmatpush1.bf16.msra.mxu0 %v5410_v16  ;;  %2892 = vmatpush1.bf16.msra.mxu1 %v5412_v17  ;;  %v365_v16 = vld [vmem:[#allocation5 + $0x770] sm:$0xff]  ;;  %v362_v17 = vld [vmem:[#allocation5 + $0x758] sm:$0xff] }
 0x195   :  { %2770 = vmatprep.subr.bf16.mxu0 %v5419_v18  ;;  %2893 = vmatprep.subr.bf16.mxu1 %v5421_v19  ;;  %v366_v18 = vld [vmem:[#allocation5 + $0x778] sm:$0xff]  ;;  %v5474_v19 = vcombine.low %v353_v7, %v357_v8  ;;  %v5483_v21 = vcombine.high %v361_v15, %v365_v16 }
 0x196   :  { %v5485_v22 = vcombine.high %v362_v17, %v366_v18  ;;  %v5484_v30 = vcombine.low %v362_v17, %v366_v18  ;;  %v429_v17 = vld [vmem:[#allocation5 + $0x970] sm:$0xff]  ;;  %v426_v18 = vld [vmem:[#allocation5 + $0x958] sm:$0xff] }
 0x198   :  { %2771 = vmatpush1.bf16.msra.mxu0 %v5418_v26  ;;  %2894 = vmatpush1.bf16.msra.mxu1 %v5420_v27  ;;  %v373_v26 = vld [vmem:[#allocation5 + $0x7b0] sm:$0xff]  ;;  %v370_v27 = vld [vmem:[#allocation5 + $0x798] sm:$0xff] }
 0x199   :  { %2772 = vmatprep.subr.bf16.mxu0 %v5427_v28  ;;  %2895 = vmatprep.subr.bf16.mxu1 %v5429_v29  ;;  %v374_v28 = vld [vmem:[#allocation5 + $0x7b8] sm:$0xff]  ;;  %v5482_v29 = vcombine.low %v361_v15, %v365_v16  ;;  %v5491_v31 = vcombine.high %v369_v24, %v373_v26  ;;  %v5539_v15 = vcombine.high %v417_v9, %v421_v10  ;;  %v425_v16 = vld [vmem:[#allocation5 + $0x950] sm:$0xff] }
 0x19a   :  { %v5493_v32 = vcombine.high %v370_v27, %v374_v28  ;;  %v5492_v40 = vcombine.low %v370_v27, %v374_v28  ;;  %v437_v27 = vld [vmem:[#allocation5 + $0x9b0] sm:$0xff]  ;;  %v434_v28 = vld [vmem:[#allocation5 + $0x998] sm:$0xff] }
 0x19c   :  { %2773 = vmatpush1.bf16.msra.mxu0 %v5426_v35  ;;  %2896 = vmatpush1.bf16.msra.mxu1 %v5428_v36  ;;  %v381_v35 = vld [vmem:[#allocation5 + $0x7f0] sm:$0xff]  ;;  %v378_v36 = vld [vmem:[#allocation5 + $0x7d8] sm:$0xff] }
 0x19d   :  { %2774 = vmatprep.subr.bf16.mxu0 %v5435_v37  ;;  %2897 = vmatprep.subr.bf16.mxu1 %v5437_v39  ;;  %v382_v37 = vld [vmem:[#allocation5 + $0x7f8] sm:$0xff]  ;;  %v5490_v39 = vcombine.low %v369_v24, %v373_v26  ;;  %v5499_v41 = vcombine.high %v377_v33, %v381_v35  ;;  %v433_v26 = vld [vmem:[#allocation5 + $0x990] sm:$0xff] }
 0x19e   :  { %v5501_v42 = vcombine.high %v378_v36, %v382_v37  ;;  %v5500_v48 = vcombine.low %v378_v36, %v382_v37  ;;  %v445_v36 = vld [vmem:[#allocation5 + $0x9f0] sm:$0xff]  ;;  %v442_v37 = vld [vmem:[#allocation5 + $0x9d8] sm:$0xff] }
 0x1a0   :  { %2775 = vmatpush1.bf16.msra.mxu0 %v5434_v44  ;;  %2898 = vmatpush1.bf16.msra.mxu1 %v5436_v45  ;;  %v389_v44 = vld [vmem:[#allocation5 + $0x830] sm:$0xff]  ;;  %v386_v45 = vld [vmem:[#allocation5 + $0x818] sm:$0xff] }
 0x1a1   :  { %2776 = vmatprep.subr.bf16.mxu0 %v5443_v46  ;;  %2899 = vmatprep.subr.bf16.mxu1 %v5445_v47  ;;  %v390_v46 = vld [vmem:[#allocation5 + $0x838] sm:$0xff]  ;;  %v5498_v47 = vcombine.low %v377_v33, %v381_v35  ;;  %v5507_v49 = vcombine.high %v385_v43, %v389_v44  ;;  %v441_v35 = vld [vmem:[#allocation5 + $0x9d0] sm:$0xff] }
 0x1a2   :  { %v5509_v50 = vcombine.high %v386_v45, %v390_v46  ;;  %v5508_v56 = vcombine.low %v386_v45, %v390_v46  ;;  %v453_v45 = vld [vmem:[#allocation5 + $0xa30] sm:$0xff]  ;;  %v450_v46 = vld [vmem:[#allocation5 + $0xa18] sm:$0xff] }
 0x1a4   :  { %2777 = vmatpush1.bf16.msra.mxu0 %v5442_v52  ;;  %2900 = vmatpush1.bf16.msra.mxu1 %v5444_v53  ;;  %v397_v52 = vld [vmem:[#allocation5 + $0x870] sm:$0xff]  ;;  %v394_v53 = vld [vmem:[#allocation5 + $0x858] sm:$0xff] }
 0x1a5   :  { %2778 = vmatprep.subr.bf16.mxu0 %v5451_v54  ;;  %2901 = vmatprep.subr.bf16.mxu1 %v5453_v55  ;;  %v398_v54 = vld [vmem:[#allocation5 + $0x878] sm:$0xff]  ;;  %v5506_v55 = vcombine.low %v385_v43, %v389_v44  ;;  %v5515_v58 = vcombine.high %v393_v51, %v397_v52  ;;  %v449_v44 = vld [vmem:[#allocation5 + $0xa10] sm:$0xff] }
 0x1a6   :  { %v5517_v59 = vcombine.high %v394_v53, %v398_v54  ;;  %v5516_v1 = vcombine.low %v394_v53, %v398_v54  ;;  %v461_v53 = vld [vmem:[#allocation5 + $0xa70] sm:$0xff]  ;;  %v458_v54 = vld [vmem:[#allocation5 + $0xa58] sm:$0xff] }
 0x1a8   :  { %2779 = vmatpush1.bf16.msra.mxu0 %v5450_v61  ;;  %2902 = vmatpush1.bf16.msra.mxu1 %v5452_v62  ;;  %v405_v61 = vld [vmem:[#allocation5 + $0x8b0] sm:$0xff]  ;;  %v402_v62 = vld [vmem:[#allocation5 + $0x898] sm:$0xff] }
 0x1a9   :  { %2780 = vmatprep.subr.bf16.mxu0 %v5459_v63  ;;  %2903 = vmatprep.subr.bf16.mxu1 %v5461_v0  ;;  %v406_v63 = vld [vmem:[#allocation5 + $0x8b8] sm:$0xff]  ;;  %v5514_v0 = vcombine.low %v393_v51, %v397_v52  ;;  %v5523_v2 = vcombine.high %v401_v60, %v405_v61  ;;  %v457_v52 = vld [vmem:[#allocation5 + $0xa50] sm:$0xff] }
 0x1aa   :  { %v5525_v12 = vcombine.high %v402_v62, %v406_v63 }
 0x1ac   :  { %2781 = vmatpush1.bf16.msra.mxu0 %v5458_v57  ;;  %2904 = vmatpush1.bf16.msra.mxu1 %v5460_v4  ;;  %v413_v57 = vld [vmem:[#allocation5 + $0x8f0] sm:$0xff]  ;;  %v410_v4 = vld [vmem:[#allocation5 + $0x8d8] sm:$0xff] }
 0x1ad   :  { %2782 = vmatprep.subr.bf16.mxu0 %v5467_v5  ;;  %2905 = vmatprep.subr.bf16.mxu1 %v5469_v6  ;;  %v414_v5 = vld [vmem:[#allocation5 + $0x8f8] sm:$0xff]  ;;  %v5522_v6 = vcombine.low %v401_v60, %v405_v61  ;;  %v5531_v7 = vcombine.high %v409_v3, %v413_v57  ;;  %v465_v61 = vld [vmem:[#allocation5 + $0xa90] sm:$0xff] }
 0x1ae   :  { %v5533_v8 = vcombine.high %v410_v4, %v414_v5 }
 0x1b0   :  { %2783 = vmatpush1.bf16.msra.mxu0 %v5466_v23  ;;  %2906 = vmatpush1.bf16.msra.mxu1 %v5468_v11  ;;  %v418_v23 = vld [vmem:[#allocation5 + $0x918] sm:$0xff] }
 0x1b1   :  { %2784 = vmatprep.subr.bf16.mxu0 %v5475_v13  ;;  %2907 = vmatprep.subr.bf16.mxu1 %v5477_v14  ;;  %v422_v11 = vld [vmem:[#allocation5 + $0x938] sm:$0xff]  ;;  %v5530_v13 = vcombine.low %v409_v3, %v413_v57  ;;  %v5532_v14 = vcombine.low %v410_v4, %v414_v5  ;;  %v473_v57 = vld [vmem:[#allocation5 + $0xad0] sm:$0xff] }
 0x1b2   :  { %v477_v4 = vld [vmem:[#allocation5 + $0xaf0] sm:$0xff]  ;;  %v474_v5 = vld [vmem:[#allocation5 + $0xad8] sm:$0xff] }
 0x1b4   :  { %2785 = vmatpush1.bf16.msra.mxu0 %v5474_v19  ;;  %2908 = vmatpush1.bf16.msra.mxu1 %v5476_v20  ;;  %v430_v19 = vld [vmem:[#allocation5 + $0x978] sm:$0xff]  ;;  %v5538_v20 = vcombine.low %v417_v9, %v421_v10  ;;  %v481_v10 = vld [vmem:[#allocation5 + $0xb10] sm:$0xff] }
 0x1b5   :  { %2786 = vmatprep.subr.bf16.mxu0 %v5483_v21  ;;  %2909 = vmatprep.subr.bf16.mxu1 %v5485_v22  ;;  %v5540_v21 = vcombine.low %v418_v23, %v422_v11  ;;  %v5547_v22 = vcombine.high %v425_v16, %v429_v17  ;;  %v5549_v24 = vcombine.high %v426_v18, %v430_v19 }
 0x1b8   :  { %2787 = vmatpush1.bf16.msra.mxu0 %v5482_v29  ;;  %2910 = vmatpush1.bf16.msra.mxu1 %v5484_v30  ;;  %v438_v29 = vld [vmem:[#allocation5 + $0x9b8] sm:$0xff]  ;;  %v5546_v30 = vcombine.low %v425_v16, %v429_v17  ;;  %v489_v17 = vld [vmem:[#allocation5 + $0xb50] sm:$0xff] }
 0x1b9   :  { %2788 = vmatprep.subr.bf16.mxu0 %v5491_v31  ;;  %2911 = vmatprep.subr.bf16.mxu1 %v5493_v32  ;;  %v5548_v31 = vcombine.low %v426_v18, %v430_v19  ;;  %v5555_v32 = vcombine.high %v433_v26, %v437_v27  ;;  %v5557_v33 = vcombine.high %v434_v28, %v438_v29  ;;  %v493_v18 = vld [vmem:[#allocation5 + $0xb70] sm:$0xff]  ;;  %v490_v19 = vld [vmem:[#allocation5 + $0xb58] sm:$0xff] }
 0x1bc   :  { %2789 = vmatpush1.bf16.msra.mxu0 %v5490_v39  ;;  %2912 = vmatpush1.bf16.msra.mxu1 %v5492_v40  ;;  %v446_v39 = vld [vmem:[#allocation5 + $0x9f8] sm:$0xff]  ;;  %v5554_v40 = vcombine.low %v433_v26, %v437_v27  ;;  %v497_v27 = vld [vmem:[#allocation5 + $0xb90] sm:$0xff] }
 0x1bd   :  { %2790 = vmatprep.subr.bf16.mxu0 %v5499_v41  ;;  %2913 = vmatprep.subr.bf16.mxu1 %v5501_v42  ;;  %v5556_v41 = vcombine.low %v434_v28, %v438_v29  ;;  %v5563_v42 = vcombine.high %v441_v35, %v445_v36  ;;  %v5565_v43 = vcombine.high %v442_v37, %v446_v39  ;;  %v501_v28 = vld [vmem:[#allocation5 + $0xbb0] sm:$0xff]  ;;  %v498_v29 = vld [vmem:[#allocation5 + $0xb98] sm:$0xff] }
 0x1c0   :  { %2791 = vmatpush1.bf16.msra.mxu0 %v5498_v47  ;;  %2914 = vmatpush1.bf16.msra.mxu1 %v5500_v48  ;;  %v454_v47 = vld [vmem:[#allocation5 + $0xa38] sm:$0xff]  ;;  %v5562_v48 = vcombine.low %v441_v35, %v445_v36  ;;  %v505_v36 = vld [vmem:[#allocation5 + $0xbd0] sm:$0xff] }
 0x1c1   :  { %2801 = vmatprep.subr.bf16.mxu0 %v5507_v49  ;;  %2924 = vmatprep.subr.bf16.mxu1 %v5509_v50  ;;  %v5564_v49 = vcombine.low %v442_v37, %v446_v39  ;;  %v5571_v50 = vcombine.high %v449_v44, %v453_v45  ;;  %v5573_v51 = vcombine.high %v450_v46, %v454_v47  ;;  %v509_v37 = vld [vmem:[#allocation5 + $0xbf0] sm:$0xff]  ;;  %v506_v39 = vld [vmem:[#allocation5 + $0xbd8] sm:$0xff] }
 0x1c3   :  { %2793 = vmatmul.mubr.bf16.vlgmr.msra.gmra.mrb[4].mxu0 %v6802_v25  ;;  %2916 = vmatmul.mubr.bf16.vlgmr.msra.gmra.mrb[4].mxu1 %v6802_v25  ;;  %v5524_v25 = vcombine.low %v402_v62, %v406_v63  ;;  %v469_v62 = vld [vmem:[#allocation5 + $0xab0] sm:$0xff]  ;;  %v466_v63 = vld [vmem:[#allocation5 + $0xa98] sm:$0xff] }
 0x1c4   :  { %2802 = vmatpush1.bf16.msra.mxu0 %v5506_v55  ;;  %2925 = vmatpush1.bf16.msra.mxu1 %v5508_v56  ;;  %v462_v55 = vld [vmem:[#allocation5 + $0xa78] sm:$0xff]  ;;  %v5570_v56 = vcombine.low %v449_v44, %v453_v45  ;;  %v5626_v45 = vcombine.low %v505_v36, %v509_v37 }
 0x1c5   :  { %2803 = vmatprep.subr.bf16.mxu0 %v5515_v58  ;;  %2926 = vmatprep.subr.bf16.mxu1 %v5517_v59  ;;  %v5572_v58 = vcombine.low %v450_v46, %v454_v47  ;;  %v5579_v59 = vcombine.high %v457_v52, %v461_v53  ;;  %v5581_v60 = vcombine.high %v458_v54, %v462_v55  ;;  %v6047_v47 = vld [vmem:[#allocation8 + $0x4] ss:$16 sps:$4 sm:$0xff]  }
 0x1c6   :  { %2833 = vmatprep.mubr.bf16.mxu0 %v6804_v34  ;;  %2956 = vmatprep.mubr.bf16.mxu1 %v6804_v34  ;;  %v5541_v34 = vcombine.high %v418_v23, %v422_v11  ;;  %v485_v23 = vld [vmem:[#allocation5 + $0xb30] sm:$0xff]  ;;  %v482_v11 = vld [vmem:[#allocation5 + $0xb18] sm:$0xff] }
 0x1c8   :  { %2804 = vmatpush1.bf16.msra.mxu0 %v5514_v0  ;;  %2927 = vmatpush1.bf16.msra.mxu1 %v5516_v1  ;;  %v470_v0 = vld [vmem:[#allocation5 + $0xab8] sm:$0xff]  ;;  %v5578_v1 = vcombine.low %v457_v52, %v461_v53  ;;  %v6056_v52 = vld [vmem:[#allocation8 + $0x2c] ss:$16 sps:$4 sm:$0xff]  }
 0x1c9   :  { %2805 = vmatprep.subr.bf16.mxu0 %v5523_v2  ;;  %2928 = vmatprep.subr.bf16.mxu1 %v5525_v12  ;;  %v5580_v2 = vcombine.low %v458_v54, %v462_v55  ;;  %v5587_v12 = vcombine.high %v465_v61, %v469_v62  ;;  %v5589_v3 = vcombine.high %v466_v63, %v470_v0  ;;  %v6051_v53 = vld [vmem:[#allocation8 + $0x20] ss:$16 sps:$4 sm:$0xff]   ;;  %v6054_v54 = vld [vmem:[#allocation8 + $0x28] ss:$16 sps:$4 sm:$0xff]   ;;  %v6059_v55 = vld [vmem:[#allocation8 + $0x44] ss:$16 sps:$4 sm:$0xff]  }
 0x1cc   :  { %2806 = vmatpush1.bf16.msra.mxu0 %v5522_v6  ;;  %2929 = vmatpush1.bf16.msra.mxu1 %v5524_v25  ;;  %v478_v6 = vld [vmem:[#allocation5 + $0xaf8] sm:$0xff]  ;;  %v5586_v25 = vcombine.low %v465_v61, %v469_v62  ;;  %v6068_v62 = vld [vmem:[#allocation8 + $0x6c] ss:$16 sps:$4 sm:$0xff]  }
 0x1cd   :  { %2807 = vmatprep.subr.bf16.mxu0 %v5531_v7  ;;  %2930 = vmatprep.subr.bf16.mxu1 %v5533_v8  ;;  %v5588_v7 = vcombine.low %v466_v63, %v470_v0  ;;  %v5595_v8 = vcombine.high %v473_v57, %v477_v4  ;;  %v5597_v9 = vcombine.high %v474_v5, %v478_v6  ;;  %v6065_v61 = vld [vmem:[#allocation8 + $0x64] ss:$16 sps:$4 sm:$0xff]   ;;  %v6063_v63 = vld [vmem:[#allocation8 + $0x60] ss:$16 sps:$4 sm:$0xff]   ;;  %v6066_v0 = vld [vmem:[#allocation8 + $0x68] ss:$16 sps:$4 sm:$0xff]  }
 0x1d0   :  { %2808 = vmatpush1.bf16.msra.mxu0 %v5530_v13  ;;  %2931 = vmatpush1.bf16.msra.mxu1 %v5532_v14  ;;  %v486_v13 = vld [vmem:[#allocation5 + $0xb38] sm:$0xff]  ;;  %v5594_v14 = vcombine.low %v473_v57, %v477_v4  ;;  %v6072_v57 = vld [vmem:[#allocation8 + $0x88] ss:$16 sps:$4 sm:$0xff]  }
 0x1d1   :  { %2809 = vmatprep.subr.bf16.mxu0 %v5539_v15  ;;  %2932 = vmatprep.subr.bf16.mxu1 %v5541_v34  ;;  %v5596_v15 = vcombine.low %v474_v5, %v478_v6  ;;  %v5603_v34 = vcombine.high %v481_v10, %v485_v23  ;;  %v5605_v16 = vcombine.high %v482_v11, %v486_v13  ;;  %v6829_v4 = vld [vmem:[#allocation7] sm:$0xff]  ;;  %v6077_v5 = vld [vmem:[#allocation8 + $0xa4] ss:$16 sps:$4 sm:$0xff]  }
 0x1d2   :  { %v6080_v6 = vld [vmem:[#allocation8 + $0xac] ss:$16 sps:$4 sm:$0xff]  }
 0x1d4   :  { %2810 = vmatpush1.bf16.msra.mxu0 %v5538_v20  ;;  %2933 = vmatpush1.bf16.msra.mxu1 %v5540_v21  ;;  %v494_v20 = vld [vmem:[#allocation5 + $0xb78] sm:$0xff]  ;;  %v5602_v21 = vcombine.low %v481_v10, %v485_v23  ;;  %v6086_v23 = vld [vmem:[#allocation8 + $0xcc] ss:$16 sps:$4 sm:$0xff]  }
 0x1d5   :  { %2811 = vmatprep.subr.bf16.mxu0 %v5547_v22  ;;  %2934 = vmatprep.subr.bf16.mxu1 %v5549_v24  ;;  %v5604_v22 = vcombine.low %v482_v11, %v486_v13  ;;  %v5611_v24 = vcombine.high %v489_v17, %v493_v18  ;;  %v5613_v26 = vcombine.high %v490_v19, %v494_v20 }
 0x1d8   :  { %2812 = vmatpush1.bf16.msra.mxu0 %v5546_v30  ;;  %2935 = vmatpush1.bf16.msra.mxu1 %v5548_v31  ;;  %v502_v30 = vld [vmem:[#allocation5 + $0xbb8] sm:$0xff]  ;;  %v5610_v31 = vcombine.low %v489_v17, %v493_v18 }
 0x1d9   :  { %2813 = vmatprep.subr.bf16.mxu0 %v5555_v32  ;;  %2936 = vmatprep.subr.bf16.mxu1 %v5557_v33  ;;  %v5612_v32 = vcombine.low %v490_v19, %v494_v20  ;;  %v5619_v33 = vcombine.high %v497_v27, %v501_v28  ;;  %v5621_v35 = vcombine.high %v498_v29, %v502_v30  ;;  %v6084_v19 = vld [vmem:[#allocation8 + $0xc8] ss:$16 sps:$4 sm:$0xff]   ;;  %v6089_v20 = vld [vmem:[#allocation8 + $0xe4] ss:$16 sps:$4 sm:$0xff]  }
 0x1dc   :  { %2814 = vmatpush1.bf16.msra.mxu0 %v5554_v40  ;;  %2937 = vmatpush1.bf16.msra.mxu1 %v5556_v41  ;;  %v510_v40 = vld [vmem:[#allocation5 + $0xbf8] sm:$0xff]  ;;  %v5618_v41 = vcombine.low %v497_v27, %v501_v28  ;;  %v6090_v28 = vld [vmem:[#allocation8 + $0xe8] ss:$16 sps:$4 sm:$0xff]  }
 0x1dd   :  { %2815 = vmatprep.subr.bf16.mxu0 %v5563_v42  ;;  %2938 = vmatprep.subr.bf16.mxu1 %v5565_v43  ;;  %v5620_v42 = vcombine.low %v498_v29, %v502_v30  ;;  %v5627_v43 = vcombine.high %v505_v36, %v509_v37  ;;  %v5629_v44 = vcombine.high %v506_v39, %v510_v40  ;;  %v6087_v27 = vld [vmem:[#allocation8 + $0xe0] ss:$16 sps:$4 sm:$0xff]   ;;  %v6095_v29 = vld [vmem:[#allocation8 + $0x104] ss:$16 sps:$4 sm:$0xff]   ;;  %v6098_v30 = vld [vmem:[#allocation8 + $0x10c] ss:$16 sps:$4 sm:$0xff]  }
 0x1de   :  { %v5628_v46 = vcombine.low %v506_v39, %v510_v40  ;;  %v6099_v36 = vld [vmem:[#allocation8 + $0x120] ss:$16 sps:$4 sm:$0xff]   ;;  %v6102_v37 = vld [vmem:[#allocation8 + $0x128] ss:$16 sps:$4 sm:$0xff]   ;;  %v6107_v39 = vld [vmem:[#allocation8 + $0x144] ss:$16 sps:$4 sm:$0xff]  }
 0x1df   :  { %v6110_v40 = vld [vmem:[#allocation8 + $0x14c] ss:$16 sps:$4 sm:$0xff]  }
 0x1e0   :  { %2816 = vmatpush1.bf16.msra.mxu0 %v5562_v48  ;;  %2939 = vmatpush1.bf16.msra.mxu1 %v5564_v49  ;;  %v6050_v48 = vld [vmem:[#allocation8 + $0xc] ss:$16 sps:$4 sm:$0xff]   ;;  %v6045_v49 = vld [vmem:[#allocation8] ss:$16 sps:$4 sm:$0xff]  }
 0x1e1   :  { %2817 = vmatprep.subr.bf16.mxu0 %v5571_v50  ;;  %2940 = vmatprep.subr.bf16.mxu1 %v5573_v51  ;;  %v6048_v50 = vld [vmem:[#allocation8 + $0x8] ss:$16 sps:$4 sm:$0xff]   ;;  %v6053_v51 = vld [vmem:[#allocation8 + $0x24] ss:$16 sps:$4 sm:$0xff]  }
 0x1e4   :  { %2818 = vmatpush1.bf16.msra.mxu0 %v5570_v56  ;;  %2941 = vmatpush1.bf16.msra.mxu1 %v5572_v58  ;;  %v6062_v56 = vld [vmem:[#allocation8 + $0x4c] ss:$16 sps:$4 sm:$0xff]   ;;  %v6057_v58 = vld [vmem:[#allocation8 + $0x40] ss:$16 sps:$4 sm:$0xff]  }
 0x1e5   :  { %2819 = vmatprep.subr.bf16.mxu0 %v5579_v59  ;;  %2942 = vmatprep.subr.bf16.mxu1 %v5581_v60  ;;  %v513_v59 = vlaneseq  ;;  %v6060_v60 = vld [vmem:[#allocation8 + $0x48] ss:$16 sps:$4 sm:$0xff]  }
 0x1e8   :  { %2820 = vmatpush1.bf16.msra.mxu0 %v5578_v1  ;;  %2943 = vmatpush1.bf16.msra.mxu1 %v5580_v2  ;;  %v6071_v1 = vld [vmem:[#allocation8 + $0x84] ss:$16 sps:$4 sm:$0xff]   ;;  %v6074_v2 = vld [vmem:[#allocation8 + $0x8c] ss:$16 sps:$4 sm:$0xff]  }
 0x1e9   :  { %2821 = vmatprep.subr.bf16.mxu0 %v5587_v12  ;;  %2944 = vmatprep.subr.bf16.mxu1 %v5589_v3  ;;  %v6069_v12 = vld [vmem:[#allocation8 + $0x80] ss:$16 sps:$4 sm:$0xff]  }
 0x1ec   :  { %2822 = vmatpush1.bf16.msra.mxu0 %v5586_v25  ;;  %2945 = vmatpush1.bf16.msra.mxu1 %v5588_v7  ;;  %v6075_v7 = vld [vmem:[#allocation8 + $0xa0] ss:$16 sps:$4 sm:$0xff]  }
 0x1ed   :  { %2823 = vmatprep.subr.bf16.mxu0 %v5595_v8  ;;  %2946 = vmatprep.subr.bf16.mxu1 %v5597_v9  ;;  %v6078_v8 = vld [vmem:[#allocation8 + $0xa8] ss:$16 sps:$4 sm:$0xff]   ;;  %v6083_v9 = vld [vmem:[#allocation8 + $0xc4] ss:$16 sps:$4 sm:$0xff]  }
 0x1f0   :  { %2824 = vmatpush1.bf16.msra.mxu0 %v5594_v14  ;;  %2947 = vmatpush1.bf16.msra.mxu1 %v5596_v15 }
 0x1f1   :  { %2825 = vmatprep.subr.bf16.mxu0 %v5603_v34  ;;  %2948 = vmatprep.subr.bf16.mxu1 %v5605_v16  ;;  %v6081_v16 = vld [vmem:[#allocation8 + $0xc0] ss:$16 sps:$4 sm:$0xff]  }
 0x1f4   :  { %2826 = vmatpush1.bf16.msra.mxu0 %v5602_v21  ;;  %2949 = vmatpush1.bf16.msra.mxu1 %v5604_v22 }
 0x1f5   :  { %2827 = vmatprep.subr.bf16.mxu0 %v5611_v24  ;;  %2950 = vmatprep.subr.bf16.mxu1 %v5613_v26  ;;  %v6092_v24 = vld [vmem:[#allocation8 + $0xec] ss:$16 sps:$4 sm:$0xff]  }
 0x1f8   :  { %2828 = vmatpush1.bf16.msra.mxu0 %v5610_v31  ;;  %2951 = vmatpush1.bf16.msra.mxu1 %v5612_v32  ;;  %v6093_v31 = vld [vmem:[#allocation8 + $0x100] ss:$16 sps:$4 sm:$0xff]   ;;  %v6096_v32 = vld [vmem:[#allocation8 + $0x108] ss:$16 sps:$4 sm:$0xff]  }
 0x1f9   :  { %2829 = vmatprep.subr.bf16.mxu0 %v5619_v33  ;;  %2952 = vmatprep.subr.bf16.mxu1 %v5621_v35  ;;  %v6101_v33 = vld [vmem:[#allocation8 + $0x124] ss:$16 sps:$4 sm:$0xff]   ;;  %v6104_v35 = vld [vmem:[#allocation8 + $0x12c] ss:$16 sps:$4 sm:$0xff]  }
 0x1fc   :  { %2830 = vmatpush1.bf16.msra.mxu0 %v5618_v41  ;;  %2953 = vmatpush1.bf16.msra.mxu1 %v5620_v42  ;;  %v6105_v41 = vld [vmem:[#allocation8 + $0x140] ss:$16 sps:$4 sm:$0xff]   ;;  %v6108_v42 = vld [vmem:[#allocation8 + $0x148] ss:$16 sps:$4 sm:$0xff]  }
 0x1fd   :  { %2831 = vmatprep.subr.bf16.mxu0 %v5627_v43  ;;  %2954 = vmatprep.subr.bf16.mxu1 %v5629_v44  ;;  %v6113_v43 = vld [vmem:[#allocation8 + $0x164] ss:$16 sps:$4 sm:$0xff]   ;;  %v6116_v44 = vld [vmem:[#allocation8 + $0x16c] ss:$16 sps:$4 sm:$0xff]  }
 0x200   :  { %2832 = vmatpush1.bf16.msra.mxu0 %v5626_v45  ;;  %2955 = vmatpush1.bf16.msra.mxu1 %v5628_v46  ;;  %v6111_v45 = vld [vmem:[#allocation8 + $0x160] ss:$16 sps:$4 sm:$0xff]   ;;  %v6114_v46 = vld [vmem:[#allocation8 + $0x168] ss:$16 sps:$4 sm:$0xff]  }
 0x201   :  { %4539 = vmatprep.subr.bf16.mxu0 %v6047_v47  ;;  %4703 = vmatprep.subr.bf16.mxu1 %v6050_v48  ;;  %v6119_v47 = vld [vmem:[#allocation8 + $0x184] ss:$16 sps:$4 sm:$0xff]   ;;  %v6122_v48 = vld [vmem:[#allocation8 + $0x18c] ss:$16 sps:$4 sm:$0xff]  }
 0x203   :  { %2834 = vmatmul.mubr.bf16.vlgmr.msra.gmra.mrb[4].mxu0 %v6810_v38  ;;  %2957 = vmatmul.mubr.bf16.vlgmr.msra.gmra.mrb[4].mxu1 %v6810_v38  ;;  %v6826_v38 = vshrl.u32 %v513_v59, 7  ;;  %v6131_v59 = vld [vmem:[#allocation8 + $0x1c4] ss:$16 sps:$4 sm:$0xff]  }
 0x204   :  { %4540 = vmatpush1.bf16.msra.mxu0 %v6045_v49  ;;  %4704 = vmatpush1.bf16.msra.mxu1 %v6048_v50  ;;  %v6117_v49 = vld [vmem:[#allocation8 + $0x180] ss:$16 sps:$4 sm:$0xff]  }
 0x205   :  { %4541 = vmatprep.subr.bf16.mxu0 %v6053_v51  ;;  %4705 = vmatprep.subr.bf16.mxu1 %v6056_v52  ;;  %v519_v3 = vsub.s32 1, %v6826_v38  ;;  %v515_v50 = vsub.s32 0, %v6826_v38  ;;  %v6120_v51 = vld [vmem:[#allocation8 + $0x188] ss:$16 sps:$4 sm:$0xff]   ;;  %v6125_v52 = vld [vmem:[#allocation8 + $0x1a4] ss:$16 sps:$4 sm:$0xff]  }
 0x207   :  { %v520_v25 = vrot.slane %v6829_v4, %v519_v3 }
 0x208   :  { %4542 = vmatpush1.bf16.msra.mxu0 %v6051_v53  ;;  %4706 = vmatpush1.bf16.msra.mxu1 %v6054_v54  ;;  %v6128_v53 = vld [vmem:[#allocation8 + $0x1ac] ss:$16 sps:$4 sm:$0xff]   ;;  %v527_v54 = vsub.s32 3, %v6826_v38 }
 0x209   :  { %4543 = vmatprep.subr.bf16.mxu0 %v6059_v55  ;;  %4707 = vmatprep.subr.bf16.mxu1 %v6062_v56  ;;  %v6123_v55 = vld [vmem:[#allocation8 + $0x1a0] ss:$16 sps:$4 sm:$0xff]   ;;  %v516_v56 = vrot.slane %v6829_v4, %v515_v50 }
 0x20c   :  { %4544 = vmatpush1.bf16.msra.mxu0 %v6057_v58  ;;  %4708 = vmatpush1.bf16.msra.mxu1 %v6060_v60  ;;  %v6126_v58 = vld [vmem:[#allocation8 + $0x1a8] ss:$16 sps:$4 sm:$0xff]   ;;  %v6134_v60 = vld [vmem:[#allocation8 + $0x1cc] ss:$16 sps:$4 sm:$0xff]  }
 0x20d   :  { %4545 = vmatprep.subr.bf16.mxu0 %v6065_v61  ;;  %4709 = vmatprep.subr.bf16.mxu1 %v6068_v62  ;;  %v528_v61 = vrot.slane %v6829_v4, %v527_v54  ;;  %v6129_v62 = vld [vmem:[#allocation8 + $0x1c0] ss:$16 sps:$4 sm:$0xff]  }
 0x210   :  { %4546 = vmatpush1.bf16.msra.mxu0 %v6063_v63  ;;  %4710 = vmatpush1.bf16.msra.mxu1 %v6066_v0  ;;  %v6132_v0 = vld [vmem:[#allocation8 + $0x1c8] ss:$16 sps:$4 sm:$0xff]  }
 0x211   :  { %4547 = vmatprep.subr.bf16.mxu0 %v6071_v1  ;;  %4711 = vmatprep.subr.bf16.mxu1 %v6074_v2  ;;  %v6137_v1 = vld [vmem:[#allocation8 + $0x1e4] ss:$16 sps:$4 sm:$0xff]   ;;  %v6140_v2 = vld [vmem:[#allocation8 + $0x1ec] ss:$16 sps:$4 sm:$0xff]  }
 0x214   :  { %4548 = vmatpush1.bf16.msra.mxu0 %v6069_v12  ;;  %4712 = vmatpush1.bf16.msra.mxu1 %v6072_v57  ;;  %v6135_v57 = vld [vmem:[#allocation8 + $0x1e0] ss:$16 sps:$4 sm:$0xff]  }
 0x215   :  { %4549 = vmatprep.subr.bf16.mxu0 %v6077_v5  ;;  %4713 = vmatprep.subr.bf16.mxu1 %v6080_v6  ;;  %v6138_v6 = vld [vmem:[#allocation8 + $0x1e8] ss:$16 sps:$4 sm:$0xff]  }
 0x216   :  { %v6834_v10 = vpop.f32.mrb[0].mxu0  ;;  %v6836_v11 = vpop.f32.mrb[0].mxu1 }
 0x217   :  { %v2591_v13 = vpop.f32.mrb[1].mxu0  ;;  %v6838_v15 = vpop.f32.mrb[1].mxu1  ;;  %v5963_v63 = vadd.f32 %v6834_v10, %v516_v56  ;;  %v6206_v56 = vld [vmem:[#allocation8 + $0x34c] ss:$16 sps:$4 sm:$0xff]  }
 0x218   :  { %v5964_v14 = vadd.f32 %v2591_v13, %v520_v25  ;;  %v2593_v34 = vpop.f32.mrb[2].mxu0  ;;  %4550 = vmatpush1.bf16.msra.mxu0 %v6075_v7  ;;  %v2716_v17 = vpop.f32.mrb[2].mxu1  ;;  %4714 = vmatpush1.bf16.msra.mxu1 %v6078_v8  ;;  %v5966_v12 = vadd.f32 %v6838_v15, %v528_v61  ;;  %v6143_v25 = vld [vmem:[#allocation8 + $0x204] ss:$16 sps:$4 sm:$0xff]   ;;  %v6146_v7 = vld [vmem:[#allocation8 + $0x20c] ss:$16 sps:$4 sm:$0xff]  }
 0x219   :  { %v2594_v18 = vpop.f32.mrb[3].mxu0  ;;  %4551 = vmatprep.subr.bf16.mxu0 %v6083_v9  ;;  %v2717_v22 = vpop.f32.mrb[3].mxu1  ;;  %4715 = vmatprep.subr.bf16.mxu1 %v6086_v23  ;;  %v2965_v5 = vmax.f32 %v5963_v63, 0.0  ;;  %v6141_v9 = vld [vmem:[#allocation8 + $0x200] ss:$16 sps:$4 sm:$0xff]  }
 0x21a   :  { %v2966_v21 = vmax.f32 %v5964_v14, 0.0  ;;  %v2968_v8 = vmax.f32 %v5966_v12, 0.0  ;;  %v6144_v23 = vld [vmem:[#allocation8 + $0x208] ss:$16 sps:$4 sm:$0xff]   ;;  %v6149_v13 = vld [vmem:[#allocation8 + $0x224] ss:$16 sps:$4 sm:$0xff]  }
 0x21b   :  { %v2973_v10 = vpack.c.bf16 %v2965_v5, %v2965_v5  ;;  %v6152_v15 = vld [vmem:[#allocation8 + $0x22c] ss:$16 sps:$4 sm:$0xff]   ;;  %v6147_v34 = vld [vmem:[#allocation8 + $0x220] ss:$16 sps:$4 sm:$0xff]   ;;  %v6155_v17 = vld [vmem:[#allocation8 + $0x244] ss:$16 sps:$4 sm:$0xff]  }
 0x21c   :  { %v2974_v26 = vpack.c.bf16 %v2966_v21, %v2966_v21  ;;  %4552 = vmatpush1.bf16.msra.mxu0 %v6081_v16  ;;  %4716 = vmatpush1.bf16.msra.mxu1 %v6084_v19  ;;  %v2976_v14 = vpack.c.bf16 %v2968_v8, %v2968_v8  ;;  %v6150_v16 = vld [vmem:[#allocation8 + $0x228] ss:$16 sps:$4 sm:$0xff]   ;;  %v6158_v18 = vld [vmem:[#allocation8 + $0x24c] ss:$16 sps:$4 sm:$0xff]   ;;  %v6153_v19 = vld [vmem:[#allocation8 + $0x240] ss:$16 sps:$4 sm:$0xff]  }
 0x21d   :  { %4553 = vmatprep.subr.bf16.mxu0 %v6089_v20  ;;  %4717 = vmatprep.subr.bf16.mxu1 %v6092_v24  ;;  %v6156_v20 = vld [vmem:[#allocation8 + $0x248] ss:$16 sps:$4 sm:$0xff]   ;;  %v6161_v21 = vld [vmem:[#allocation8 + $0x264] ss:$16 sps:$4 sm:$0xff]   ;;  %v6164_v22 = vld [vmem:[#allocation8 + $0x26c] ss:$16 sps:$4 sm:$0xff]  }
 0x21e   :  { %4571 = vmatprep.mubr.bf16.mxu0 %v2974_v26  ;;  %4735 = vmatprep.mubr.bf16.mxu1 %v2974_v26  ;;  %v6159_v24 = vld [vmem:[#allocation8 + $0x260] ss:$16 sps:$4 sm:$0xff]   ;;  %v6162_v26 = vld [vmem:[#allocation8 + $0x268] ss:$16 sps:$4 sm:$0xff]   ;;  %v6212_v61 = vld [vmem:[#allocation8 + $0x36c] ss:$16 sps:$4 sm:$0xff]  }
 0x21f   :  { %v6210_v63 = vld [vmem:[#allocation8 + $0x368] ss:$16 sps:$4 sm:$0xff]   ;;  %v523_v12 = vsub.s32 2, %v6826_v38  ;;  %v6221_v5 = vld [vmem:[#allocation8 + $0x3a4] ss:$16 sps:$4 sm:$0xff]  }
 0x220   :  { %4554 = vmatpush1.bf16.msra.mxu0 %v6087_v27  ;;  %4718 = vmatpush1.bf16.msra.mxu1 %v6090_v28  ;;  %v6167_v27 = vld [vmem:[#allocation8 + $0x284] ss:$16 sps:$4 sm:$0xff]   ;;  %v6170_v28 = vld [vmem:[#allocation8 + $0x28c] ss:$16 sps:$4 sm:$0xff]   ;;  %v6222_v8 = vld [vmem:[#allocation8 + $0x3a8] ss:$16 sps:$4 sm:$0xff]  }
 0x221   :  { %4555 = vmatprep.subr.bf16.mxu0 %v6095_v29  ;;  %4719 = vmatprep.subr.bf16.mxu1 %v6098_v30  ;;  %v6165_v29 = vld [vmem:[#allocation8 + $0x280] ss:$16 sps:$4 sm:$0xff]   ;;  %v6168_v30 = vld [vmem:[#allocation8 + $0x288] ss:$16 sps:$4 sm:$0xff]  }
 0x224   :  { %4556 = vmatpush1.bf16.msra.mxu0 %v6093_v31  ;;  %4720 = vmatpush1.bf16.msra.mxu1 %v6096_v32  ;;  %v6173_v31 = vld [vmem:[#allocation8 + $0x2a4] ss:$16 sps:$4 sm:$0xff]   ;;  %v6176_v32 = vld [vmem:[#allocation8 + $0x2ac] ss:$16 sps:$4 sm:$0xff]  }
 0x225   :  { %4557 = vmatprep.subr.bf16.mxu0 %v6101_v33  ;;  %4721 = vmatprep.subr.bf16.mxu1 %v6104_v35  ;;  %v6171_v33 = vld [vmem:[#allocation8 + $0x2a0] ss:$16 sps:$4 sm:$0xff]   ;;  %v6174_v35 = vld [vmem:[#allocation8 + $0x2a8] ss:$16 sps:$4 sm:$0xff]  }
 0x228   :  { %4558 = vmatpush1.bf16.msra.mxu0 %v6099_v36  ;;  %4722 = vmatpush1.bf16.msra.mxu1 %v6102_v37  ;;  %v6179_v36 = vld [vmem:[#allocation8 + $0x2c4] ss:$16 sps:$4 sm:$0xff]   ;;  %v6182_v37 = vld [vmem:[#allocation8 + $0x2cc] ss:$16 sps:$4 sm:$0xff]  }
 0x229   :  { %4559 = vmatprep.subr.bf16.mxu0 %v6107_v39  ;;  %4723 = vmatprep.subr.bf16.mxu1 %v6110_v40  ;;  %v6177_v39 = vld [vmem:[#allocation8 + $0x2c0] ss:$16 sps:$4 sm:$0xff]   ;;  %v6180_v40 = vld [vmem:[#allocation8 + $0x2c8] ss:$16 sps:$4 sm:$0xff]  }
 0x22c   :  { %4560 = vmatpush1.bf16.msra.mxu0 %v6105_v41  ;;  %4724 = vmatpush1.bf16.msra.mxu1 %v6108_v42  ;;  %v6185_v41 = vld [vmem:[#allocation8 + $0x2e4] ss:$16 sps:$4 sm:$0xff]   ;;  %v6188_v42 = vld [vmem:[#allocation8 + $0x2ec] ss:$16 sps:$4 sm:$0xff]  }
 0x22d   :  { %4561 = vmatprep.subr.bf16.mxu0 %v6113_v43  ;;  %4725 = vmatprep.subr.bf16.mxu1 %v6116_v44  ;;  %v6183_v43 = vld [vmem:[#allocation8 + $0x2e0] ss:$16 sps:$4 sm:$0xff]   ;;  %v6186_v44 = vld [vmem:[#allocation8 + $0x2e8] ss:$16 sps:$4 sm:$0xff]  }
 0x230   :  { %4562 = vmatpush1.bf16.msra.mxu0 %v6111_v45  ;;  %4726 = vmatpush1.bf16.msra.mxu1 %v6114_v46  ;;  %v6191_v45 = vld [vmem:[#allocation8 + $0x304] ss:$16 sps:$4 sm:$0xff]   ;;  %v6194_v46 = vld [vmem:[#allocation8 + $0x30c] ss:$16 sps:$4 sm:$0xff]  }
 0x231   :  { %4563 = vmatprep.subr.bf16.mxu0 %v6119_v47  ;;  %4727 = vmatprep.subr.bf16.mxu1 %v6122_v48  ;;  %v6189_v47 = vld [vmem:[#allocation8 + $0x300] ss:$16 sps:$4 sm:$0xff]   ;;  %v6192_v48 = vld [vmem:[#allocation8 + $0x308] ss:$16 sps:$4 sm:$0xff]  }
 0x234   :  { %4564 = vmatpush1.bf16.msra.mxu0 %v6117_v49  ;;  %4728 = vmatpush1.bf16.msra.mxu1 %v6120_v51  ;;  %v6197_v49 = vld [vmem:[#allocation8 + $0x324] ss:$16 sps:$4 sm:$0xff]   ;;  %v6200_v51 = vld [vmem:[#allocation8 + $0x32c] ss:$16 sps:$4 sm:$0xff]  }
 0x235   :  { %4565 = vmatprep.subr.bf16.mxu0 %v6125_v52  ;;  %4729 = vmatprep.subr.bf16.mxu1 %v6128_v53  ;;  %v6195_v52 = vld [vmem:[#allocation8 + $0x320] ss:$16 sps:$4 sm:$0xff]   ;;  %v6198_v53 = vld [vmem:[#allocation8 + $0x328] ss:$16 sps:$4 sm:$0xff]  }
 0x238   :  { %4566 = vmatpush1.bf16.msra.mxu0 %v6123_v55  ;;  %4730 = vmatpush1.bf16.msra.mxu1 %v6126_v58  ;;  %v6203_v55 = vld [vmem:[#allocation8 + $0x344] ss:$16 sps:$4 sm:$0xff]   ;;  %v6201_v58 = vld [vmem:[#allocation8 + $0x340] ss:$16 sps:$4 sm:$0xff]  }
 0x239   :  { %4567 = vmatprep.subr.bf16.mxu0 %v6131_v59  ;;  %4731 = vmatprep.subr.bf16.mxu1 %v6134_v60  ;;  %v6204_v59 = vld [vmem:[#allocation8 + $0x348] ss:$16 sps:$4 sm:$0xff]   ;;  %v6209_v60 = vld [vmem:[#allocation8 + $0x364] ss:$16 sps:$4 sm:$0xff]  }
 0x23c   :  { %4568 = vmatpush1.bf16.msra.mxu0 %v6129_v62  ;;  %4732 = vmatpush1.bf16.msra.mxu1 %v6132_v0  ;;  %v6207_v62 = vld [vmem:[#allocation8 + $0x360] ss:$16 sps:$4 sm:$0xff]   ;;  %v6215_v0 = vld [vmem:[#allocation8 + $0x384] ss:$16 sps:$4 sm:$0xff]  }
 0x23d   :  { %4569 = vmatprep.subr.bf16.mxu0 %v6137_v1  ;;  %4733 = vmatprep.subr.bf16.mxu1 %v6140_v2  ;;  %v6218_v1 = vld [vmem:[#allocation8 + $0x38c] ss:$16 sps:$4 sm:$0xff]   ;;  %v6213_v2 = vld [vmem:[#allocation8 + $0x380] ss:$16 sps:$4 sm:$0xff]  }
 0x240   :  { %4570 = vmatpush1.bf16.msra.mxu0 %v6135_v57  ;;  %4734 = vmatpush1.bf16.msra.mxu1 %v6138_v6  ;;  %v6216_v57 = vld [vmem:[#allocation8 + $0x388] ss:$16 sps:$4 sm:$0xff]   ;;  %v6224_v6 = vld [vmem:[#allocation8 + $0x3ac] ss:$16 sps:$4 sm:$0xff]  }
 0x241   :  { %4580 = vmatprep.subr.bf16.mxu0 %v6143_v25  ;;  %4744 = vmatprep.subr.bf16.mxu1 %v6146_v7  ;;  %v6219_v25 = vld [vmem:[#allocation8 + $0x3a0] ss:$16 sps:$4 sm:$0xff]   ;;  %v524_v7 = vrot.slane %v6829_v4, %v523_v12 }
 0x243   :  { %4572 = vmatmul.mubr.bf16.vlgmr.msra.gmra.mrb[8].mxu0 %v2973_v10  ;;  %4736 = vmatmul.mubr.bf16.vlgmr.msra.gmra.mrb[8].mxu1 %v2973_v10  ;;  %v6230_v10 = vld [vmem:[#allocation8 + $0x3cc] ss:$16 sps:$4 sm:$0xff]  }
 0x244   :  { %4581 = vmatpush1.bf16.msra.mxu0 %v6141_v9  ;;  %4612 = vmatprep.mubr.bf16.mxu0 %v2976_v14  ;;  %v6227_v9 = vld [vmem:[#allocation8 + $0x3c4] ss:$16 sps:$4 sm:$0xff]  }
 0x245   :  { %4745 = vmatpush1.bf16.msra.mxu1 %v6144_v23  ;;  %4776 = vmatprep.mubr.bf16.mxu1 %v2976_v14  ;;  %v6225_v23 = vld [vmem:[#allocation8 + $0x3c0] ss:$16 sps:$4 sm:$0xff]   ;;  %v6228_v14 = vld [vmem:[#allocation8 + $0x3c8] ss:$16 sps:$4 sm:$0xff]  }
 0x246   :  { %4582 = vmatprep.subr.bf16.mxu0 %v6149_v13  ;;  %4746 = vmatprep.subr.bf16.mxu1 %v6152_v15  ;;  %v5965_v13 = vadd.f32 %v6836_v11, %v524_v7  ;;  %v6233_v15 = vld [vmem:[#allocation8 + $0x3e4] ss:$16 sps:$4 sm:$0xff]   ;;  %v6240_v11 = vld [vmem:[#allocation8 + $0x408] ss:$16 sps:$4 sm:$0xff]   ;;  %v6308_v7 = vld [vmem:[#allocation8 + $0x56c] ss:$16 sps:$4 sm:$0xff]  }
 0x248   :  { %4583 = vmatpush1.bf16.msra.mxu0 %v6147_v34  ;;  %v6236_v34 = vld [vmem:[#allocation8 + $0x3ec] ss:$16 sps:$4 sm:$0xff]  }
 0x249   :  { %4747 = vmatpush1.bf16.msra.mxu1 %v6150_v16  ;;  %4584 = vmatprep.subr.bf16.mxu0 %v6155_v17  ;;  %v6231_v16 = vld [vmem:[#allocation8 + $0x3e0] ss:$16 sps:$4 sm:$0xff]   ;;  %v2967_v17 = vmax.f32 %v5965_v13, 0.0 }
 0x24a   :  { %4748 = vmatprep.subr.bf16.mxu1 %v6158_v18  ;;  %v6234_v18 = vld [vmem:[#allocation8 + $0x3e8] ss:$16 sps:$4 sm:$0xff]   ;;  %v6309_v13 = vld [vmem:[#allocation8 + $0x580] ss:$16 sps:$4 sm:$0xff]  }
 0x24c   :  { %4585 = vmatpush1.bf16.msra.mxu0 %v6153_v19  ;;  %v6239_v19 = vld [vmem:[#allocation8 + $0x404] ss:$16 sps:$4 sm:$0xff]  }
 0x24d   :  { %4749 = vmatpush1.bf16.msra.mxu1 %v6156_v20  ;;  %4586 = vmatprep.subr.bf16.mxu0 %v6161_v21  ;;  %v6242_v20 = vld [vmem:[#allocation8 + $0x40c] ss:$16 sps:$4 sm:$0xff]   ;;  %v6237_v21 = vld [vmem:[#allocation8 + $0x400] ss:$16 sps:$4 sm:$0xff]  }
 0x24e   :  { %4750 = vmatprep.subr.bf16.mxu1 %v6164_v22  ;;  %v2975_v22 = vpack.c.bf16 %v2967_v17, %v2967_v17  ;;  %v6318_v17 = vld [vmem:[#allocation8 + $0x5a8] ss:$16 sps:$4 sm:$0xff]  }
 0x250   :  { %4587 = vmatpush1.bf16.msra.mxu0 %v6159_v24  ;;  %v6245_v24 = vld [vmem:[#allocation8 + $0x424] ss:$16 sps:$4 sm:$0xff]  }
 0x251   :  { %4751 = vmatpush1.bf16.msra.mxu1 %v6162_v26  ;;  %4588 = vmatprep.subr.bf16.mxu0 %v6167_v27  ;;  %v6248_v26 = vld [vmem:[#allocation8 + $0x42c] ss:$16 sps:$4 sm:$0xff]   ;;  %v6243_v27 = vld [vmem:[#allocation8 + $0x420] ss:$16 sps:$4 sm:$0xff]  }
 0x252   :  { %4752 = vmatprep.subr.bf16.mxu1 %v6170_v28  ;;  %v6246_v28 = vld [vmem:[#allocation8 + $0x428] ss:$16 sps:$4 sm:$0xff]  }
 0x254   :  { %4589 = vmatpush1.bf16.msra.mxu0 %v6165_v29  ;;  %v6251_v29 = vld [vmem:[#allocation8 + $0x444] ss:$16 sps:$4 sm:$0xff]  }
 0x255   :  { %4753 = vmatpush1.bf16.msra.mxu1 %v6168_v30  ;;  %4590 = vmatprep.subr.bf16.mxu0 %v6173_v31  ;;  %v6254_v30 = vld [vmem:[#allocation8 + $0x44c] ss:$16 sps:$4 sm:$0xff]   ;;  %v6249_v31 = vld [vmem:[#allocation8 + $0x440] ss:$16 sps:$4 sm:$0xff]  }
 0x256   :  { %4754 = vmatprep.subr.bf16.mxu1 %v6176_v32  ;;  %v6252_v32 = vld [vmem:[#allocation8 + $0x448] ss:$16 sps:$4 sm:$0xff]  }
 0x258   :  { %4591 = vmatpush1.bf16.msra.mxu0 %v6171_v33  ;;  %v6257_v33 = vld [vmem:[#allocation8 + $0x464] ss:$16 sps:$4 sm:$0xff]  }
 0x259   :  { %4755 = vmatpush1.bf16.msra.mxu1 %v6174_v35  ;;  %4592 = vmatprep.subr.bf16.mxu0 %v6179_v36  ;;  %v6260_v35 = vld [vmem:[#allocation8 + $0x46c] ss:$16 sps:$4 sm:$0xff]   ;;  %v6255_v36 = vld [vmem:[#allocation8 + $0x460] ss:$16 sps:$4 sm:$0xff]  }
 0x25a   :  { %4756 = vmatprep.subr.bf16.mxu1 %v6182_v37  ;;  %v6258_v37 = vld [vmem:[#allocation8 + $0x468] ss:$16 sps:$4 sm:$0xff]  }
 0x25c   :  { %4593 = vmatpush1.bf16.msra.mxu0 %v6177_v39  ;;  %v6263_v39 = vld [vmem:[#allocation8 + $0x484] ss:$16 sps:$4 sm:$0xff]  }
 0x25d   :  { %4757 = vmatpush1.bf16.msra.mxu1 %v6180_v40  ;;  %4594 = vmatprep.subr.bf16.mxu0 %v6185_v41  ;;  %v6266_v40 = vld [vmem:[#allocation8 + $0x48c] ss:$16 sps:$4 sm:$0xff]   ;;  %v6261_v41 = vld [vmem:[#allocation8 + $0x480] ss:$16 sps:$4 sm:$0xff]  }
 0x25e   :  { %4758 = vmatprep.subr.bf16.mxu1 %v6188_v42  ;;  %v6264_v42 = vld [vmem:[#allocation8 + $0x488] ss:$16 sps:$4 sm:$0xff]  }
 0x260   :  { %4595 = vmatpush1.bf16.msra.mxu0 %v6183_v43  ;;  %v6269_v43 = vld [vmem:[#allocation8 + $0x4a4] ss:$16 sps:$4 sm:$0xff]  }
 0x261   :  { %4759 = vmatpush1.bf16.msra.mxu1 %v6186_v44  ;;  %4596 = vmatprep.subr.bf16.mxu0 %v6191_v45  ;;  %v6272_v44 = vld [vmem:[#allocation8 + $0x4ac] ss:$16 sps:$4 sm:$0xff]   ;;  %v6267_v45 = vld [vmem:[#allocation8 + $0x4a0] ss:$16 sps:$4 sm:$0xff]  }
 0x262   :  { %4760 = vmatprep.subr.bf16.mxu1 %v6194_v46  ;;  %v6270_v46 = vld [vmem:[#allocation8 + $0x4a8] ss:$16 sps:$4 sm:$0xff]  }
 0x264   :  { %4597 = vmatpush1.bf16.msra.mxu0 %v6189_v47  ;;  %v6275_v47 = vld [vmem:[#allocation8 + $0x4c4] ss:$16 sps:$4 sm:$0xff]  }
 0x265   :  { %4761 = vmatpush1.bf16.msra.mxu1 %v6192_v48  ;;  %4598 = vmatprep.subr.bf16.mxu0 %v6197_v49  ;;  %v6278_v48 = vld [vmem:[#allocation8 + $0x4cc] ss:$16 sps:$4 sm:$0xff]   ;;  %v6273_v49 = vld [vmem:[#allocation8 + $0x4c0] ss:$16 sps:$4 sm:$0xff]  }
 0x266   :  { %4762 = vmatprep.subr.bf16.mxu1 %v6200_v51  ;;  %v6276_v51 = vld [vmem:[#allocation8 + $0x4c8] ss:$16 sps:$4 sm:$0xff]  }
 0x268   :  { %4599 = vmatpush1.bf16.msra.mxu0 %v6195_v52  ;;  %v6281_v52 = vld [vmem:[#allocation8 + $0x4e4] ss:$16 sps:$4 sm:$0xff]  }
 0x269   :  { %4763 = vmatpush1.bf16.msra.mxu1 %v6198_v53  ;;  %4600 = vmatprep.subr.bf16.mxu0 %v6203_v55  ;;  %v6284_v53 = vld [vmem:[#allocation8 + $0x4ec] ss:$16 sps:$4 sm:$0xff]   ;;  %v6279_v55 = vld [vmem:[#allocation8 + $0x4e0] ss:$16 sps:$4 sm:$0xff]  }
 0x26a   :  { %4764 = vmatprep.subr.bf16.mxu1 %v6206_v56  ;;  %v6282_v56 = vld [vmem:[#allocation8 + $0x4e8] ss:$16 sps:$4 sm:$0xff]  }
 0x26c   :  { %4601 = vmatpush1.bf16.msra.mxu0 %v6201_v58  ;;  %v6287_v58 = vld [vmem:[#allocation8 + $0x504] ss:$16 sps:$4 sm:$0xff]  }
 0x26d   :  { %4765 = vmatpush1.bf16.msra.mxu1 %v6204_v59  ;;  %4602 = vmatprep.subr.bf16.mxu0 %v6209_v60  ;;  %v6290_v59 = vld [vmem:[#allocation8 + $0x50c] ss:$16 sps:$4 sm:$0xff]   ;;  %v6285_v60 = vld [vmem:[#allocation8 + $0x500] ss:$16 sps:$4 sm:$0xff]  }
 0x26e   :  { %4766 = vmatprep.subr.bf16.mxu1 %v6212_v61  ;;  %v6288_v61 = vld [vmem:[#allocation8 + $0x508] ss:$16 sps:$4 sm:$0xff]  }
 0x270   :  { %4603 = vmatpush1.bf16.msra.mxu0 %v6207_v62  ;;  %v6293_v62 = vld [vmem:[#allocation8 + $0x524] ss:$16 sps:$4 sm:$0xff]  }
 0x271   :  { %4767 = vmatpush1.bf16.msra.mxu1 %v6210_v63  ;;  %4604 = vmatprep.subr.bf16.mxu0 %v6215_v0  ;;  %v6296_v63 = vld [vmem:[#allocation8 + $0x52c] ss:$16 sps:$4 sm:$0xff]   ;;  %v6291_v0 = vld [vmem:[#allocation8 + $0x520] ss:$16 sps:$4 sm:$0xff]  }
 0x272   :  { %4768 = vmatprep.subr.bf16.mxu1 %v6218_v1  ;;  %v6294_v1 = vld [vmem:[#allocation8 + $0x528] ss:$16 sps:$4 sm:$0xff]  }
 0x274   :  { %4605 = vmatpush1.bf16.msra.mxu0 %v6213_v2  ;;  %v6299_v2 = vld [vmem:[#allocation8 + $0x544] ss:$16 sps:$4 sm:$0xff]  }
 0x275   :  { %4769 = vmatpush1.bf16.msra.mxu1 %v6216_v57  ;;  %4606 = vmatprep.subr.bf16.mxu0 %v6221_v5  ;;  %v6302_v57 = vld [vmem:[#allocation8 + $0x54c] ss:$16 sps:$4 sm:$0xff]   ;;  %v6297_v5 = vld [vmem:[#allocation8 + $0x540] ss:$16 sps:$4 sm:$0xff]  }
 0x276   :  { %4770 = vmatprep.subr.bf16.mxu1 %v6224_v6  ;;  %v6300_v6 = vld [vmem:[#allocation8 + $0x548] ss:$16 sps:$4 sm:$0xff]  }
 0x278   :  { %4607 = vmatpush1.bf16.msra.mxu0 %v6219_v25  ;;  %v6305_v25 = vld [vmem:[#allocation8 + $0x564] ss:$16 sps:$4 sm:$0xff]  }
 0x279   :  { %4771 = vmatpush1.bf16.msra.mxu1 %v6222_v8  ;;  %4608 = vmatprep.subr.bf16.mxu0 %v6227_v9  ;;  %v6303_v8 = vld [vmem:[#allocation8 + $0x560] ss:$16 sps:$4 sm:$0xff]   ;;  %v6306_v9 = vld [vmem:[#allocation8 + $0x568] ss:$16 sps:$4 sm:$0xff]  }
 0x27a   :  { %4772 = vmatprep.subr.bf16.mxu1 %v6230_v10  ;;  %v6311_v10 = vld [vmem:[#allocation8 + $0x584] ss:$16 sps:$4 sm:$0xff]  }
 0x27c   :  { %4609 = vmatpush1.bf16.msra.mxu0 %v6225_v23  ;;  %v6314_v23 = vld [vmem:[#allocation8 + $0x58c] ss:$16 sps:$4 sm:$0xff]  }
 0x27d   :  { %4773 = vmatpush1.bf16.msra.mxu1 %v6228_v14  ;;  %4610 = vmatprep.subr.bf16.mxu0 %v6233_v15  ;;  %v6312_v14 = vld [vmem:[#allocation8 + $0x588] ss:$16 sps:$4 sm:$0xff]   ;;  %v6317_v15 = vld [vmem:[#allocation8 + $0x5a4] ss:$16 sps:$4 sm:$0xff]  }
 0x27e   :  { %4774 = vmatprep.subr.bf16.mxu1 %v6236_v34  ;;  %v6320_v34 = vld [vmem:[#allocation8 + $0x5ac] ss:$16 sps:$4 sm:$0xff]  }
 0x280   :  { %4611 = vmatpush1.bf16.msra.mxu0 %v6231_v16  ;;  %v6315_v16 = vld [vmem:[#allocation8 + $0x5a0] ss:$16 sps:$4 sm:$0xff]  }
 0x281   :  { %4775 = vmatpush1.bf16.msra.mxu1 %v6234_v18  ;;  %4621 = vmatprep.subr.bf16.mxu0 %v6239_v19  ;;  %v6323_v18 = vld [vmem:[#allocation8 + $0x5c4] ss:$16 sps:$4 sm:$0xff]   ;;  %v6326_v19 = vld [vmem:[#allocation8 + $0x5cc] ss:$16 sps:$4 sm:$0xff]  }
 0x282   :  { %4785 = vmatprep.subr.bf16.mxu1 %v6242_v20  ;;  %v6321_v20 = vld [vmem:[#allocation8 + $0x5c0] ss:$16 sps:$4 sm:$0xff]  }
 0x283   :  { %4613 = vmatmul.mubr.bf16.vlgmr.msra.gmra.mrb[8].mxu0 %v2975_v22 }
 0x284   :  { %4777 = vmatmul.mubr.bf16.vlgmr.msra.gmra.mrb[8].mxu1 %v2975_v22  ;;  %4622 = vmatpush1.bf16.msra.mxu0 %v6237_v21  ;;  %v6324_v21 = vld [vmem:[#allocation8 + $0x5c8] ss:$16 sps:$4 sm:$0xff]   ;;  %v6329_v22 = vld [vmem:[#allocation8 + $0x5e4] ss:$16 sps:$4 sm:$0xff]  }
 0x285   :  { %4786 = vmatpush1.bf16.msra.mxu1 %v6240_v11  ;;  %4623 = vmatprep.subr.bf16.mxu0 %v6245_v24  ;;  %v6332_v11 = vld [vmem:[#allocation8 + $0x5ec] ss:$16 sps:$4 sm:$0xff]   ;;  %v6327_v24 = vld [vmem:[#allocation8 + $0x5e0] ss:$16 sps:$4 sm:$0xff]  }
 0x286   :  { %4787 = vmatprep.subr.bf16.mxu1 %v6248_v26  ;;  %v6330_v26 = vld [vmem:[#allocation8 + $0x5e8] ss:$16 sps:$4 sm:$0xff]  }
 0x288   :  { %4624 = vmatpush1.bf16.msra.mxu0 %v6243_v27  ;;  %v6335_v27 = vld [vmem:[#allocation8 + $0x604] ss:$16 sps:$4 sm:$0xff]  }
 0x289   :  { %4788 = vmatpush1.bf16.msra.mxu1 %v6246_v28  ;;  %4625 = vmatprep.subr.bf16.mxu0 %v6251_v29  ;;  %v6338_v28 = vld [vmem:[#allocation8 + $0x60c] ss:$16 sps:$4 sm:$0xff]   ;;  %v531_v29 = vsub.s32 4, %v6826_v38 }
 0x28a   :  { %4789 = vmatprep.subr.bf16.mxu1 %v6254_v30  ;;  %v535_v30 = vsub.s32 5, %v6826_v38 }
 0x28c   :  { %4626 = vmatpush1.bf16.msra.mxu0 %v6249_v31  ;;  %v543_v31 = vsub.s32 7, %v6826_v38 }
 0x28d   :  { %4790 = vmatpush1.bf16.msra.mxu1 %v6252_v32  ;;  %4627 = vmatprep.subr.bf16.mxu0 %v6257_v33  ;;  %v532_v32 = vrot.slane %v6829_v4, %v531_v29  ;;  %v536_v33 = vrot.slane %v6829_v4, %v535_v30  ;;  %v6387_v29 = vld [vmem:[#allocation8 + $0x720] ss:$16 sps:$4 sm:$0xff]   ;;  %v6390_v30 = vld [vmem:[#allocation8 + $0x728] ss:$16 sps:$4 sm:$0xff]  }
 0x28e   :  { %4791 = vmatprep.subr.bf16.mxu1 %v6260_v35  ;;  %v544_v35 = vrot.slane %v6829_v4, %v543_v31  ;;  %v6341_v4 = vld [vmem:[#allocation8 + $0x624] ss:$16 sps:$4 sm:$0xff]  }
 0x28f   :  { %v6395_v31 = vld [vmem:[#allocation8 + $0x744] ss:$16 sps:$4 sm:$0xff]  }
 0x290   :  { %4628 = vmatpush1.bf16.msra.mxu0 %v6255_v36 }
 0x291   :  { %4792 = vmatpush1.bf16.msra.mxu1 %v6258_v37  ;;  %4629 = vmatprep.subr.bf16.mxu0 %v6263_v39 }
 0x292   :  { %4793 = vmatprep.subr.bf16.mxu1 %v6266_v40 }
 0x294   :  { %4630 = vmatpush1.bf16.msra.mxu0 %v6261_v41 }
 0x295   :  { %4794 = vmatpush1.bf16.msra.mxu1 %v6264_v42  ;;  %4631 = vmatprep.subr.bf16.mxu0 %v6269_v43 }
 0x296   :  { %4795 = vmatprep.subr.bf16.mxu1 %v6272_v44 }
 0x298   :  { %4632 = vmatpush1.bf16.msra.mxu0 %v6267_v45 }
 0x299   :  { %4796 = vmatpush1.bf16.msra.mxu1 %v6270_v46  ;;  %4633 = vmatprep.subr.bf16.mxu0 %v6275_v47 }
 0x29a   :  { %4797 = vmatprep.subr.bf16.mxu1 %v6278_v48 }
 0x29c   :  { %4634 = vmatpush1.bf16.msra.mxu0 %v6273_v49 }
 0x29d   :  { %4798 = vmatpush1.bf16.msra.mxu1 %v6276_v51  ;;  %4635 = vmatprep.subr.bf16.mxu0 %v6281_v52 }
 0x29e   :  { %4799 = vmatprep.subr.bf16.mxu1 %v6284_v53  ;;  %v6333_v53 = vld [vmem:[#allocation8 + $0x600] ss:$16 sps:$4 sm:$0xff]  }
 0x2a0   :  { %4636 = vmatpush1.bf16.msra.mxu0 %v6279_v55  ;;  %v6336_v55 = vld [vmem:[#allocation8 + $0x608] ss:$16 sps:$4 sm:$0xff]  }
 0x2a1   :  { %4800 = vmatpush1.bf16.msra.mxu1 %v6282_v56  ;;  %4637 = vmatprep.subr.bf16.mxu0 %v6287_v58  ;;  %v6344_v58 = vld [vmem:[#allocation8 + $0x62c] ss:$16 sps:$4 sm:$0xff]  }
 0x2a2   :  { %4801 = vmatprep.subr.bf16.mxu1 %v6290_v59 }
 0x2a4   :  { %4638 = vmatpush1.bf16.msra.mxu0 %v6285_v60  ;;  %v6339_v60 = vld [vmem:[#allocation8 + $0x620] ss:$16 sps:$4 sm:$0xff]  }
 0x2a5   :  { %4802 = vmatpush1.bf16.msra.mxu1 %v6288_v61  ;;  %4639 = vmatprep.subr.bf16.mxu0 %v6293_v62  ;;  %v6342_v61 = vld [vmem:[#allocation8 + $0x628] ss:$16 sps:$4 sm:$0xff]   ;;  %v6347_v62 = vld [vmem:[#allocation8 + $0x644] ss:$16 sps:$4 sm:$0xff]  }
 0x2a6   :  { %4803 = vmatprep.subr.bf16.mxu1 %v6296_v63  ;;  %v6350_v63 = vld [vmem:[#allocation8 + $0x64c] ss:$16 sps:$4 sm:$0xff]  }
 0x2a8   :  { %4640 = vmatpush1.bf16.msra.mxu0 %v6291_v0  ;;  %v6345_v0 = vld [vmem:[#allocation8 + $0x640] ss:$16 sps:$4 sm:$0xff]  }
 0x2a9   :  { %4804 = vmatpush1.bf16.msra.mxu1 %v6294_v1  ;;  %4641 = vmatprep.subr.bf16.mxu0 %v6299_v2  ;;  %v6348_v1 = vld [vmem:[#allocation8 + $0x648] ss:$16 sps:$4 sm:$0xff]   ;;  %v6353_v2 = vld [vmem:[#allocation8 + $0x664] ss:$16 sps:$4 sm:$0xff]  }
 0x2aa   :  { %4805 = vmatprep.subr.bf16.mxu1 %v6302_v57  ;;  %v6356_v57 = vld [vmem:[#allocation8 + $0x66c] ss:$16 sps:$4 sm:$0xff]  }
 0x2ac   :  { %4642 = vmatpush1.bf16.msra.mxu0 %v6297_v5  ;;  %v6351_v5 = vld [vmem:[#allocation8 + $0x660] ss:$16 sps:$4 sm:$0xff]  }
 0x2ad   :  { %4806 = vmatpush1.bf16.msra.mxu1 %v6300_v6  ;;  %4643 = vmatprep.subr.bf16.mxu0 %v6305_v25  ;;  %v6354_v6 = vld [vmem:[#allocation8 + $0x668] ss:$16 sps:$4 sm:$0xff]   ;;  %v6359_v25 = vld [vmem:[#allocation8 + $0x684] ss:$16 sps:$4 sm:$0xff]  }
 0x2ae   :  { %4807 = vmatprep.subr.bf16.mxu1 %v6308_v7  ;;  %v6362_v7 = vld [vmem:[#allocation8 + $0x68c] ss:$16 sps:$4 sm:$0xff]  }
 0x2b0   :  { %4644 = vmatpush1.bf16.msra.mxu0 %v6303_v8  ;;  %v6357_v8 = vld [vmem:[#allocation8 + $0x680] ss:$16 sps:$4 sm:$0xff]  }
 0x2b1   :  { %4808 = vmatpush1.bf16.msra.mxu1 %v6306_v9  ;;  %4645 = vmatprep.subr.bf16.mxu0 %v6311_v10  ;;  %v6360_v9 = vld [vmem:[#allocation8 + $0x688] ss:$16 sps:$4 sm:$0xff]   ;;  %v6365_v10 = vld [vmem:[#allocation8 + $0x6a4] ss:$16 sps:$4 sm:$0xff]  }
 0x2b2   :  { %4809 = vmatprep.subr.bf16.mxu1 %v6314_v23  ;;  %v6368_v23 = vld [vmem:[#allocation8 + $0x6ac] ss:$16 sps:$4 sm:$0xff]  }
 0x2b4   :  { %4646 = vmatpush1.bf16.msra.mxu0 %v6309_v13  ;;  %v6363_v13 = vld [vmem:[#allocation8 + $0x6a0] ss:$16 sps:$4 sm:$0xff]  }
 0x2b5   :  { %4810 = vmatpush1.bf16.msra.mxu1 %v6312_v14  ;;  %4647 = vmatprep.subr.bf16.mxu0 %v6317_v15  ;;  %v6366_v14 = vld [vmem:[#allocation8 + $0x6a8] ss:$16 sps:$4 sm:$0xff]   ;;  %v6371_v15 = vld [vmem:[#allocation8 + $0x6c4] ss:$16 sps:$4 sm:$0xff]  }
 0x2b6   :  { %4811 = vmatprep.subr.bf16.mxu1 %v6320_v34  ;;  %v6374_v34 = vld [vmem:[#allocation8 + $0x6cc] ss:$16 sps:$4 sm:$0xff]  }
 0x2b8   :  { %4648 = vmatpush1.bf16.msra.mxu0 %v6315_v16  ;;  %v6369_v16 = vld [vmem:[#allocation8 + $0x6c0] ss:$16 sps:$4 sm:$0xff]  }
 0x2b9   :  { %4812 = vmatpush1.bf16.msra.mxu1 %v6318_v17  ;;  %4649 = vmatprep.subr.bf16.mxu0 %v6323_v18  ;;  %v6372_v17 = vld [vmem:[#allocation8 + $0x6c8] ss:$16 sps:$4 sm:$0xff]   ;;  %v6377_v18 = vld [vmem:[#allocation8 + $0x6e4] ss:$16 sps:$4 sm:$0xff]  }
 0x2ba   :  { %4813 = vmatprep.subr.bf16.mxu1 %v6326_v19  ;;  %v6380_v19 = vld [vmem:[#allocation8 + $0x6ec] ss:$16 sps:$4 sm:$0xff]  }
 0x2bc   :  { %4650 = vmatpush1.bf16.msra.mxu0 %v6321_v20  ;;  %v6375_v20 = vld [vmem:[#allocation8 + $0x6e0] ss:$16 sps:$4 sm:$0xff]  }
 0x2bd   :  { %4814 = vmatpush1.bf16.msra.mxu1 %v6324_v21  ;;  %4651 = vmatprep.subr.bf16.mxu0 %v6329_v22  ;;  %v6378_v21 = vld [vmem:[#allocation8 + $0x6e8] ss:$16 sps:$4 sm:$0xff]   ;;  %v6383_v22 = vld [vmem:[#allocation8 + $0x704] ss:$16 sps:$4 sm:$0xff]  }
 0x2be   :  { %4815 = vmatprep.subr.bf16.mxu1 %v6332_v11  ;;  %v6386_v11 = vld [vmem:[#allocation8 + $0x70c] ss:$16 sps:$4 sm:$0xff]  }
 0x2c0   :  { %4652 = vmatpush1.bf16.msra.mxu0 %v6327_v24  ;;  %v6381_v24 = vld [vmem:[#allocation8 + $0x700] ss:$16 sps:$4 sm:$0xff]  }
 0x2c1   :  { %4816 = vmatpush1.bf16.msra.mxu1 %v6330_v26  ;;  %4662 = vmatprep.subr.bf16.mxu0 %v6335_v27  ;;  %v6384_v26 = vld [vmem:[#allocation8 + $0x708] ss:$16 sps:$4 sm:$0xff]   ;;  %v6389_v27 = vld [vmem:[#allocation8 + $0x724] ss:$16 sps:$4 sm:$0xff]  }
 0x2c2   :  { %4826 = vmatprep.subr.bf16.mxu1 %v6338_v28  ;;  %v6392_v28 = vld [vmem:[#allocation8 + $0x72c] ss:$16 sps:$4 sm:$0xff]  }
 0x2d6   :  { %v2835_v36 = vpop.f32.mrb[4].mxu0  ;;  %v6861_v39 = vpop.f32.mrb[4].mxu1 }
 0x2d7   :  { %v5967_v37 = vadd.f32 %v2835_v36, %v532_v32  ;;  %v2837_v40 = vpop.f32.mrb[5].mxu0  ;;  %v2960_v42 = vpop.f32.mrb[5].mxu1  ;;  %v6398_v32 = vld [vmem:[#allocation8 + $0x74c] ss:$16 sps:$4 sm:$0xff]   ;;  %v6401_v36 = vld [vmem:[#allocation8 + $0x764] ss:$16 sps:$4 sm:$0xff]  }
 0x2d8   :  { %v5968_v41 = vadd.f32 %v2837_v40, %v536_v33  ;;  %v2839_v43 = vpop.f32.mrb[6].mxu0  ;;  %v5970_v45 = vadd.f32 %v2960_v42, %v544_v35  ;;  %v2962_v46 = vpop.f32.mrb[6].mxu1  ;;  %v6393_v33 = vld [vmem:[#allocation8 + $0x740] ss:$16 sps:$4 sm:$0xff]   ;;  %v6396_v35 = vld [vmem:[#allocation8 + $0x748] ss:$16 sps:$4 sm:$0xff]  }
 0x2d9   :  { %v2969_v44 = vmax.f32 %v5967_v37, 0.0  ;;  %v2840_v47 = vpop.f32.mrb[7].mxu0  ;;  %v2963_v49 = vpop.f32.mrb[7].mxu1  ;;  %v6404_v37 = vld [vmem:[#allocation8 + $0x76c] ss:$16 sps:$4 sm:$0xff]   ;;  %v539_v46 = vsub.s32 6, %v6826_v38 }
 0x2da   :  { %v2970_v48 = vmax.f32 %v5968_v41, 0.0  ;;  %v2972_v51 = vmax.f32 %v5970_v45, 0.0  ;;  %v6399_v40 = vld [vmem:[#allocation8 + $0x760] ss:$16 sps:$4 sm:$0xff]   ;;  %v6402_v41 = vld [vmem:[#allocation8 + $0x768] ss:$16 sps:$4 sm:$0xff]  }
 0x2db   :  { %v2977_v56 = vpack.c.bf16 %v2969_v44, %v2969_v44  ;;  %v6407_v42 = vld [vmem:[#allocation8 + $0x784] ss:$16 sps:$4 sm:$0xff]   ;;  %v6410_v43 = vld [vmem:[#allocation8 + $0x78c] ss:$16 sps:$4 sm:$0xff]   ;;  %v6405_v44 = vld [vmem:[#allocation8 + $0x780] ss:$16 sps:$4 sm:$0xff]  }
 0x2dc   :  { %v2978_v52 = vpack.c.bf16 %v2970_v48, %v2970_v48  ;;  %v2980_v59 = vpack.c.bf16 %v2972_v51, %v2972_v51  ;;  %v6408_v45 = vld [vmem:[#allocation8 + $0x788] ss:$16 sps:$4 sm:$0xff]   ;;  %v6413_v47 = vld [vmem:[#allocation8 + $0x7a4] ss:$16 sps:$4 sm:$0xff]   ;;  %v6416_v48 = vld [vmem:[#allocation8 + $0x7ac] ss:$16 sps:$4 sm:$0xff]  }
 0x2dd   :  { %v6411_v49 = vld [vmem:[#allocation8 + $0x7a0] ss:$16 sps:$4 sm:$0xff]   ;;  %v6414_v51 = vld [vmem:[#allocation8 + $0x7a8] ss:$16 sps:$4 sm:$0xff]  }
 0x2de   :  { %4653 = vmatprep.mubr.bf16.mxu0 %v2978_v52  ;;  %4817 = vmatprep.mubr.bf16.mxu1 %v2978_v52  ;;  %v6465_v52 = vld [vmem:[#allocation7] sm:$0xff] }
 0x2df   :  { %4654 = vmatmul.mubr.bf16.vlgmr.msra.gmra.mrb[8].mxu0 %v2977_v56  ;;  %4818 = vmatmul.mubr.bf16.vlgmr.msra.gmra.mrb[8].mxu1 %v2977_v56  ;;  %v6422_v56 = vld [vmem:[#allocation8 + $0x7cc] ss:$16 sps:$4 sm:$0xff]  }
 0x2e0   :  { %4663 = vmatpush1.bf16.msra.mxu0 %v6333_v53  ;;  %4827 = vmatpush1.bf16.msra.mxu1 %v6336_v55  ;;  %v540_v53 = vrot.slane %v6465_v52, %v539_v46  ;;  %v6419_v55 = vld [vmem:[#allocation8 + $0x7c4] ss:$16 sps:$4 sm:$0xff]  }
 0x2e1   :  { %4694 = vmatprep.mubr.bf16.mxu0 %v2980_v59  ;;  %4858 = vmatprep.mubr.bf16.mxu1 %v2980_v59 }
 0x2e2   :  { %4664 = vmatprep.subr.bf16.mxu0 %v6341_v4  ;;  %4828 = vmatprep.subr.bf16.mxu1 %v6344_v58  ;;  %v6417_v4 = vld [vmem:[#allocation8 + $0x7c0] ss:$16 sps:$4 sm:$0xff]   ;;  %v6420_v58 = vld [vmem:[#allocation8 + $0x7c8] ss:$16 sps:$4 sm:$0xff]   ;;  %v5969_v59 = vadd.f32 %v6861_v39, %v540_v53 }
 0x2e3   :  { %v6433_v39 = vld [vmem:[#allocation11 + $0x48] sm:$0xff]  }
 0x2e4   :  { %4665 = vmatpush1.bf16.msra.mxu0 %v6339_v60  ;;  %4829 = vmatpush1.bf16.msra.mxu1 %v6342_v61  ;;  %v6425_v60 = vld [vmem:[#allocation8 + $0x7e4] ss:$16 sps:$4 sm:$0xff]   ;;  %v6428_v61 = vld [vmem:[#allocation8 + $0x7ec] ss:$16 sps:$4 sm:$0xff]  }
 0x2e5   :  { %4666 = vmatprep.subr.bf16.mxu0 %v6347_v62  ;;  %4830 = vmatprep.subr.bf16.mxu1 %v6350_v63  ;;  %v6423_v62 = vld [vmem:[#allocation8 + $0x7e0] ss:$16 sps:$4 sm:$0xff]   ;;  %v6426_v63 = vld [vmem:[#allocation8 + $0x7e8] ss:$16 sps:$4 sm:$0xff]  }
 0x2e8   :  { %4667 = vmatpush1.bf16.msra.mxu0 %v6345_v0  ;;  %4831 = vmatpush1.bf16.msra.mxu1 %v6348_v1  ;;  %v2971_v0 = vmax.f32 %v5969_v59, 0.0  ;;  %v6429_v1 = vld [vmem:[#allocation11 + $0x40] sm:$0xff]  }
 0x2e9   :  { %4668 = vmatprep.subr.bf16.mxu0 %v6353_v2  ;;  %4832 = vmatprep.subr.bf16.mxu1 %v6356_v57  ;;  %v6430_v2 = vld [vmem:[#allocation11 + $0xc0] sm:$0xff]  }
 0x2ea   :  { %v6431_v57 = vld [vmem:[#allocation11] sm:$0xff]  }
 0x2ec   :  { %4669 = vmatpush1.bf16.msra.mxu0 %v6351_v5  ;;  %4833 = vmatpush1.bf16.msra.mxu1 %v6354_v6  ;;  %v6432_v5 = vld [vmem:[#allocation11 + $0x80] sm:$0xff]   ;;  %v2979_v6 = vpack.c.bf16 %v2971_v0, %v2971_v0 }
 0x2ed   :  { %4670 = vmatprep.subr.bf16.mxu0 %v6359_v25  ;;  %4834 = vmatprep.subr.bf16.mxu1 %v6362_v7  ;;  %v6434_v25 = vld [vmem:[#allocation11 + $0xc8] sm:$0xff]  }
 0x2ee   :  { %v6435_v7 = vld [vmem:[#allocation11 + $0x8] sm:$0xff]  }
 0x2f0   :  { %4671 = vmatpush1.bf16.msra.mxu0 %v6357_v8  ;;  %4835 = vmatpush1.bf16.msra.mxu1 %v6360_v9  ;;  %v6436_v8 = vld [vmem:[#allocation11 + $0x88] sm:$0xff]   ;;  %v6437_v9 = vld [vmem:[#allocation11 + $0x50] sm:$0xff]  }
 0x2f1   :  { %4672 = vmatprep.subr.bf16.mxu0 %v6365_v10  ;;  %4836 = vmatprep.subr.bf16.mxu1 %v6368_v23  ;;  %v6438_v10 = vld [vmem:[#allocation11 + $0xd0] sm:$0xff]  }
 0x2f2   :  { %v6439_v23 = vld [vmem:[#allocation11 + $0x10] sm:$0xff]  }
 0x2f4   :  { %4673 = vmatpush1.bf16.msra.mxu0 %v6363_v13  ;;  %4837 = vmatpush1.bf16.msra.mxu1 %v6366_v14  ;;  %v6440_v13 = vld [vmem:[#allocation11 + $0x90] sm:$0xff]   ;;  %v6441_v14 = vld [vmem:[#allocation11 + $0x58] sm:$0xff]  }
 0x2f5   :  { %4674 = vmatprep.subr.bf16.mxu0 %v6371_v15  ;;  %4838 = vmatprep.subr.bf16.mxu1 %v6374_v34  ;;  %v6442_v15 = vld [vmem:[#allocation11 + $0xd8] sm:$0xff]  }
 0x2f6   :  { %v6443_v34 = vld [vmem:[#allocation11 + $0x18] sm:$0xff]  }
 0x2f8   :  { %4675 = vmatpush1.bf16.msra.mxu0 %v6369_v16  ;;  %4839 = vmatpush1.bf16.msra.mxu1 %v6372_v17  ;;  %v6444_v16 = vld [vmem:[#allocation11 + $0x98] sm:$0xff]   ;;  %v6445_v17 = vld [vmem:[#allocation11 + $0x60] sm:$0xff]  }
 0x2f9   :  { %4676 = vmatprep.subr.bf16.mxu0 %v6377_v18  ;;  %4840 = vmatprep.subr.bf16.mxu1 %v6380_v19  ;;  %v6446_v18 = vld [vmem:[#allocation11 + $0xe0] sm:$0xff]  }
 0x2fa   :  { %v6447_v19 = vld [vmem:[#allocation11 + $0x20] sm:$0xff]  }
 0x2fc   :  { %4677 = vmatpush1.bf16.msra.mxu0 %v6375_v20  ;;  %4841 = vmatpush1.bf16.msra.mxu1 %v6378_v21  ;;  %v6448_v20 = vld [vmem:[#allocation11 + $0xa0] sm:$0xff]   ;;  %v6449_v21 = vld [vmem:[#allocation11 + $0x68] sm:$0xff]  }
 0x2fd   :  { %4678 = vmatprep.subr.bf16.mxu0 %v6383_v22  ;;  %4842 = vmatprep.subr.bf16.mxu1 %v6386_v11  ;;  %v6450_v22 = vld [vmem:[#allocation11 + $0xe8] sm:$0xff]  }
 0x2fe   :  { %v6451_v11 = vld [vmem:[#allocation11 + $0x28] sm:$0xff]  }
 0x300   :  { %4679 = vmatpush1.bf16.msra.mxu0 %v6381_v24  ;;  %4843 = vmatpush1.bf16.msra.mxu1 %v6384_v26  ;;  %v6452_v24 = vld [vmem:[#allocation11 + $0xa8] sm:$0xff]   ;;  %v6453_v26 = vld [vmem:[#allocation11 + $0x70] sm:$0xff]  }
 0x301   :  { %4680 = vmatprep.subr.bf16.mxu0 %v6389_v27  ;;  %4844 = vmatprep.subr.bf16.mxu1 %v6392_v28  ;;  %v6454_v27 = vld [vmem:[#allocation11 + $0xf0] sm:$0xff]  }
 0x302   :  { %v6455_v28 = vld [vmem:[#allocation11 + $0x30] sm:$0xff]  }
 0x304   :  { %4681 = vmatpush1.bf16.msra.mxu0 %v6387_v29  ;;  %4845 = vmatpush1.bf16.msra.mxu1 %v6390_v30  ;;  %v6456_v29 = vld [vmem:[#allocation11 + $0xb0] sm:$0xff]   ;;  %v6457_v30 = vld [vmem:[#allocation11 + $0x78] sm:$0xff]  }
 0x305   :  { %4682 = vmatprep.subr.bf16.mxu0 %v6395_v31  ;;  %4846 = vmatprep.subr.bf16.mxu1 %v6398_v32  ;;  %v6458_v31 = vld [vmem:[#allocation11 + $0xf8] sm:$0xff]  }
 0x306   :  { %v6459_v32 = vld [vmem:[#allocation11 + $0x38] sm:$0xff]  }
 0x308   :  { %4683 = vmatpush1.bf16.msra.mxu0 %v6393_v33  ;;  %4847 = vmatpush1.bf16.msra.mxu1 %v6396_v35  ;;  %v6460_v33 = vld [vmem:[#allocation11 + $0xb8] sm:$0xff]  }
 0x309   :  { %4684 = vmatprep.subr.bf16.mxu0 %v6401_v36  ;;  %4848 = vmatprep.subr.bf16.mxu1 %v6404_v37  ;;  %v3237_v35 = vld [vmem:[#allocation10] sm:$0xf] }
 0x30a   :  { %v3242_v36 = vrot.slane %v3237_v35, %v515_v50  ;;  %v3250_v37 = vrot.slane %v3237_v35, %v523_v12 }
 0x30c   :  { %4685 = vmatpush1.bf16.msra.mxu0 %v6399_v40  ;;  %4849 = vmatpush1.bf16.msra.mxu1 %v6402_v41  ;;  %v3246_v40 = vrot.slane %v3237_v35, %v519_v3  ;;  %v3254_v41 = vrot.slane %v3237_v35, %v527_v54 }
 0x30d   :  { %4686 = vmatprep.subr.bf16.mxu0 %v6407_v42  ;;  %4850 = vmatprep.subr.bf16.mxu1 %v6410_v43 }
 0x310   :  { %4687 = vmatpush1.bf16.msra.mxu0 %v6405_v44  ;;  %4851 = vmatpush1.bf16.msra.mxu1 %v6408_v45 }
 0x311   :  { %4688 = vmatprep.subr.bf16.mxu0 %v6413_v47  ;;  %4852 = vmatprep.subr.bf16.mxu1 %v6416_v48 }
 0x314   :  { %4689 = vmatpush1.bf16.msra.mxu0 %v6411_v49  ;;  %4853 = vmatpush1.bf16.msra.mxu1 %v6414_v51 }
 0x315   :  { %4690 = vmatprep.subr.bf16.mxu0 %v6419_v55  ;;  %4854 = vmatprep.subr.bf16.mxu1 %v6422_v56 }
 0x318   :  { %4691 = vmatpush1.bf16.msra.mxu0 %v6417_v4  ;;  %4855 = vmatpush1.bf16.msra.mxu1 %v6420_v58 }
 0x319   :  { %4692 = vmatprep.subr.bf16.mxu0 %v6425_v60  ;;  %4856 = vmatprep.subr.bf16.mxu1 %v6428_v61  ;;  %v5886_v61 = vld [vmem:[#allocation13] ss:$0 sm:$0xff] }
 0x31c   :  { %4693 = vmatpush1.bf16.msra.mxu0 %v6423_v62  ;;  %4857 = vmatpush1.bf16.msra.mxu1 %v6426_v63 }
 0x31d   :  { %5919 = vmatprep.subr.bf16.mxu0 %v6429_v1  ;;  %5941 = vmatprep.subr.bf16.mxu1 %v6430_v2 }
 0x31f   :  { %4695 = vmatmul.mubr.bf16.vlgmr.msra.gmra.mrb[8].mxu0 %v2979_v6  ;;  %4859 = vmatmul.mubr.bf16.vlgmr.msra.gmra.mrb[8].mxu1 %v2979_v6 }
 0x320   :  { %5920 = vmatpush3.bf16.msra.mxu0 %v6431_v57  ;;  %5942 = vmatpush3.bf16.msra.mxu1 %v6432_v5 }
 0x321   :  { %5921 = vmatprep.subr.bf16.mxu0 %v6433_v39  ;;  %5943 = vmatprep.subr.bf16.mxu1 %v6434_v25 }
 0x324   :  { %5922 = vmatpush3.bf16.msra.mxu0 %v6435_v7  ;;  %5944 = vmatpush3.bf16.msra.mxu1 %v6436_v8 }
 0x325   :  { %5923 = vmatprep.subr.bf16.mxu0 %v6437_v9  ;;  %5945 = vmatprep.subr.bf16.mxu1 %v6438_v10 }
 0x328   :  { %5924 = vmatpush3.bf16.msra.mxu0 %v6439_v23  ;;  %5946 = vmatpush3.bf16.msra.mxu1 %v6440_v13 }
 0x329   :  { %5925 = vmatprep.subr.bf16.mxu0 %v6441_v14  ;;  %5947 = vmatprep.subr.bf16.mxu1 %v6442_v15 }
 0x32c   :  { %5926 = vmatpush3.bf16.msra.mxu0 %v6443_v34  ;;  %5948 = vmatpush3.bf16.msra.mxu1 %v6444_v16 }
 0x32d   :  { %5927 = vmatprep.subr.bf16.mxu0 %v6445_v17  ;;  %5949 = vmatprep.subr.bf16.mxu1 %v6446_v18 }
 0x330   :  { %5928 = vmatpush3.bf16.msra.mxu0 %v6447_v19  ;;  %5950 = vmatpush3.bf16.msra.mxu1 %v6448_v20 }
 0x331   :  { %5929 = vmatprep.subr.bf16.mxu0 %v6449_v21  ;;  %5951 = vmatprep.subr.bf16.mxu1 %v6450_v22 }
 0x334   :  { %5930 = vmatpush3.bf16.msra.mxu0 %v6451_v11  ;;  %5952 = vmatpush3.bf16.msra.mxu1 %v6452_v24 }
 0x335   :  { %5931 = vmatprep.subr.bf16.mxu0 %v6453_v26  ;;  %5953 = vmatprep.subr.bf16.mxu1 %v6454_v27 }
 0x338   :  { %5932 = vmatpush3.bf16.msra.mxu0 %v6455_v28  ;;  %5954 = vmatpush3.bf16.msra.mxu1 %v6456_v29 }
 0x339   :  { %5933 = vmatprep.subr.bf16.mxu0 %v6457_v30  ;;  %5955 = vmatprep.subr.bf16.mxu1 %v6458_v31 }
 0x33c   :  { %5934 = vmatpush3.bf16.msra.mxu0 %v6459_v32  ;;  %5956 = vmatpush3.bf16.msra.mxu1 %v6460_v33 }
 0x3f2   :  { %v4696_v42 = vpop.f32.mrb[8].mxu0  ;;  %v4860_v43 = vpop.f32.mrb[8].mxu1 }
 0x3f3   :  { %v5971_v44 = vadd.f32 %v4696_v42, %v3242_v36  ;;  %v5973_v45 = vadd.f32 %v4860_v43, %v3250_v37  ;;  %v4698_v46 = vpop.f32.mrb[9].mxu0  ;;  %v4862_v47 = vpop.f32.mrb[9].mxu1 }
 0x3f4   :  { %v5972_v48 = vadd.f32 %v4698_v46, %v3246_v40  ;;  %v5974_v49 = vadd.f32 %v4862_v47, %v3254_v41  ;;  %v4700_v51 = vpop.f32.mrb[10].mxu0  ;;  %v4864_v52 = vpop.f32.mrb[10].mxu1 }
 0x3f5   :  { %v4867_v50 = vmax.f32 %v5971_v44, 0.0  ;;  %v4869_v53 = vmax.f32 %v5973_v45, 0.0  ;;  %v4701_v55 = vpop.f32.mrb[11].mxu0  ;;  %v4865_v12 = vpop.f32.mrb[11].mxu1 }
 0x3f6   :  { %v4868_v56 = vmax.f32 %v5972_v48, 0.0  ;;  %v4870_v4 = vmax.f32 %v5974_v49, 0.0 }
 0x3f7   :  { %v4871_v38 = vpack.c.bf16 %v4867_v50, %v4867_v50  ;;  %v4873_v54 = vpack.c.bf16 %v4869_v53, %v4869_v53 }
 0x3f8   :  { %v4872_v3 = vpack.c.bf16 %v4868_v56, %v4868_v56  ;;  %v4874_v58 = vpack.c.bf16 %v4870_v4, %v4870_v4 }
 0x3fa   :  { %5170 = vmatprep.mubr.bf16.mxu0 %v4872_v3  ;;  %5210 = vmatprep.mubr.bf16.mxu1 %v4874_v58 }
 0x3fb   :  { %5171 = vmatmul.mubr.bf16.vlgmr.msra.gmra.mrb[12].mxu0 %v4871_v38  ;;  %5211 = vmatmul.mubr.bf16.vlgmr.msra.gmra.mrb[12].mxu1 %v4873_v54 }
 0x4ce   :  { %v5935_v59 = vpop.f32.mrb[12].mxu0  ;;  %v5957_v60 = vpop.f32.mrb[12].mxu1 }
 0x4cf   :  { %v5936_v62 = vpop.f32.mrb[13].mxu0  ;;  %v5958_v63 = vpop.f32.mrb[13].mxu1 }
 0x4d0   :  { %v5937_v0 = vadd.f32 %v5936_v62, %v5935_v59  ;;  %v5959_v1 = vadd.f32 %v5958_v63, %v5957_v60  ;;  %v5938_v2 = vpop.f32.mrb[14].mxu0  ;;  %v5960_v57 = vpop.f32.mrb[14].mxu1 }
 0x4d1   :  { %v5939_v5 = vpop.f32.mrb[15].mxu0  ;;  %v5961_v6 = vpop.f32.mrb[15].mxu1 }
 0x4d2   :  { %v5173_v39 = vadd.f32 %v5937_v0, %v5886_v61 }
 0x4d4   :  { %v5213_v25 = vadd.f32 %v5959_v1, %v5173_v39 }
 0x4d6   :  { %5218 = vmax.xlane.f32.xlu0 %v5213_v25 }
 0x563   :  { %v5219_v7 = vpop.xlane.xlu0 %5218 }
 0x564   :  { %v5220_v8 = vsub.f32 %v5213_v25, %v5219_v7 }
 0x566   :  { %v5221_v9 = vmul.f32 1.442695, %v5220_v8 }
 0x568   :  { %6461 = vpow2.f32 %v5221_v9 }
 0x572   :  { %v6462_v10 = vpop.eup %6461 }
 0x573   :  { %5223 = vadd.xlane.f32.xlu0 %v6462_v10 }
 0x600   :  { %v5224_v23 = vpop.xlane.xlu0 %5223 }
 0x601   :  { %6463 = vrcp.f32 %v5224_v23 }
 0x60b   :  { %v6464_v13 = vpop.eup %6463 }
 0x60c   :  { %v5226_v14 = vmul.f32 %v6464_v13, %v6462_v10 }
 0x60e   :  { %5227 = vst [vmem:[#allocation14] sm:$0xff] %v5226_v14 }
 0x60f   :  { %6631 = shalt.err (!%p6628_p4)
}
 0x610   :  { %s6632_s15 = scalar_lea.hbm %s6892_s7, 128 }
 0x611   :  { %p6633_p5 = scmp.ne.s32.totalorder %s6892_s7, %s6632_s15  ;;  %p6636_p6 = scmp.lt.u32.totalorder %s6632_s15, %s6892_s7 }
 0x613   :  { %p6638_p7 = pnand %p6636_p6, %p6633_p5 }
 0x615   :  { %6641 = shalt.err (!%p6638_p7)
}
 0x616   :  { %5237 = dma.vmem_to_hbm [thread:$0]  %s5235_s13, 128, %s6892_s7, [#allocation4]  }
 0x617   :  { %6650 = dma.done.wait [#allocation4], 128  }
 0x618   :  { %6651 = vsyncadd [#allocation4], 4294967168 }
 0x619   :  { %5241 = vsyncpa [#allocation3], 1 }
 0x61a   :  { %5242 = vsyncpa [#allocation6], 1 }
 0x61b   :  { %5243 = vsyncpa [#allocation9], 1 }
 0x61c   :  { %5244 = vsyncpa [#allocation12], 1 }
 0x61d   :  { %5245 = vsyncpa [#allocation4], 1 }

</bundles_post_ra>
